<compile_context>
chip_gen: v7x
topology: tpu7x:2x2x1
jax: 0.10.0
libtpu: 0.0.40
codegen_flags: <defaults>
</compile_context>

<pallas_src>
import functools

import jax
import jax.numpy as jnp
from jax.experimental import pallas as pl
from jax.experimental.pallas import tpu as pltpu


# ----------------------------- Pallas kernel ------------------------------ #
def convlstm_kernel(xg_ref, wh_ref, out_h_ref, out_c_ref, hpad_ref, c_ref):
    """One batch element of the ConvLSTM recurrence; T is looped in-kernel.

    xg_ref : (T, H, 4*W*Ch) f32   precomputed  bias + conv(x_t, Wx)  gate seed
    wh_ref : (3*W*Ch, 4*W*Ch)     fused banded recurrent weight (3 vert. taps)
    """
    T, H, G = xg_ref.shape
    WCh = G // 4
    R0 = 8                       # interior row offset inside hpad (8-aligned)
    HP = hpad_ref.shape[0]       # H + 16 padded rows (rows outside interior = 0)

    # h_{-1} = c_{-1} = 0; rows outside the interior of hpad stay zero forever
    # and provide the vertical "same" zero padding for the recurrent conv.
    hpad_ref[...] = jnp.zeros_like(hpad_ref)
    c_ref[...] = jnp.zeros_like(c_ref)

    def step(t, carry):
        # Vertical (ky) taps of h_{t-1}: two XLU sublane rotations of the
        # padded buffer + fixed 8-aligned slices -> no unaligned windows.
        hp = hpad_ref[...]                           # (H+16, W*Ch) f32
        h_dn = pltpu.roll(hp, 1, 0)                  # h_dn[r] == hp[r-1] (ky=0)
        h_up = pltpu.roll(hp, HP - 1, 0)             # h_up[r] == hp[r+1] (ky=2)
        # Single fused MXU matmul: K = 3*W*Ch, lane-dense (H, 4*W*Ch) result.
        h_lhs = jnp.concatenate(
            [h_dn[R0:R0 + H, :], hp[R0:R0 + H, :], h_up[R0:R0 + H, :]],
            axis=-1).astype(wh_ref.dtype)            # (H, 3*W*Ch)
        g = xg_ref[t] + jnp.dot(h_lhs, wh_ref[...],
                                preferred_element_type=jnp.float32)

        g_i = g[:, 0 * WCh:1 * WCh]                  # aligned 128-lane slices
        g_f = g[:, 1 * WCh:2 * WCh]
        g_c = g[:, 2 * WCh:3 * WCh]
        g_o = g[:, 3 * WCh:4 * WCh]

        # Gate math in f32 on lane-dense (H, W*Ch) tiles (v5e has no bf16 VPU/EUP).
        # TODO(synk): peephole Wci/Wcf/Wco elided -- the torch module creates
        # them lazily as zeros in forward(); add three lane-dense FMAs here if
        # trained peephole weights are ever needed.
        c_prev = c_ref[...]
        c_new = (jax.nn.sigmoid(g_f) * c_prev
                 + jax.nn.sigmoid(g_i) * jnp.tanh(g_c))
        h_new = jax.nn.sigmoid(g_o) * jnp.tanh(c_new)

        c_ref[...] = c_new
        hpad_ref[R0:R0 + H, :] = h_new               # feeds next step's conv
        return carry

    if T <= 8:                                       # short fixed trip count:
        for t in range(T):                           # full unroll (static idx)
            step(t, 0)
    else:
        jax.lax.fori_loop(0, T, step, 0)

    # HBM outputs are produced once, after the last timestep.
    out_h_ref[...] = hpad_ref[R0:R0 + H, :]
    out_c_ref[...] = c_ref[...]


# ------------------------------ JAX wrapper -------------------------------- #
def _band_weights(w_part, Ch, W):
    """Fold the horizontal conv taps into a banded matmul weight.

    w_part: (4*Ch, Cm, 3, 3) torch-OIHW 3x3 conv weights for one input group
            (x channels or h channels).
    Returns (3, W*Cm, 4*W*Ch): per vertical tap ky, a block-banded matrix that
    maps a row-dense input row (lane = xw*Cm + ci) to row-dense gates
    (lane = g*(W*Ch) + x*Ch + co).  Horizontal taps and the horizontal "same"
    zero padding are encoded by the band, so the kernel never shifts along W.
    NOTE: the band is O(W^2 * Cm * Ch); for large W*Ch, tile the W axis (the
    matrix is block-banded, so a W tile only needs a one-column halo).
    """
    Cm = w_part.shape[1]
    # wp[ky, kx, ci, g, co] = w_part[g*Ch + co, ci, ky, kx]
    wp = jnp.transpose(w_part.reshape(4, Ch, Cm, 3, 3), (3, 4, 2, 0, 1))
    xw = jnp.arange(W)[:, None]                     # input column
    x = jnp.arange(W)[None, :]                      # output column
    kx = xw - x + 1                                 # horizontal tap index
    valid = ((kx >= 0) & (kx <= 2)).astype(w_part.dtype)
    band = wp[:, jnp.clip(kx, 0, 2)]                # (3, W, W, Cm, 4, Ch)
    band = band * valid[None, :, :, None, None, None]
    band = jnp.transpose(band, (0, 1, 3, 4, 2, 5))  # (ky, xw, ci, g, x, co)
    return band.reshape(3, W * Cm, 4 * W * Ch)


def conv_lstm_forward(seq_nchw, w_full, b_full, mxu_dtype=jnp.bfloat16):
    """ConvLSTM forward.

    seq_nchw: (T, B, Cin, H, W)    sequence (batch_first=False, torch layout)
    w_full:   (4*Ch, Cin+Ch, 3, 3) Wxh_ifco conv weight (torch OIHW)
    b_full:   (4*Ch,)              conv bias
    Returns (output, (h, c)) in torch shapes:
        output (1, B, Ch, H, W), h and c (B, Ch, H, W).
    """
    T, B, Cin, H, W = seq_nchw.shape
    Ch = w_full.shape[0] // 4
    WCh = W * Ch
    WCin = W * Cin
    G = 4 * WCh

    # ---- one-time precompute, outside the sequential recurrence -------------
    # (1) x gate seed: bias + conv(x_t, Wx) for all (t, b) as ONE big matmul
    #     at full MXU utilization (M = T*B*H), instead of per-step tiny matmuls.
    x_rows = jnp.transpose(seq_nchw, (0, 1, 3, 4, 2)).reshape(T, B, H, WCin)
    x_pad = jnp.pad(x_rows.astype(jnp.float32), ((0, 0), (0, 0), (1, 1), (0, 0)))
    x3 = jnp.stack([x_pad[:, :, k:k + H, :] for k in range(3)], axis=3)
    # x3: (T, B, H, 3, W*Cin); flatten (ky, lane) into K = 3*W*Cin.
    wx_band = _band_weights(w_full[:, :Cin].astype(jnp.float32), Ch, W)
    xg = jnp.dot(x3.reshape(T * B * H, 3 * WCin).astype(mxu_dtype),
                 wx_band.reshape(3 * WCin, G).astype(mxu_dtype),
                 preferred_element_type=jnp.float32)
    # Bias broadcast to the lane-dense gate layout (g, x, co).
    bias = jnp.broadcast_to(b_full.astype(jnp.float32).reshape(4, 1, Ch),
                            (4, W, Ch)).reshape(G)
    xg = (xg + bias).reshape(T, B, H, G)
    xg = jnp.transpose(xg, (1, 0, 2, 3))            # (B, T, H, 4*W*Ch) f32

    # (2) fused recurrent banded weight: 3 vertical taps stacked along K.
    wh_fused = _band_weights(w_full[:, Cin:].astype(jnp.float32), Ch, W)
    wh_fused = wh_fused.reshape(3 * WCh, G).astype(mxu_dtype)

    out_shape = (jax.ShapeDtypeStruct((B, H, WCh), jnp.float32),
                 jax.ShapeDtypeStruct((B, H, WCh), jnp.float32))

    # Explicit VMEM budget (double-buffered blocks + scratch) and cost estimate.
    wh_bytes = int(wh_fused.size) * jnp.dtype(mxu_dtype).itemsize
    xg_block_bytes = T * H * G * 4
    out_block_bytes = 2 * H * WCh * 4
    scratch_bytes = ((H + 16) * WCh + H * WCh) * 4
    vmem_est = 2 * (xg_block_bytes + wh_bytes + out_block_bytes) + scratch_bytes
    vmem_limit = int(min(100 * 2 ** 20, max(2 * vmem_est, 16 * 2 ** 20)))
    cost = pl.CostEstimate(
        flops=2 * B * T * H * (3 * WCh) * G,
        transcendentals=5 * B * T * H * WCh,
        bytes_accessed=int(xg.size) * 4 + B * wh_bytes + 2 * B * H * WCh * 4)

    h_last, c_last = pl.pallas_call(
        convlstm_kernel,
        out_shape=out_shape,
        grid_spec=pltpu.PrefetchScalarGridSpec(
            num_scalar_prefetch=0,
            grid=(B,),                       # one batch element per grid step
            in_specs=[
                pl.BlockSpec((None, T, H, G), lambda b: (b, 0, 0, 0)),
                # NOTE: at larger W*Ch move this to memory_space=pl.ANY + a
                # one-time manual copy (band is O((W*Ch)^2) and double-buffered
                # here), to stay within v7x's 64 MiB VMEM.
                pl.BlockSpec((3 * WCh, G), lambda b: (0, 0)),
            ],
            out_specs=[
                pl.BlockSpec((None, H, WCh), lambda b: (b, 0, 0)),
                pl.BlockSpec((None, H, WCh), lambda b: (b, 0, 0)),
            ],
            scratch_shapes=[
                pltpu.VMEM((H + 16, WCh), jnp.float32),  # zero-padded h rows
                pltpu.VMEM((H, WCh), jnp.float32),       # cell state c
            ],
        ),
        compiler_params=pltpu.CompilerParams(
            dimension_semantics=("parallel",),   # v7x: one batch half per TC
            vmem_limit_bytes=vmem_limit),
        cost_estimate=cost,
    )(xg, wh_fused)

    # Back to torch NCHW conventions.
    h_nchw = jnp.transpose(h_last.reshape(B, H, W, Ch), (0, 3, 1, 2))
    c_nchw = jnp.transpose(c_last.reshape(B, H, W, Ch), (0, 3, 1, 2))
    return h_nchw[None], (h_nchw, c_nchw)


# ------------------------- plain-JAX reference ------------------------------ #
def conv_lstm_ref(seq_nchw, w_full, b_full):
    """All-f32 reference matching the torch forward (peepholes are zeros)."""
    T, B, Cin, H, W = seq_nchw.shape
    Ch = w_full.shape[0] // 4
    h = jnp.zeros((B, Ch, H, W), jnp.float32)
    c = jnp.zeros((B, Ch, H, W), jnp.float32)
    for t in range(T):
        xh = jnp.concatenate([seq_nchw[t], h], axis=1)
        g = jax.lax.conv_general_dilated(
            xh, w_full, window_strides=(1, 1), padding="SAME",
            dimension_numbers=("NCHW", "OIHW", "NCHW")) + b_full.reshape(1, -1, 1, 1)
        gi, gf, gc, go = jnp.split(g, 4, axis=1)
        c = jax.nn.sigmoid(gf) * c + jax.nn.sigmoid(gi) * jnp.tanh(gc)
        h = jax.nn.sigmoid(go) * jnp.tanh(c)
    return h[None], (h, c)


# ---------------------------------- main ------------------------------------ #
if __name__ == "__main__":
    T, B, Cin, Ch, H, W = 8, 2, 4, 8, 16, 16

    key = jax.random.PRNGKey(0)
    k_seq, k_w, k_b = jax.random.split(key, 3)

    seq = jax.random.normal(k_seq, (T, B, Cin, H, W), dtype=jnp.float32)

    # Conv2d(Cin+Ch, 4*Ch, 3, padding=1) shapes, uniform(-1/sqrt(fan_in), ...).
    fan_in = (Cin + Ch) * 3 * 3
    bound = float(fan_in) ** -0.5
    w_full = jax.random.uniform(k_w, (4 * Ch, Cin + Ch, 3, 3),
                                minval=-bound, maxval=bound, dtype=jnp.float32)
    b_full = jax.random.uniform(k_b, (4 * Ch,),
                                minval=-bound, maxval=bound, dtype=jnp.float32)

    # Default (performance) configuration: bf16 MXU operands, f32 gate math.
    out, (h, c) = jax.jit(conv_lstm_forward)(seq, w_full, b_full)
    jax.block_until_ready((out, h, c))

    out_ref, (h_ref, c_ref) = conv_lstm_ref(seq, w_full, b_full)

    assert out.shape == (1, B, Ch, H, W)
    assert h.shape == (B, Ch, H, W) and c.shape == (B, Ch, H, W)

    # Exact-semantics check: with f32 MXU operands the kernel reproduces the
    # all-f32 reference tightly.
    out32, (h32, c32) = jax.jit(
        functools.partial(conv_lstm_forward, mxu_dtype=jnp.float32))(
            seq, w_full, b_full)
    assert jnp.allclose(out32, out_ref, atol=5e-4, rtol=5e-4)
    assert jnp.allclose(h32, h_ref, atol=5e-4, rtol=5e-4)
    assert jnp.allclose(c32, c_ref, atol=5e-4, rtol=5e-4)

    # bf16 MXU operands (f32 accumulation / gate math) over an 8-step
    # recurrence vs the all-f32 reference -> loose tolerance.
    assert jnp.allclose(out, out_ref, atol=5e-2, rtol=5e-2)
    assert jnp.allclose(h, h_ref, atol=5e-2, rtol=5e-2)
    assert jnp.allclose(c, c_ref, atol=5e-2, rtol=5e-2)

    print("KERNEL_OK")
</pallas_src>

<mosaic_0001>
module attributes {stable_mosaic.version = 11 : i64} {
  func.func @convlstm_kernel(%arg0: i32, %arg1: memref<1x8x16x512xf32, #tpu.memory_space<vmem>>, %arg2: memref<384x512xbf16, #tpu.memory_space<vmem>>, %arg3: memref<1x16x128xf32, #tpu.memory_space<vmem>>, %arg4: memref<1x16x128xf32, #tpu.memory_space<vmem>>, %arg5: memref<32x128xf32, #tpu.memory_space<vmem>>, %arg6: memref<16x128xf32, #tpu.memory_space<vmem>>) attributes {dimension_semantics = [#tpu.dimension_semantics<parallel>], iteration_bounds = array<i64: 2>, scalar_prefetch = 0 : i64, scratch_operands = 2 : i64, tpu.core_type = #tpu.core_type<tc>, window_params = [{transform_indices = @transform_0, window_bounds = array<i64: 1, 8, 16, 512>}, {pipeline_mode = #tpu.pipeline_mode<synchronous>, transform_indices = @transform_1, window_bounds = array<i64: 384, 512>}, {transform_indices = @transform_2, window_bounds = array<i64: 1, 16, 128>}, {transform_indices = @transform_3, window_bounds = array<i64: 1, 16, 128>}]} {
    %cst = arith.constant 0.000000e+00 : f32
    %0 = vector.broadcast %cst : f32 to vector<32x128xf32>
    %c0 = arith.constant 0 : index
    %c0_0 = arith.constant 0 : index
    %1 = vector.load %arg5[%c0, %c0_0] : memref<32x128xf32, #tpu.memory_space<vmem>>, vector<32x128xf32>
    tpu.vector_store %arg5[%c0, %c0_0], %0 {strides = array<i32>} : memref<32x128xf32, #tpu.memory_space<vmem>>, vector<32x128xf32>,
    %cst_1 = arith.constant 0.000000e+00 : f32
    %2 = vector.broadcast %cst_1 : f32 to vector<16x128xf32>
    %c0_2 = arith.constant 0 : index
    %c0_3 = arith.constant 0 : index
    %3 = vector.load %arg6[%c0_2, %c0_3] : memref<16x128xf32, #tpu.memory_space<vmem>>, vector<16x128xf32>
    tpu.vector_store %arg6[%c0_2, %c0_3], %2 {strides = array<i32>} : memref<16x128xf32, #tpu.memory_space<vmem>>, vector<16x128xf32>,
    %c0_4 = arith.constant 0 : index
    %c0_5 = arith.constant 0 : index
    %4 = vector.load %arg5[%c0_4, %c0_5] : memref<32x128xf32, #tpu.memory_space<vmem>>, vector<32x128xf32>
    %c1_i32 = arith.constant 1 : i32
    %5 = tpu.dynamic_rotate %4 by %c1_i32 dim 0 : vector<32x128xf32>, i32 -> vector<32x128xf32>
    %c31_i32 = arith.constant 31 : i32
    %6 = tpu.dynamic_rotate %4 by %c31_i32 dim 0 : vector<32x128xf32>, i32 -> vector<32x128xf32>
    %7 = vector.extract_strided_slice %5 {offsets = [8, 0], sizes = [16, 128], strides = [1, 1]} : vector<32x128xf32> to vector<16x128xf32>
    %8 = vector.extract_strided_slice %4 {offsets = [8, 0], sizes = [16, 128], strides = [1, 1]} : vector<32x128xf32> to vector<16x128xf32>
    %9 = vector.extract_strided_slice %6 {offsets = [8, 0], sizes = [16, 128], strides = [1, 1]} : vector<32x128xf32> to vector<16x128xf32>
    %10 = tpu.concatenate %7, %8, %9 in 1 : vector<16x128xf32>, vector<16x128xf32>, vector<16x128xf32> -> vector<16x384xf32>
    %11 = arith.truncf %10 : vector<16x384xf32> to vector<16x384xbf16>
    %c0_6 = arith.constant 0 : index
    %c0_7 = arith.constant 0 : index
    %c0_8 = arith.constant 0 : index
    %c0_9 = arith.constant 0 : index
    %12 = vector.load %arg1[%c0_6, %c0_7, %c0_8, %c0_9] : memref<1x8x16x512xf32, #tpu.memory_space<vmem>>, vector<1x1x16x512xf32>
    %13 = vector.shape_cast %12 : vector<1x1x16x512xf32> to vector<16x512xf32>
    %c0_10 = arith.constant 0 : index
    %c0_11 = arith.constant 0 : index
    %14 = vector.load %arg2[%c0_10, %c0_11] : memref<384x512xbf16, #tpu.memory_space<vmem>>, vector<384x512xbf16>
    %cst_12 = arith.constant dense<0.000000e+00> : vector<16x512xf32>
    %15 = tpu.matmul %11, %14, %cst_12 {dimension_numbers = #tpu.dot_dimension_numbers<[1], [0], [0], [1], [0, 0, 1, 1], [], []>} : vector<16x384xbf16>, vector<384x512xbf16>, vector<16x512xf32> -> vector<16x512xf32>
    %16 = arith.addf %13, %15 : vector<16x512xf32>
    %17 = vector.extract_strided_slice %16 {offsets = [0, 0], sizes = [16, 128], strides = [1, 1]} : vector<16x512xf32> to vector<16x128xf32>
    %18 = vector.extract_strided_slice %16 {offsets = [0, 128], sizes = [16, 128], strides = [1, 1]} : vector<16x512xf32> to vector<16x128xf32>
    %19 = vector.extract_strided_slice %16 {offsets = [0, 256], sizes = [16, 128], strides = [1, 1]} : vector<16x512xf32> to vector<16x128xf32>
    %20 = vector.extract_strided_slice %16 {offsets = [0, 384], sizes = [16, 128], strides = [1, 1]} : vector<16x512xf32> to vector<16x128xf32>
    %c0_13 = arith.constant 0 : index
    %c0_14 = arith.constant 0 : index
    %21 = vector.load %arg6[%c0_13, %c0_14] : memref<16x128xf32, #tpu.memory_space<vmem>>, vector<16x128xf32>
    %22 = arith.negf %18 : vector<16x128xf32>
    %23 = math.exp %22 : vector<16x128xf32>
    %cst_15 = arith.constant 1.000000e+00 : f32
    %24 = vector.broadcast %cst_15 : f32 to vector<16x128xf32>
    %25 = arith.addf %24, %23 : vector<16x128xf32>
    %26 = arith.divf %24, %25 : vector<16x128xf32>
    %27 = arith.mulf %26, %21 : vector<16x128xf32>
    %28 = arith.negf %17 : vector<16x128xf32>
    %29 = math.exp %28 : vector<16x128xf32>
    %cst_16 = arith.constant 1.000000e+00 : f32
    %30 = vector.broadcast %cst_16 : f32 to vector<16x128xf32>
    %31 = arith.addf %30, %29 : vector<16x128xf32>
    %32 = arith.divf %30, %31 : vector<16x128xf32>
    %33 = math.tanh %19 : vector<16x128xf32>
    %34 = arith.mulf %32, %33 : vector<16x128xf32>
    %35 = arith.addf %27, %34 : vector<16x128xf32>
    %36 = arith.negf %20 : vector<16x128xf32>
    %37 = math.exp %36 : vector<16x128xf32>
    %cst_17 = arith.constant 1.000000e+00 : f32
    %38 = vector.broadcast %cst_17 : f32 to vector<16x128xf32>
    %39 = arith.addf %38, %37 : vector<16x128xf32>
    %40 = arith.divf %38, %39 : vector<16x128xf32>
    %41 = math.tanh %35 : vector<16x128xf32>
    %42 = arith.mulf %40, %41 : vector<16x128xf32>
    %c0_18 = arith.constant 0 : index
    %c0_19 = arith.constant 0 : index
    %43 = vector.load %arg6[%c0_18, %c0_19] : memref<16x128xf32, #tpu.memory_space<vmem>>, vector<16x128xf32>
    tpu.vector_store %arg6[%c0_18, %c0_19], %35 {strides = array<i32>} : memref<16x128xf32, #tpu.memory_space<vmem>>, vector<16x128xf32>,
    %c8 = arith.constant 8 : index
    %c0_20 = arith.constant 0 : index
    %44 = vector.load %arg5[%c8, %c0_20] : memref<32x128xf32, #tpu.memory_space<vmem>>, vector<16x128xf32>
    tpu.vector_store %arg5[%c8, %c0_20], %42 {strides = array<i32>} : memref<32x128xf32, #tpu.memory_space<vmem>>, vector<16x128xf32>,
    %c0_21 = arith.constant 0 : index
    %c0_22 = arith.constant 0 : index
    %45 = vector.load %arg5[%c0_21, %c0_22] : memref<32x128xf32, #tpu.memory_space<vmem>>, vector<32x128xf32>
    %c1_i32_23 = arith.constant 1 : i32
    %46 = tpu.dynamic_rotate %45 by %c1_i32_23 dim 0 : vector<32x128xf32>, i32 -> vector<32x128xf32>
    %c31_i32_24 = arith.constant 31 : i32
    %47 = tpu.dynamic_rotate %45 by %c31_i32_24 dim 0 : vector<32x128xf32>, i32 -> vector<32x128xf32>
    %48 = vector.extract_strided_slice %46 {offsets = [8, 0], sizes = [16, 128], strides = [1, 1]} : vector<32x128xf32> to vector<16x128xf32>
    %49 = vector.extract_strided_slice %45 {offsets = [8, 0], sizes = [16, 128], strides = [1, 1]} : vector<32x128xf32> to vector<16x128xf32>
    %50 = vector.extract_strided_slice %47 {offsets = [8, 0], sizes = [16, 128], strides = [1, 1]} : vector<32x128xf32> to vector<16x128xf32>
    %51 = tpu.concatenate %48, %49, %50 in 1 : vector<16x128xf32>, vector<16x128xf32>, vector<16x128xf32> -> vector<16x384xf32>
    %52 = arith.truncf %51 : vector<16x384xf32> to vector<16x384xbf16>
    %c0_25 = arith.constant 0 : index
    %c1 = arith.constant 1 : index
    %c0_26 = arith.constant 0 : index
    %c0_27 = arith.constant 0 : index
    %53 = vector.load %arg1[%c0_25, %c1, %c0_26, %c0_27] : memref<1x8x16x512xf32, #tpu.memory_space<vmem>>, vector<1x1x16x512xf32>
    %54 = vector.shape_cast %53 : vector<1x1x16x512xf32> to vector<16x512xf32>
    %c0_28 = arith.constant 0 : index
    %c0_29 = arith.constant 0 : index
    %55 = vector.load %arg2[%c0_28, %c0_29] : memref<384x512xbf16, #tpu.memory_space<vmem>>, vector<384x512xbf16>
    %cst_30 = arith.constant dense<0.000000e+00> : vector<16x512xf32>
    %56 = tpu.matmul %52, %55, %cst_30 {dimension_numbers = #tpu.dot_dimension_numbers<[1], [0], [0], [1], [0, 0, 1, 1], [], []>} : vector<16x384xbf16>, vector<384x512xbf16>, vector<16x512xf32> -> vector<16x512xf32>
    %57 = arith.addf %54, %56 : vector<16x512xf32>
    %58 = vector.extract_strided_slice %57 {offsets = [0, 0], sizes = [16, 128], strides = [1, 1]} : vector<16x512xf32> to vector<16x128xf32>
    %59 = vector.extract_strided_slice %57 {offsets = [0, 128], sizes = [16, 128], strides = [1, 1]} : vector<16x512xf32> to vector<16x128xf32>
    %60 = vector.extract_strided_slice %57 {offsets = [0, 256], sizes = [16, 128], strides = [1, 1]} : vector<16x512xf32> to vector<16x128xf32>
    %61 = vector.extract_strided_slice %57 {offsets = [0, 384], sizes = [16, 128], strides = [1, 1]} : vector<16x512xf32> to vector<16x128xf32>
    %c0_31 = arith.constant 0 : index
    %c0_32 = arith.constant 0 : index
    %62 = vector.load %arg6[%c0_31, %c0_32] : memref<16x128xf32, #tpu.memory_space<vmem>>, vector<16x128xf32>
    %63 = arith.negf %59 : vector<16x128xf32>
    %64 = math.exp %63 : vector<16x128xf32>
    %cst_33 = arith.constant 1.000000e+00 : f32
    %65 = vector.broadcast %cst_33 : f32 to vector<16x128xf32>
    %66 = arith.addf %65, %64 : vector<16x128xf32>
    %67 = arith.divf %65, %66 : vector<16x128xf32>
    %68 = arith.mulf %67, %62 : vector<16x128xf32>
    %69 = arith.negf %58 : vector<16x128xf32>
    %70 = math.exp %69 : vector<16x128xf32>
    %cst_34 = arith.constant 1.000000e+00 : f32
    %71 = vector.broadcast %cst_34 : f32 to vector<16x128xf32>
    %72 = arith.addf %71, %70 : vector<16x128xf32>
    %73 = arith.divf %71, %72 : vector<16x128xf32>
    %74 = math.tanh %60 : vector<16x128xf32>
    %75 = arith.mulf %73, %74 : vector<16x128xf32>
    %76 = arith.addf %68, %75 : vector<16x128xf32>
    %77 = arith.negf %61 : vector<16x128xf32>
    %78 = math.exp %77 : vector<16x128xf32>
    %cst_35 = arith.constant 1.000000e+00 : f32
    %79 = vector.broadcast %cst_35 : f32 to vector<16x128xf32>
    %80 = arith.addf %79, %78 : vector<16x128xf32>
    %81 = arith.divf %79, %80 : vector<16x128xf32>
    %82 = math.tanh %76 : vector<16x128xf32>
    %83 = arith.mulf %81, %82 : vector<16x128xf32>
    %c0_36 = arith.constant 0 : index
    %c0_37 = arith.constant 0 : index
    %84 = vector.load %arg6[%c0_36, %c0_37] : memref<16x128xf32, #tpu.memory_space<vmem>>, vector<16x128xf32>
    tpu.vector_store %arg6[%c0_36, %c0_37], %76 {strides = array<i32>} : memref<16x128xf32, #tpu.memory_space<vmem>>, vector<16x128xf32>,
    %c8_38 = arith.constant 8 : index
    %c0_39 = arith.constant 0 : index
    %85 = vector.load %arg5[%c8_38, %c0_39] : memref<32x128xf32, #tpu.memory_space<vmem>>, vector<16x128xf32>
    tpu.vector_store %arg5[%c8_38, %c0_39], %83 {strides = array<i32>} : memref<32x128xf32, #tpu.memory_space<vmem>>, vector<16x128xf32>,
    %c0_40 = arith.constant 0 : index
    %c0_41 = arith.constant 0 : index
    %86 = vector.load %arg5[%c0_40, %c0_41] : memref<32x128xf32, #tpu.memory_space<vmem>>, vector<32x128xf32>
    %c1_i32_42 = arith.constant 1 : i32
    %87 = tpu.dynamic_rotate %86 by %c1_i32_42 dim 0 : vector<32x128xf32>, i32 -> vector<32x128xf32>
    %c31_i32_43 = arith.constant 31 : i32
    %88 = tpu.dynamic_rotate %86 by %c31_i32_43 dim 0 : vector<32x128xf32>, i32 -> vector<32x128xf32>
    %89 = vector.extract_strided_slice %87 {offsets = [8, 0], sizes = [16, 128], strides = [1, 1]} : vector<32x128xf32> to vector<16x128xf32>
    %90 = vector.extract_strided_slice %86 {offsets = [8, 0], sizes = [16, 128], strides = [1, 1]} : vector<32x128xf32> to vector<16x128xf32>
    %91 = vector.extract_strided_slice %88 {offsets = [8, 0], sizes = [16, 128], strides = [1, 1]} : vector<32x128xf32> to vector<16x128xf32>
    %92 = tpu.concatenate %89, %90, %91 in 1 : vector<16x128xf32>, vector<16x128xf32>, vector<16x128xf32> -> vector<16x384xf32>
    %93 = arith.truncf %92 : vector<16x384xf32> to vector<16x384xbf16>
    %c0_44 = arith.constant 0 : index
    %c2 = arith.constant 2 : index
    %c0_45 = arith.constant 0 : index
    %c0_46 = arith.constant 0 : index
    %94 = vector.load %arg1[%c0_44, %c2, %c0_45, %c0_46] : memref<1x8x16x512xf32, #tpu.memory_space<vmem>>, vector<1x1x16x512xf32>
    %95 = vector.shape_cast %94 : vector<1x1x16x512xf32> to vector<16x512xf32>
    %c0_47 = arith.constant 0 : index
    %c0_48 = arith.constant 0 : index
    %96 = vector.load %arg2[%c0_47, %c0_48] : memref<384x512xbf16, #tpu.memory_space<vmem>>, vector<384x512xbf16>
    %cst_49 = arith.constant dense<0.000000e+00> : vector<16x512xf32>
    %97 = tpu.matmul %93, %96, %cst_49 {dimension_numbers = #tpu.dot_dimension_numbers<[1], [0], [0], [1], [0, 0, 1, 1], [], []>} : vector<16x384xbf16>, vector<384x512xbf16>, vector<16x512xf32> -> vector<16x512xf32>
    %98 = arith.addf %95, %97 : vector<16x512xf32>
    %99 = vector.extract_strided_slice %98 {offsets = [0, 0], sizes = [16, 128], strides = [1, 1]} : vector<16x512xf32> to vector<16x128xf32>
    %100 = vector.extract_strided_slice %98 {offsets = [0, 128], sizes = [16, 128], strides = [1, 1]} : vector<16x512xf32> to vector<16x128xf32>
    %101 = vector.extract_strided_slice %98 {offsets = [0, 256], sizes = [16, 128], strides = [1, 1]} : vector<16x512xf32> to vector<16x128xf32>
    %102 = vector.extract_strided_slice %98 {offsets = [0, 384], sizes = [16, 128], strides = [1, 1]} : vector<16x512xf32> to vector<16x128xf32>
    %c0_50 = arith.constant 0 : index
    %c0_51 = arith.constant 0 : index
    %103 = vector.load %arg6[%c0_50, %c0_51] : memref<16x128xf32, #tpu.memory_space<vmem>>, vector<16x128xf32>
    %104 = arith.negf %100 : vector<16x128xf32>
    %105 = math.exp %104 : vector<16x128xf32>
    %cst_52 = arith.constant 1.000000e+00 : f32
    %106 = vector.broadcast %cst_52 : f32 to vector<16x128xf32>
    %107 = arith.addf %106, %105 : vector<16x128xf32>
    %108 = arith.divf %106, %107 : vector<16x128xf32>
    %109 = arith.mulf %108, %103 : vector<16x128xf32>
    %110 = arith.negf %99 : vector<16x128xf32>
    %111 = math.exp %110 : vector<16x128xf32>
    %cst_53 = arith.constant 1.000000e+00 : f32
    %112 = vector.broadcast %cst_53 : f32 to vector<16x128xf32>
    %113 = arith.addf %112, %111 : vector<16x128xf32>
    %114 = arith.divf %112, %113 : vector<16x128xf32>
    %115 = math.tanh %101 : vector<16x128xf32>
    %116 = arith.mulf %114, %115 : vector<16x128xf32>
    %117 = arith.addf %109, %116 : vector<16x128xf32>
    %118 = arith.negf %102 : vector<16x128xf32>
    %119 = math.exp %118 : vector<16x128xf32>
    %cst_54 = arith.constant 1.000000e+00 : f32
    %120 = vector.broadcast %cst_54 : f32 to vector<16x128xf32>
    %121 = arith.addf %120, %119 : vector<16x128xf32>
    %122 = arith.divf %120, %121 : vector<16x128xf32>
    %123 = math.tanh %117 : vector<16x128xf32>
    %124 = arith.mulf %122, %123 : vector<16x128xf32>
    %c0_55 = arith.constant 0 : index
    %c0_56 = arith.constant 0 : index
    %125 = vector.load %arg6[%c0_55, %c0_56] : memref<16x128xf32, #tpu.memory_space<vmem>>, vector<16x128xf32>
    tpu.vector_store %arg6[%c0_55, %c0_56], %117 {strides = array<i32>} : memref<16x128xf32, #tpu.memory_space<vmem>>, vector<16x128xf32>,
    %c8_57 = arith.constant 8 : index
    %c0_58 = arith.constant 0 : index
    %126 = vector.load %arg5[%c8_57, %c0_58] : memref<32x128xf32, #tpu.memory_space<vmem>>, vector<16x128xf32>
    tpu.vector_store %arg5[%c8_57, %c0_58], %124 {strides = array<i32>} : memref<32x128xf32, #tpu.memory_space<vmem>>, vector<16x128xf32>,
    %c0_59 = arith.constant 0 : index
    %c0_60 = arith.constant 0 : index
    %127 = vector.load %arg5[%c0_59, %c0_60] : memref<32x128xf32, #tpu.memory_space<vmem>>, vector<32x128xf32>
    %c1_i32_61 = arith.constant 1 : i32
    %128 = tpu.dynamic_rotate %127 by %c1_i32_61 dim 0 : vector<32x128xf32>, i32 -> vector<32x128xf32>
    %c31_i32_62 = arith.constant 31 : i32
    %129 = tpu.dynamic_rotate %127 by %c31_i32_62 dim 0 : vector<32x128xf32>, i32 -> vector<32x128xf32>
    %130 = vector.extract_strided_slice %128 {offsets = [8, 0], sizes = [16, 128], strides = [1, 1]} : vector<32x128xf32> to vector<16x128xf32>
    %131 = vector.extract_strided_slice %127 {offsets = [8, 0], sizes = [16, 128], strides = [1, 1]} : vector<32x128xf32> to vector<16x128xf32>
    %132 = vector.extract_strided_slice %129 {offsets = [8, 0], sizes = [16, 128], strides = [1, 1]} : vector<32x128xf32> to vector<16x128xf32>
    %133 = tpu.concatenate %130, %131, %132 in 1 : vector<16x128xf32>, vector<16x128xf32>, vector<16x128xf32> -> vector<16x384xf32>
    %134 = arith.truncf %133 : vector<16x384xf32> to vector<16x384xbf16>
    %c0_63 = arith.constant 0 : index
    %c3 = arith.constant 3 : index
    %c0_64 = arith.constant 0 : index
    %c0_65 = arith.constant 0 : index
    %135 = vector.load %arg1[%c0_63, %c3, %c0_64, %c0_65] : memref<1x8x16x512xf32, #tpu.memory_space<vmem>>, vector<1x1x16x512xf32>
    %136 = vector.shape_cast %135 : vector<1x1x16x512xf32> to vector<16x512xf32>
    %c0_66 = arith.constant 0 : index
    %c0_67 = arith.constant 0 : index
    %137 = vector.load %arg2[%c0_66, %c0_67] : memref<384x512xbf16, #tpu.memory_space<vmem>>, vector<384x512xbf16>
    %cst_68 = arith.constant dense<0.000000e+00> : vector<16x512xf32>
    %138 = tpu.matmul %134, %137, %cst_68 {dimension_numbers = #tpu.dot_dimension_numbers<[1], [0], [0], [1], [0, 0, 1, 1], [], []>} : vector<16x384xbf16>, vector<384x512xbf16>, vector<16x512xf32> -> vector<16x512xf32>
    %139 = arith.addf %136, %138 : vector<16x512xf32>
    %140 = vector.extract_strided_slice %139 {offsets = [0, 0], sizes = [16, 128], strides = [1, 1]} : vector<16x512xf32> to vector<16x128xf32>
    %141 = vector.extract_strided_slice %139 {offsets = [0, 128], sizes = [16, 128], strides = [1, 1]} : vector<16x512xf32> to vector<16x128xf32>
    %142 = vector.extract_strided_slice %139 {offsets = [0, 256], sizes = [16, 128], strides = [1, 1]} : vector<16x512xf32> to vector<16x128xf32>
    %143 = vector.extract_strided_slice %139 {offsets = [0, 384], sizes = [16, 128], strides = [1, 1]} : vector<16x512xf32> to vector<16x128xf32>
    %c0_69 = arith.constant 0 : index
    %c0_70 = arith.constant 0 : index
    %144 = vector.load %arg6[%c0_69, %c0_70] : memref<16x128xf32, #tpu.memory_space<vmem>>, vector<16x128xf32>
    %145 = arith.negf %141 : vector<16x128xf32>
    %146 = math.exp %145 : vector<16x128xf32>
    %cst_71 = arith.constant 1.000000e+00 : f32
    %147 = vector.broadcast %cst_71 : f32 to vector<16x128xf32>
    %148 = arith.addf %147, %146 : vector<16x128xf32>
    %149 = arith.divf %147, %148 : vector<16x128xf32>
    %150 = arith.mulf %149, %144 : vector<16x128xf32>
    %151 = arith.negf %140 : vector<16x128xf32>
    %152 = math.exp %151 : vector<16x128xf32>
    %cst_72 = arith.constant 1.000000e+00 : f32
    %153 = vector.broadcast %cst_72 : f32 to vector<16x128xf32>
    %154 = arith.addf %153, %152 : vector<16x128xf32>
    %155 = arith.divf %153, %154 : vector<16x128xf32>
    %156 = math.tanh %142 : vector<16x128xf32>
    %157 = arith.mulf %155, %156 : vector<16x128xf32>
    %158 = arith.addf %150, %157 : vector<16x128xf32>
    %159 = arith.negf %143 : vector<16x128xf32>
    %160 = math.exp %159 : vector<16x128xf32>
    %cst_73 = arith.constant 1.000000e+00 : f32
    %161 = vector.broadcast %cst_73 : f32 to vector<16x128xf32>
    %162 = arith.addf %161, %160 : vector<16x128xf32>
    %163 = arith.divf %161, %162 : vector<16x128xf32>
    %164 = math.tanh %158 : vector<16x128xf32>
    %165 = arith.mulf %163, %164 : vector<16x128xf32>
    %c0_74 = arith.constant 0 : index
    %c0_75 = arith.constant 0 : index
    %166 = vector.load %arg6[%c0_74, %c0_75] : memref<16x128xf32, #tpu.memory_space<vmem>>, vector<16x128xf32>
    tpu.vector_store %arg6[%c0_74, %c0_75], %158 {strides = array<i32>} : memref<16x128xf32, #tpu.memory_space<vmem>>, vector<16x128xf32>,
    %c8_76 = arith.constant 8 : index
    %c0_77 = arith.constant 0 : index
    %167 = vector.load %arg5[%c8_76, %c0_77] : memref<32x128xf32, #tpu.memory_space<vmem>>, vector<16x128xf32>
    tpu.vector_store %arg5[%c8_76, %c0_77], %165 {strides = array<i32>} : memref<32x128xf32, #tpu.memory_space<vmem>>, vector<16x128xf32>,
    %c0_78 = arith.constant 0 : index
    %c0_79 = arith.constant 0 : index
    %168 = vector.load %arg5[%c0_78, %c0_79] : memref<32x128xf32, #tpu.memory_space<vmem>>, vector<32x128xf32>
    %c1_i32_80 = arith.constant 1 : i32
    %169 = tpu.dynamic_rotate %168 by %c1_i32_80 dim 0 : vector<32x128xf32>, i32 -> vector<32x128xf32>
    %c31_i32_81 = arith.constant 31 : i32
    %170 = tpu.dynamic_rotate %168 by %c31_i32_81 dim 0 : vector<32x128xf32>, i32 -> vector<32x128xf32>
    %171 = vector.extract_strided_slice %169 {offsets = [8, 0], sizes = [16, 128], strides = [1, 1]} : vector<32x128xf32> to vector<16x128xf32>
    %172 = vector.extract_strided_slice %168 {offsets = [8, 0], sizes = [16, 128], strides = [1, 1]} : vector<32x128xf32> to vector<16x128xf32>
    %173 = vector.extract_strided_slice %170 {offsets = [8, 0], sizes = [16, 128], strides = [1, 1]} : vector<32x128xf32> to vector<16x128xf32>
    %174 = tpu.concatenate %171, %172, %173 in 1 : vector<16x128xf32>, vector<16x128xf32>, vector<16x128xf32> -> vector<16x384xf32>
    %175 = arith.truncf %174 : vector<16x384xf32> to vector<16x384xbf16>
    %c0_82 = arith.constant 0 : index
    %c4 = arith.constant 4 : index
    %c0_83 = arith.constant 0 : index
    %c0_84 = arith.constant 0 : index
    %176 = vector.load %arg1[%c0_82, %c4, %c0_83, %c0_84] : memref<1x8x16x512xf32, #tpu.memory_space<vmem>>, vector<1x1x16x512xf32>
    %177 = vector.shape_cast %176 : vector<1x1x16x512xf32> to vector<16x512xf32>
    %c0_85 = arith.constant 0 : index
    %c0_86 = arith.constant 0 : index
    %178 = vector.load %arg2[%c0_85, %c0_86] : memref<384x512xbf16, #tpu.memory_space<vmem>>, vector<384x512xbf16>
    %cst_87 = arith.constant dense<0.000000e+00> : vector<16x512xf32>
    %179 = tpu.matmul %175, %178, %cst_87 {dimension_numbers = #tpu.dot_dimension_numbers<[1], [0], [0], [1], [0, 0, 1, 1], [], []>} : vector<16x384xbf16>, vector<384x512xbf16>, vector<16x512xf32> -> vector<16x512xf32>
    %180 = arith.addf %177, %179 : vector<16x512xf32>
    %181 = vector.extract_strided_slice %180 {offsets = [0, 0], sizes = [16, 128], strides = [1, 1]} : vector<16x512xf32> to vector<16x128xf32>
    %182 = vector.extract_strided_slice %180 {offsets = [0, 128], sizes = [16, 128], strides = [1, 1]} : vector<16x512xf32> to vector<16x128xf32>
    %183 = vector.extract_strided_slice %180 {offsets = [0, 256], sizes = [16, 128], strides = [1, 1]} : vector<16x512xf32> to vector<16x128xf32>
    %184 = vector.extract_strided_slice %180 {offsets = [0, 384], sizes = [16, 128], strides = [1, 1]} : vector<16x512xf32> to vector<16x128xf32>
    %c0_88 = arith.constant 0 : index
    %c0_89 = arith.constant 0 : index
    %185 = vector.load %arg6[%c0_88, %c0_89] : memref<16x128xf32, #tpu.memory_space<vmem>>, vector<16x128xf32>
    %186 = arith.negf %182 : vector<16x128xf32>
    %187 = math.exp %186 : vector<16x128xf32>
    %cst_90 = arith.constant 1.000000e+00 : f32
    %188 = vector.broadcast %cst_90 : f32 to vector<16x128xf32>
    %189 = arith.addf %188, %187 : vector<16x128xf32>
    %190 = arith.divf %188, %189 : vector<16x128xf32>
    %191 = arith.mulf %190, %185 : vector<16x128xf32>
    %192 = arith.negf %181 : vector<16x128xf32>
    %193 = math.exp %192 : vector<16x128xf32>
    %cst_91 = arith.constant 1.000000e+00 : f32
    %194 = vector.broadcast %cst_91 : f32 to vector<16x128xf32>
    %195 = arith.addf %194, %193 : vector<16x128xf32>
    %196 = arith.divf %194, %195 : vector<16x128xf32>
    %197 = math.tanh %183 : vector<16x128xf32>
    %198 = arith.mulf %196, %197 : vector<16x128xf32>
    %199 = arith.addf %191, %198 : vector<16x128xf32>
    %200 = arith.negf %184 : vector<16x128xf32>
    %201 = math.exp %200 : vector<16x128xf32>
    %cst_92 = arith.constant 1.000000e+00 : f32
    %202 = vector.broadcast %cst_92 : f32 to vector<16x128xf32>
    %203 = arith.addf %202, %201 : vector<16x128xf32>
    %204 = arith.divf %202, %203 : vector<16x128xf32>
    %205 = math.tanh %199 : vector<16x128xf32>
    %206 = arith.mulf %204, %205 : vector<16x128xf32>
    %c0_93 = arith.constant 0 : index
    %c0_94 = arith.constant 0 : index
    %207 = vector.load %arg6[%c0_93, %c0_94] : memref<16x128xf32, #tpu.memory_space<vmem>>, vector<16x128xf32>
    tpu.vector_store %arg6[%c0_93, %c0_94], %199 {strides = array<i32>} : memref<16x128xf32, #tpu.memory_space<vmem>>, vector<16x128xf32>,
    %c8_95 = arith.constant 8 : index
    %c0_96 = arith.constant 0 : index
    %208 = vector.load %arg5[%c8_95, %c0_96] : memref<32x128xf32, #tpu.memory_space<vmem>>, vector<16x128xf32>
    tpu.vector_store %arg5[%c8_95, %c0_96], %206 {strides = array<i32>} : memref<32x128xf32, #tpu.memory_space<vmem>>, vector<16x128xf32>,
    %c0_97 = arith.constant 0 : index
    %c0_98 = arith.constant 0 : index
    %209 = vector.load %arg5[%c0_97, %c0_98] : memref<32x128xf32, #tpu.memory_space<vmem>>, vector<32x128xf32>
    %c1_i32_99 = arith.constant 1 : i32
    %210 = tpu.dynamic_rotate %209 by %c1_i32_99 dim 0 : vector<32x128xf32>, i32 -> vector<32x128xf32>
    %c31_i32_100 = arith.constant 31 : i32
    %211 = tpu.dynamic_rotate %209 by %c31_i32_100 dim 0 : vector<32x128xf32>, i32 -> vector<32x128xf32>
    %212 = vector.extract_strided_slice %210 {offsets = [8, 0], sizes = [16, 128], strides = [1, 1]} : vector<32x128xf32> to vector<16x128xf32>
    %213 = vector.extract_strided_slice %209 {offsets = [8, 0], sizes = [16, 128], strides = [1, 1]} : vector<32x128xf32> to vector<16x128xf32>
    %214 = vector.extract_strided_slice %211 {offsets = [8, 0], sizes = [16, 128], strides = [1, 1]} : vector<32x128xf32> to vector<16x128xf32>
    %215 = tpu.concatenate %212, %213, %214 in 1 : vector<16x128xf32>, vector<16x128xf32>, vector<16x128xf32> -> vector<16x384xf32>
    %216 = arith.truncf %215 : vector<16x384xf32> to vector<16x384xbf16>
    %c0_101 = arith.constant 0 : index
    %c5 = arith.constant 5 : index
    %c0_102 = arith.constant 0 : index
    %c0_103 = arith.constant 0 : index
    %217 = vector.load %arg1[%c0_101, %c5, %c0_102, %c0_103] : memref<1x8x16x512xf32, #tpu.memory_space<vmem>>, vector<1x1x16x512xf32>
    %218 = vector.shape_cast %217 : vector<1x1x16x512xf32> to vector<16x512xf32>
    %c0_104 = arith.constant 0 : index
    %c0_105 = arith.constant 0 : index
    %219 = vector.load %arg2[%c0_104, %c0_105] : memref<384x512xbf16, #tpu.memory_space<vmem>>, vector<384x512xbf16>
    %cst_106 = arith.constant dense<0.000000e+00> : vector<16x512xf32>
    %220 = tpu.matmul %216, %219, %cst_106 {dimension_numbers = #tpu.dot_dimension_numbers<[1], [0], [0], [1], [0, 0, 1, 1], [], []>} : vector<16x384xbf16>, vector<384x512xbf16>, vector<16x512xf32> -> vector<16x512xf32>
    %221 = arith.addf %218, %220 : vector<16x512xf32>
    %222 = vector.extract_strided_slice %221 {offsets = [0, 0], sizes = [16, 128], strides = [1, 1]} : vector<16x512xf32> to vector<16x128xf32>
    %223 = vector.extract_strided_slice %221 {offsets = [0, 128], sizes = [16, 128], strides = [1, 1]} : vector<16x512xf32> to vector<16x128xf32>
    %224 = vector.extract_strided_slice %221 {offsets = [0, 256], sizes = [16, 128], strides = [1, 1]} : vector<16x512xf32> to vector<16x128xf32>
    %225 = vector.extract_strided_slice %221 {offsets = [0, 384], sizes = [16, 128], strides = [1, 1]} : vector<16x512xf32> to vector<16x128xf32>
    %c0_107 = arith.constant 0 : index
    %c0_108 = arith.constant 0 : index
    %226 = vector.load %arg6[%c0_107, %c0_108] : memref<16x128xf32, #tpu.memory_space<vmem>>, vector<16x128xf32>
    %227 = arith.negf %223 : vector<16x128xf32>
    %228 = math.exp %227 : vector<16x128xf32>
    %cst_109 = arith.constant 1.000000e+00 : f32
    %229 = vector.broadcast %cst_109 : f32 to vector<16x128xf32>
    %230 = arith.addf %229, %228 : vector<16x128xf32>
    %231 = arith.divf %229, %230 : vector<16x128xf32>
    %232 = arith.mulf %231, %226 : vector<16x128xf32>
    %233 = arith.negf %222 : vector<16x128xf32>
    %234 = math.exp %233 : vector<16x128xf32>
    %cst_110 = arith.constant 1.000000e+00 : f32
    %235 = vector.broadcast %cst_110 : f32 to vector<16x128xf32>
    %236 = arith.addf %235, %234 : vector<16x128xf32>
    %237 = arith.divf %235, %236 : vector<16x128xf32>
    %238 = math.tanh %224 : vector<16x128xf32>
    %239 = arith.mulf %237, %238 : vector<16x128xf32>
    %240 = arith.addf %232, %239 : vector<16x128xf32>
    %241 = arith.negf %225 : vector<16x128xf32>
    %242 = math.exp %241 : vector<16x128xf32>
    %cst_111 = arith.constant 1.000000e+00 : f32
    %243 = vector.broadcast %cst_111 : f32 to vector<16x128xf32>
    %244 = arith.addf %243, %242 : vector<16x128xf32>
    %245 = arith.divf %243, %244 : vector<16x128xf32>
    %246 = math.tanh %240 : vector<16x128xf32>
    %247 = arith.mulf %245, %246 : vector<16x128xf32>
    %c0_112 = arith.constant 0 : index
    %c0_113 = arith.constant 0 : index
    %248 = vector.load %arg6[%c0_112, %c0_113] : memref<16x128xf32, #tpu.memory_space<vmem>>, vector<16x128xf32>
    tpu.vector_store %arg6[%c0_112, %c0_113], %240 {strides = array<i32>} : memref<16x128xf32, #tpu.memory_space<vmem>>, vector<16x128xf32>,
    %c8_114 = arith.constant 8 : index
    %c0_115 = arith.constant 0 : index
    %249 = vector.load %arg5[%c8_114, %c0_115] : memref<32x128xf32, #tpu.memory_space<vmem>>, vector<16x128xf32>
    tpu.vector_store %arg5[%c8_114, %c0_115], %247 {strides = array<i32>} : memref<32x128xf32, #tpu.memory_space<vmem>>, vector<16x128xf32>,
    %c0_116 = arith.constant 0 : index
    %c0_117 = arith.constant 0 : index
    %250 = vector.load %arg5[%c0_116, %c0_117] : memref<32x128xf32, #tpu.memory_space<vmem>>, vector<32x128xf32>
    %c1_i32_118 = arith.constant 1 : i32
    %251 = tpu.dynamic_rotate %250 by %c1_i32_118 dim 0 : vector<32x128xf32>, i32 -> vector<32x128xf32>
    %c31_i32_119 = arith.constant 31 : i32
    %252 = tpu.dynamic_rotate %250 by %c31_i32_119 dim 0 : vector<32x128xf32>, i32 -> vector<32x128xf32>
    %253 = vector.extract_strided_slice %251 {offsets = [8, 0], sizes = [16, 128], strides = [1, 1]} : vector<32x128xf32> to vector<16x128xf32>
    %254 = vector.extract_strided_slice %250 {offsets = [8, 0], sizes = [16, 128], strides = [1, 1]} : vector<32x128xf32> to vector<16x128xf32>
    %255 = vector.extract_strided_slice %252 {offsets = [8, 0], sizes = [16, 128], strides = [1, 1]} : vector<32x128xf32> to vector<16x128xf32>
    %256 = tpu.concatenate %253, %254, %255 in 1 : vector<16x128xf32>, vector<16x128xf32>, vector<16x128xf32> -> vector<16x384xf32>
    %257 = arith.truncf %256 : vector<16x384xf32> to vector<16x384xbf16>
    %c0_120 = arith.constant 0 : index
    %c6 = arith.constant 6 : index
    %c0_121 = arith.constant 0 : index
    %c0_122 = arith.constant 0 : index
    %258 = vector.load %arg1[%c0_120, %c6, %c0_121, %c0_122] : memref<1x8x16x512xf32, #tpu.memory_space<vmem>>, vector<1x1x16x512xf32>
    %259 = vector.shape_cast %258 : vector<1x1x16x512xf32> to vector<16x512xf32>
    %c0_123 = arith.constant 0 : index
    %c0_124 = arith.constant 0 : index
    %260 = vector.load %arg2[%c0_123, %c0_124] : memref<384x512xbf16, #tpu.memory_space<vmem>>, vector<384x512xbf16>
    %cst_125 = arith.constant dense<0.000000e+00> : vector<16x512xf32>
    %261 = tpu.matmul %257, %260, %cst_125 {dimension_numbers = #tpu.dot_dimension_numbers<[1], [0], [0], [1], [0, 0, 1, 1], [], []>} : vector<16x384xbf16>, vector<384x512xbf16>, vector<16x512xf32> -> vector<16x512xf32>
    %262 = arith.addf %259, %261 : vector<16x512xf32>
    %263 = vector.extract_strided_slice %262 {offsets = [0, 0], sizes = [16, 128], strides = [1, 1]} : vector<16x512xf32> to vector<16x128xf32>
    %264 = vector.extract_strided_slice %262 {offsets = [0, 128], sizes = [16, 128], strides = [1, 1]} : vector<16x512xf32> to vector<16x128xf32>
    %265 = vector.extract_strided_slice %262 {offsets = [0, 256], sizes = [16, 128], strides = [1, 1]} : vector<16x512xf32> to vector<16x128xf32>
    %266 = vector.extract_strided_slice %262 {offsets = [0, 384], sizes = [16, 128], strides = [1, 1]} : vector<16x512xf32> to vector<16x128xf32>
    %c0_126 = arith.constant 0 : index
    %c0_127 = arith.constant 0 : index
    %267 = vector.load %arg6[%c0_126, %c0_127] : memref<16x128xf32, #tpu.memory_space<vmem>>, vector<16x128xf32>
    %268 = arith.negf %264 : vector<16x128xf32>
    %269 = math.exp %268 : vector<16x128xf32>
    %cst_128 = arith.constant 1.000000e+00 : f32
    %270 = vector.broadcast %cst_128 : f32 to vector<16x128xf32>
    %271 = arith.addf %270, %269 : vector<16x128xf32>
    %272 = arith.divf %270, %271 : vector<16x128xf32>
    %273 = arith.mulf %272, %267 : vector<16x128xf32>
    %274 = arith.negf %263 : vector<16x128xf32>
    %275 = math.exp %274 : vector<16x128xf32>
    %cst_129 = arith.constant 1.000000e+00 : f32
    %276 = vector.broadcast %cst_129 : f32 to vector<16x128xf32>
    %277 = arith.addf %276, %275 : vector<16x128xf32>
    %278 = arith.divf %276, %277 : vector<16x128xf32>
    %279 = math.tanh %265 : vector<16x128xf32>
    %280 = arith.mulf %278, %279 : vector<16x128xf32>
    %281 = arith.addf %273, %280 : vector<16x128xf32>
    %282 = arith.negf %266 : vector<16x128xf32>
    %283 = math.exp %282 : vector<16x128xf32>
    %cst_130 = arith.constant 1.000000e+00 : f32
    %284 = vector.broadcast %cst_130 : f32 to vector<16x128xf32>
    %285 = arith.addf %284, %283 : vector<16x128xf32>
    %286 = arith.divf %284, %285 : vector<16x128xf32>
    %287 = math.tanh %281 : vector<16x128xf32>
    %288 = arith.mulf %286, %287 : vector<16x128xf32>
    %c0_131 = arith.constant 0 : index
    %c0_132 = arith.constant 0 : index
    %289 = vector.load %arg6[%c0_131, %c0_132] : memref<16x128xf32, #tpu.memory_space<vmem>>, vector<16x128xf32>
    tpu.vector_store %arg6[%c0_131, %c0_132], %281 {strides = array<i32>} : memref<16x128xf32, #tpu.memory_space<vmem>>, vector<16x128xf32>,
    %c8_133 = arith.constant 8 : index
    %c0_134 = arith.constant 0 : index
    %290 = vector.load %arg5[%c8_133, %c0_134] : memref<32x128xf32, #tpu.memory_space<vmem>>, vector<16x128xf32>
    tpu.vector_store %arg5[%c8_133, %c0_134], %288 {strides = array<i32>} : memref<32x128xf32, #tpu.memory_space<vmem>>, vector<16x128xf32>,
    %c0_135 = arith.constant 0 : index
    %c0_136 = arith.constant 0 : index
    %291 = vector.load %arg5[%c0_135, %c0_136] : memref<32x128xf32, #tpu.memory_space<vmem>>, vector<32x128xf32>
    %c1_i32_137 = arith.constant 1 : i32
    %292 = tpu.dynamic_rotate %291 by %c1_i32_137 dim 0 : vector<32x128xf32>, i32 -> vector<32x128xf32>
    %c31_i32_138 = arith.constant 31 : i32
    %293 = tpu.dynamic_rotate %291 by %c31_i32_138 dim 0 : vector<32x128xf32>, i32 -> vector<32x128xf32>
    %294 = vector.extract_strided_slice %292 {offsets = [8, 0], sizes = [16, 128], strides = [1, 1]} : vector<32x128xf32> to vector<16x128xf32>
    %295 = vector.extract_strided_slice %291 {offsets = [8, 0], sizes = [16, 128], strides = [1, 1]} : vector<32x128xf32> to vector<16x128xf32>
    %296 = vector.extract_strided_slice %293 {offsets = [8, 0], sizes = [16, 128], strides = [1, 1]} : vector<32x128xf32> to vector<16x128xf32>
    %297 = tpu.concatenate %294, %295, %296 in 1 : vector<16x128xf32>, vector<16x128xf32>, vector<16x128xf32> -> vector<16x384xf32>
    %298 = arith.truncf %297 : vector<16x384xf32> to vector<16x384xbf16>
    %c0_139 = arith.constant 0 : index
    %c7 = arith.constant 7 : index
    %c0_140 = arith.constant 0 : index
    %c0_141 = arith.constant 0 : index
    %299 = vector.load %arg1[%c0_139, %c7, %c0_140, %c0_141] : memref<1x8x16x512xf32, #tpu.memory_space<vmem>>, vector<1x1x16x512xf32>
    %300 = vector.shape_cast %299 : vector<1x1x16x512xf32> to vector<16x512xf32>
    %c0_142 = arith.constant 0 : index
    %c0_143 = arith.constant 0 : index
    %301 = vector.load %arg2[%c0_142, %c0_143] : memref<384x512xbf16, #tpu.memory_space<vmem>>, vector<384x512xbf16>
    %cst_144 = arith.constant dense<0.000000e+00> : vector<16x512xf32>
    %302 = tpu.matmul %298, %301, %cst_144 {dimension_numbers = #tpu.dot_dimension_numbers<[1], [0], [0], [1], [0, 0, 1, 1], [], []>} : vector<16x384xbf16>, vector<384x512xbf16>, vector<16x512xf32> -> vector<16x512xf32>
    %303 = arith.addf %300, %302 : vector<16x512xf32>
    %304 = vector.extract_strided_slice %303 {offsets = [0, 0], sizes = [16, 128], strides = [1, 1]} : vector<16x512xf32> to vector<16x128xf32>
    %305 = vector.extract_strided_slice %303 {offsets = [0, 128], sizes = [16, 128], strides = [1, 1]} : vector<16x512xf32> to vector<16x128xf32>
    %306 = vector.extract_strided_slice %303 {offsets = [0, 256], sizes = [16, 128], strides = [1, 1]} : vector<16x512xf32> to vector<16x128xf32>
    %307 = vector.extract_strided_slice %303 {offsets = [0, 384], sizes = [16, 128], strides = [1, 1]} : vector<16x512xf32> to vector<16x128xf32>
    %c0_145 = arith.constant 0 : index
    %c0_146 = arith.constant 0 : index
    %308 = vector.load %arg6[%c0_145, %c0_146] : memref<16x128xf32, #tpu.memory_space<vmem>>, vector<16x128xf32>
    %309 = arith.negf %305 : vector<16x128xf32>
    %310 = math.exp %309 : vector<16x128xf32>
    %cst_147 = arith.constant 1.000000e+00 : f32
    %311 = vector.broadcast %cst_147 : f32 to vector<16x128xf32>
    %312 = arith.addf %311, %310 : vector<16x128xf32>
    %313 = arith.divf %311, %312 : vector<16x128xf32>
    %314 = arith.mulf %313, %308 : vector<16x128xf32>
    %315 = arith.negf %304 : vector<16x128xf32>
    %316 = math.exp %315 : vector<16x128xf32>
    %cst_148 = arith.constant 1.000000e+00 : f32
    %317 = vector.broadcast %cst_148 : f32 to vector<16x128xf32>
    %318 = arith.addf %317, %316 : vector<16x128xf32>
    %319 = arith.divf %317, %318 : vector<16x128xf32>
    %320 = math.tanh %306 : vector<16x128xf32>
    %321 = arith.mulf %319, %320 : vector<16x128xf32>
    %322 = arith.addf %314, %321 : vector<16x128xf32>
    %323 = arith.negf %307 : vector<16x128xf32>
    %324 = math.exp %323 : vector<16x128xf32>
    %cst_149 = arith.constant 1.000000e+00 : f32
    %325 = vector.broadcast %cst_149 : f32 to vector<16x128xf32>
    %326 = arith.addf %325, %324 : vector<16x128xf32>
    %327 = arith.divf %325, %326 : vector<16x128xf32>
    %328 = math.tanh %322 : vector<16x128xf32>
    %329 = arith.mulf %327, %328 : vector<16x128xf32>
    %c0_150 = arith.constant 0 : index
    %c0_151 = arith.constant 0 : index
    %330 = vector.load %arg6[%c0_150, %c0_151] : memref<16x128xf32, #tpu.memory_space<vmem>>, vector<16x128xf32>
    tpu.vector_store %arg6[%c0_150, %c0_151], %322 {strides = array<i32>} : memref<16x128xf32, #tpu.memory_space<vmem>>, vector<16x128xf32>,
    %c8_152 = arith.constant 8 : index
    %c0_153 = arith.constant 0 : index
    %331 = vector.load %arg5[%c8_152, %c0_153] : memref<32x128xf32, #tpu.memory_space<vmem>>, vector<16x128xf32>
    tpu.vector_store %arg5[%c8_152, %c0_153], %329 {strides = array<i32>} : memref<32x128xf32, #tpu.memory_space<vmem>>, vector<16x128xf32>,
    %c8_154 = arith.constant 8 : index
    %c0_155 = arith.constant 0 : index
    %332 = vector.load %arg5[%c8_154, %c0_155] : memref<32x128xf32, #tpu.memory_space<vmem>>, vector<16x128xf32>
    %c0_156 = arith.constant 0 : index
    %c0_157 = arith.constant 0 : index
    %c0_158 = arith.constant 0 : index
    %333 = vector.load %arg3[%c0_156, %c0_157, %c0_158] : memref<1x16x128xf32, #tpu.memory_space<vmem>>, vector<1x16x128xf32>
    %334 = vector.shape_cast %333 : vector<1x16x128xf32> to vector<16x128xf32>
    %335 = vector.shape_cast %332 : vector<16x128xf32> to vector<1x16x128xf32>
    tpu.vector_store %arg3[%c0_156, %c0_157, %c0_158], %335 {strides = array<i32>} : memref<1x16x128xf32, #tpu.memory_space<vmem>>, vector<1x16x128xf32>,
    %c0_159 = arith.constant 0 : index
    %c0_160 = arith.constant 0 : index
    %336 = vector.load %arg6[%c0_159, %c0_160] : memref<16x128xf32, #tpu.memory_space<vmem>>, vector<16x128xf32>
    %c0_161 = arith.constant 0 : index
    %c0_162 = arith.constant 0 : index
    %c0_163 = arith.constant 0 : index
    %337 = vector.load %arg4[%c0_161, %c0_162, %c0_163] : memref<1x16x128xf32, #tpu.memory_space<vmem>>, vector<1x16x128xf32>
    %338 = vector.shape_cast %337 : vector<1x16x128xf32> to vector<16x128xf32>
    %339 = vector.shape_cast %336 : vector<16x128xf32> to vector<1x16x128xf32>
    tpu.vector_store %arg4[%c0_161, %c0_162, %c0_163], %339 {strides = array<i32>} : memref<1x16x128xf32, #tpu.memory_space<vmem>>, vector<1x16x128xf32>,
    return
  }
  func.func @transform_0(%arg0: i32) -> (i32, i32, i32, i32) {
    %c0_i32 = arith.constant 0 : i32
    %c0_i32_0 = arith.constant 0 : i32
    %c0_i32_1 = arith.constant 0 : i32
    %c0_i32_2 = arith.constant 0 : i32
    return %arg0, %c0_i32, %c0_i32_0, %c0_i32_1 : i32, i32, i32, i32
  }
  func.func @transform_1(%arg0: i32) -> (i32, i32) {
    %c0_i32 = arith.constant 0 : i32
    %c0_i32_0 = arith.constant 0 : i32
    %c0_i32_1 = arith.constant 0 : i32
    return %c0_i32, %c0_i32_0 : i32, i32
  }
  func.func @transform_2(%arg0: i32) -> (i32, i32, i32) {
    %c0_i32 = arith.constant 0 : i32
    %c0_i32_0 = arith.constant 0 : i32
    %c0_i32_1 = arith.constant 0 : i32
    return %arg0, %c0_i32, %c0_i32_0 : i32, i32, i32
  }
  func.func @transform_3(%arg0: i32) -> (i32, i32, i32) {
    %c0_i32 = arith.constant 0 : i32
    %c0_i32_0 = arith.constant 0 : i32
    %c0_i32_1 = arith.constant 0 : i32
    return %arg0, %c0_i32, %c0_i32_0 : i32, i32, i32
  }
}

</mosaic_0001>

<bundles_post_ra>
// kernel: conv_lstm_forward.1
= control target key start
LH: loop header
LB: loop body
LE: loop exit
PB: predicated region body
PF: predicated region fallthrough
CT: control target
= control target key end

     0   :  { %s8812_s12 = smov 0   ;;  %s11754_s0 = inlined_call_operand.vmem [shape: f32[2,8,16,512], index: 0, kind: input, shape index: {}]   ;;  %s11755_s1 = inlined_call_operand.vmem [shape: bf16[384,512], index: 1, kind: input, shape index: {}]   ;;  %s11756_s2 = inlined_call_operand.vmem [shape: f32[2,16,128], index: 2, kind: output, shape index: {0}]   ;;  %s11757_s3 = inlined_call_operand.vmem [shape: f32[2,16,128], index: 3, kind: output, shape index: {1}]  }
   0x1 LB: > { %s6978_s13 = sadd.s32 4294967295, %s8787_s12   ;;  %p6982_p0 = scmp.ge.s32.totalorder %s8787_s12, 1  ;;  %s8787_s12 = sphi %s8812_s12, %s14_s12  }
   0x2   : > { %p140_p1 = scmp.lt.s32.totalorder %s8787_s12, 3 }
   0x4   : > { %p141_p2 = pnand %p6982_p0, %p140_p1 }
   0x6   : > { %144 = sbr.rel (%p141_p2) target bundleno = 2459 (0x99b), region = 28 }
   0xd   : > { %v8823_v0 = vld [vmem:[%s11755_s1 + $0x4] ss:$16 sps:$4 sm:$0xff]   ;;  %v8828_v1 = vld [vmem:[%s11755_s1 + $0xc] ss:$16 sps:$4 sm:$0xff]   ;;  %v8789_v2 = vmov 0.0|0.0   ;;  %p169_p3 = scmp.lt.s32.totalorder %s6978_s13, 1 }
   0xe   : > { %828 = vmatprep.mubr.bf16.mxu0 %v8789_v2  ;;  %914 = vmatprep.mubr.bf16.mxu1 %v8789_v2  ;;  %v8834_v3 = vld [vmem:[%s11755_s1] ss:$16 sps:$4 sm:$0xff]   ;;  %v8839_v4 = vld [vmem:[%s11755_s1 + $0x8] ss:$16 sps:$4 sm:$0xff]   ;;  %v8845_v5 = vld [vmem:[%s11755_s1 + $0x24] ss:$16 sps:$4 sm:$0xff]  }
   0xf   : > { %796 = vmatprep.subr.bf16.mxu0 %v8823_v0  ;;  %882 = vmatprep.subr.bf16.mxu1 %v8828_v1  ;;  %v8852_v6 = vld [vmem:[%s11755_s1 + $0x2c] ss:$16 sps:$4 sm:$0xff]   ;;  %v8857_v7 = vld [vmem:[%s11755_s1 + $0x20] ss:$16 sps:$4 sm:$0xff]   ;;  %v8863_v8 = vld [vmem:[%s11755_s1 + $0x28] ss:$16 sps:$4 sm:$0xff]  }
  0x10   : > { %797 = vmatpush1.bf16.msra.mxu0 %v8834_v3  ;;  %883 = vmatpush1.bf16.msra.mxu1 %v8839_v4  ;;  %v8869_v9 = vld [vmem:[%s11755_s1 + $0x44] ss:$16 sps:$4 sm:$0xff]   ;;  %v8874_v10 = vld [vmem:[%s11755_s1 + $0x4c] ss:$16 sps:$4 sm:$0xff]   ;;  %v8879_v11 = vld [vmem:[%s11755_s1 + $0x40] ss:$16 sps:$4 sm:$0xff]  }
  0x11   : > { %798 = vmatprep.subr.bf16.mxu0 %v8845_v5  ;;  %884 = vmatprep.subr.bf16.mxu1 %v8852_v6  ;;  %v8884_v12 = vld [vmem:[%s11755_s1 + $0x48] ss:$16 sps:$4 sm:$0xff]   ;;  %v8891_v13 = vld [vmem:[%s11755_s1 + $0x64] ss:$16 sps:$4 sm:$0xff]   ;;  %v8898_v14 = vld [vmem:[%s11755_s1 + $0x6c] ss:$16 sps:$4 sm:$0xff]  }
  0x12   : > { %v8903_v15 = vld [vmem:[%s11755_s1 + $0x60] ss:$16 sps:$4 sm:$0xff]   ;;  %v8910_v16 = vld [vmem:[%s11755_s1 + $0x68] ss:$16 sps:$4 sm:$0xff]   ;;  %v8915_v17 = vld [vmem:[%s11755_s1 + $0x84] ss:$16 sps:$4 sm:$0xff]  }
  0x13   : > { %v8922_v18 = vld [vmem:[%s11755_s1 + $0x8c] ss:$16 sps:$4 sm:$0xff]   ;;  %v8927_v19 = vld [vmem:[%s11755_s1 + $0x80] ss:$16 sps:$4 sm:$0xff]   ;;  %v8932_v20 = vld [vmem:[%s11755_s1 + $0x88] ss:$16 sps:$4 sm:$0xff]  }
  0x14   : > { %799 = vmatpush1.bf16.msra.mxu0 %v8857_v7  ;;  %885 = vmatpush1.bf16.msra.mxu1 %v8863_v8  ;;  %v8939_v21 = vld [vmem:[%s11755_s1 + $0xa4] ss:$16 sps:$4 sm:$0xff]   ;;  %v8946_v22 = vld [vmem:[%s11755_s1 + $0xac] ss:$16 sps:$4 sm:$0xff]   ;;  %v8951_v23 = vld [vmem:[%s11755_s1 + $0xa0] ss:$16 sps:$4 sm:$0xff]  }
  0x15   : > { %800 = vmatprep.subr.bf16.mxu0 %v8869_v9  ;;  %886 = vmatprep.subr.bf16.mxu1 %v8874_v10  ;;  %v8958_v24 = vld [vmem:[%s11755_s1 + $0xa8] ss:$16 sps:$4 sm:$0xff]   ;;  %v8963_v25 = vld [vmem:[%s11755_s1 + $0xc4] ss:$16 sps:$4 sm:$0xff]   ;;  %v8970_v26 = vld [vmem:[%s11755_s1 + $0xcc] ss:$16 sps:$4 sm:$0xff]  }
  0x16   : > { %v8975_v27 = vld [vmem:[%s11755_s1 + $0xc0] ss:$16 sps:$4 sm:$0xff]   ;;  %v8980_v28 = vld [vmem:[%s11755_s1 + $0xc8] ss:$16 sps:$4 sm:$0xff]   ;;  %v8987_v29 = vld [vmem:[%s11755_s1 + $0xe4] ss:$16 sps:$4 sm:$0xff]  }
  0x17   : > { %v8994_v30 = vld [vmem:[%s11755_s1 + $0xec] ss:$16 sps:$4 sm:$0xff]   ;;  %v8999_v31 = vld [vmem:[%s11755_s1 + $0xe0] ss:$16 sps:$4 sm:$0xff]   ;;  %v9006_v32 = vld [vmem:[%s11755_s1 + $0xe8] ss:$16 sps:$4 sm:$0xff]  }
  0x18   : > { %801 = vmatpush1.bf16.msra.mxu0 %v8879_v11  ;;  %887 = vmatpush1.bf16.msra.mxu1 %v8884_v12  ;;  %v9011_v33 = vld [vmem:[%s11755_s1 + $0x104] ss:$16 sps:$4 sm:$0xff]   ;;  %v9018_v34 = vld [vmem:[%s11755_s1 + $0x10c] ss:$16 sps:$4 sm:$0xff]   ;;  %v9023_v35 = vld [vmem:[%s11755_s1 + $0x100] ss:$16 sps:$4 sm:$0xff]  }
  0x19   : > { %802 = vmatprep.subr.bf16.mxu0 %v8891_v13  ;;  %888 = vmatprep.subr.bf16.mxu1 %v8898_v14  ;;  %v9028_v36 = vld [vmem:[%s11755_s1 + $0x108] ss:$16 sps:$4 sm:$0xff]   ;;  %v9035_v37 = vld [vmem:[%s11755_s1 + $0x124] ss:$16 sps:$4 sm:$0xff]   ;;  %v9042_v38 = vld [vmem:[%s11755_s1 + $0x12c] ss:$16 sps:$4 sm:$0xff]  }
  0x1a   : > { %v9047_v39 = vld [vmem:[%s11755_s1 + $0x120] ss:$16 sps:$4 sm:$0xff]   ;;  %v9054_v40 = vld [vmem:[%s11755_s1 + $0x128] ss:$16 sps:$4 sm:$0xff]   ;;  %v9059_v41 = vld [vmem:[%s11755_s1 + $0x144] ss:$16 sps:$4 sm:$0xff]  }
  0x1b   : > { %v9066_v42 = vld [vmem:[%s11755_s1 + $0x14c] ss:$16 sps:$4 sm:$0xff]   ;;  %v9071_v43 = vld [vmem:[%s11755_s1 + $0x140] ss:$16 sps:$4 sm:$0xff]   ;;  %v9076_v44 = vld [vmem:[%s11755_s1 + $0x148] ss:$16 sps:$4 sm:$0xff]  }
  0x1c   : > { %803 = vmatpush1.bf16.msra.mxu0 %v8903_v15  ;;  %889 = vmatpush1.bf16.msra.mxu1 %v8910_v16  ;;  %v9083_v45 = vld [vmem:[%s11755_s1 + $0x164] ss:$16 sps:$4 sm:$0xff]   ;;  %v9090_v46 = vld [vmem:[%s11755_s1 + $0x16c] ss:$16 sps:$4 sm:$0xff]   ;;  %v9095_v47 = vld [vmem:[%s11755_s1 + $0x160] ss:$16 sps:$4 sm:$0xff]  }
  0x1d   : > { %804 = vmatprep.subr.bf16.mxu0 %v8915_v17  ;;  %890 = vmatprep.subr.bf16.mxu1 %v8922_v18  ;;  %v9100_v48 = vld [vmem:[%s11755_s1 + $0x168] ss:$16 sps:$4 sm:$0xff]   ;;  %v9107_v49 = vld [vmem:[%s11755_s1 + $0x184] ss:$16 sps:$4 sm:$0xff]   ;;  %v9114_v50 = vld [vmem:[%s11755_s1 + $0x18c] ss:$16 sps:$4 sm:$0xff]  }
  0x1e   : > { %v9119_v51 = vld [vmem:[%s11755_s1 + $0x180] ss:$16 sps:$4 sm:$0xff]   ;;  %v9124_v52 = vld [vmem:[%s11755_s1 + $0x188] ss:$16 sps:$4 sm:$0xff]   ;;  %v9131_v53 = vld [vmem:[%s11755_s1 + $0x1a4] ss:$16 sps:$4 sm:$0xff]  }
  0x1f   : > { %11907 = vst [vmem:[#allocation4_spill] sm:$0xff] %v9131_v53  ;;  %v9138_v54 = vld [vmem:[%s11755_s1 + $0x1ac] ss:$16 sps:$4 sm:$0xff]   ;;  %v9143_v55 = vld [vmem:[%s11755_s1 + $0x1a0] ss:$16 sps:$4 sm:$0xff]   ;;  %s12200_s13 = smov (!%p169_p3, %s6978_s13), 1 }
  0x20   : > { %805 = vmatpush1.bf16.msra.mxu0 %v8927_v19  ;;  %891 = vmatpush1.bf16.msra.mxu1 %v8932_v20  ;;  %11908 = vst [vmem:[#allocation5_spill] sm:$0xff] %v9138_v54  ;;  %11909 = vst [vmem:[#allocation6_spill] sm:$0xff] %v9143_v55  ;;  %v9148_v56 = vld [vmem:[%s11755_s1 + $0x1a8] ss:$16 sps:$4 sm:$0xff]   ;;  %v9155_v57 = vld [vmem:[%s11755_s1 + $0x1c4] ss:$16 sps:$4 sm:$0xff]  }
  0x21   : > { %806 = vmatprep.subr.bf16.mxu0 %v8939_v21  ;;  %892 = vmatprep.subr.bf16.mxu1 %v8946_v22  ;;  %11910 = vst [vmem:[#allocation7_spill] sm:$0xff] %v9148_v56  ;;  %11911 = vst [vmem:[#allocation8_spill] sm:$0xff] %v9155_v57  ;;  %v9162_v58 = vld [vmem:[%s11755_s1 + $0x1cc] ss:$16 sps:$4 sm:$0xff]   ;;  %v9167_v59 = vld [vmem:[%s11755_s1 + $0x1c0] ss:$16 sps:$4 sm:$0xff]  }
  0x22   : > { %11912 = vst [vmem:[#allocation9_spill] sm:$0xff] %v9162_v58  ;;  %11913 = vst [vmem:[#allocation10_spill] sm:$0xff] %v9167_v59  ;;  %v9172_v60 = vld [vmem:[%s11755_s1 + $0x1c8] ss:$16 sps:$4 sm:$0xff]   ;;  %v9179_v61 = vld [vmem:[%s11755_s1 + $0x1e4] ss:$16 sps:$4 sm:$0xff]  }
  0x23   : > { %11914 = vst [vmem:[#allocation11_spill] sm:$0xff] %v9172_v60  ;;  %11915 = vst [vmem:[#allocation12_spill] sm:$0xff] %v9179_v61  ;;  %v9186_v62 = vld [vmem:[%s11755_s1 + $0x1ec] ss:$16 sps:$4 sm:$0xff]   ;;  %v9191_v63 = vld [vmem:[%s11755_s1 + $0x1e0] ss:$16 sps:$4 sm:$0xff]  }
  0x24   : > { %807 = vmatpush1.bf16.msra.mxu0 %v8951_v23  ;;  %893 = vmatpush1.bf16.msra.mxu1 %v8958_v24  ;;  %11916 = vst [vmem:[#allocation13_spill] sm:$0xff] %v9186_v62  ;;  %11917 = vst [vmem:[#allocation14_spill] sm:$0xff] %v9191_v63  ;;  %v9196_v2 = vld [vmem:[%s11755_s1 + $0x1e8] ss:$16 sps:$4 sm:$0xff]   ;;  %s7863_s4 = sshll.u32 %s12200_s13, 9 }
  0x25   : > { %808 = vmatprep.subr.bf16.mxu0 %v8963_v25  ;;  %894 = vmatprep.subr.bf16.mxu1 %v8970_v26  ;;  %11918 = vst [vmem:[#allocation15_spill] sm:$0xff] %v9196_v2  ;;  %s9460_s7 = scalar_lea.vmem %s11754_s0, %s7863_s4 }
  0x28   : > { %809 = vmatpush1.bf16.msra.mxu0 %v8975_v27  ;;  %895 = vmatpush1.bf16.msra.mxu1 %v8980_v28 }
  0x29   : > { %810 = vmatprep.subr.bf16.mxu0 %v8987_v29  ;;  %896 = vmatprep.subr.bf16.mxu1 %v8994_v30 }
  0x2c   : > { %811 = vmatpush1.bf16.msra.mxu0 %v8999_v31  ;;  %897 = vmatpush1.bf16.msra.mxu1 %v9006_v32 }
  0x2d   : > { %812 = vmatprep.subr.bf16.mxu0 %v9011_v33  ;;  %898 = vmatprep.subr.bf16.mxu1 %v9018_v34 }
  0x30   : > { %813 = vmatpush1.bf16.msra.mxu0 %v9023_v35  ;;  %899 = vmatpush1.bf16.msra.mxu1 %v9028_v36 }
  0x31   : > { %814 = vmatprep.subr.bf16.mxu0 %v9035_v37  ;;  %900 = vmatprep.subr.bf16.mxu1 %v9042_v38 }
  0x34   : > { %815 = vmatpush1.bf16.msra.mxu0 %v9047_v39  ;;  %901 = vmatpush1.bf16.msra.mxu1 %v9054_v40 }
  0x35   : > { %816 = vmatprep.subr.bf16.mxu0 %v9059_v41  ;;  %902 = vmatprep.subr.bf16.mxu1 %v9066_v42 }
  0x38   : > { %817 = vmatpush1.bf16.msra.mxu0 %v9071_v43  ;;  %903 = vmatpush1.bf16.msra.mxu1 %v9076_v44 }
  0x39   : > { %818 = vmatprep.subr.bf16.mxu0 %v9083_v45  ;;  %904 = vmatprep.subr.bf16.mxu1 %v9090_v46 }
  0x3c   : > { %819 = vmatpush1.bf16.msra.mxu0 %v9095_v47  ;;  %905 = vmatpush1.bf16.msra.mxu1 %v9100_v48 }
  0x3d   : > { %820 = vmatprep.subr.bf16.mxu0 %v9107_v49  ;;  %906 = vmatprep.subr.bf16.mxu1 %v9114_v50 }
  0x40   : > { %821 = vmatpush1.bf16.msra.mxu0 %v9119_v51  ;;  %907 = vmatpush1.bf16.msra.mxu1 %v9124_v52 }
  0x41   : > { %822 = vmatprep.subr.bf16.mxu0 %v9131_v53  ;;  %908 = vmatprep.subr.bf16.mxu1 %v9138_v54  ;;  %v8046_v54 = vld [vmem:[%s11755_s1 + $0x228] ss:$16 sps:$4 sm:$0xff]  }
  0x44   : > { %823 = vmatpush1.bf16.msra.mxu0 %v9143_v55  ;;  %909 = vmatpush1.bf16.msra.mxu1 %v9148_v56  ;;  %v11762_v56 = vmov 0.0   ;;  %v9213_v55 = vld [vmem:[%s11755_s1 + $0x20c] ss:$16 sps:$4 sm:$0xff]  }
  0x45   : > { %824 = vmatprep.subr.bf16.mxu0 %v9155_v57  ;;  %910 = vmatprep.subr.bf16.mxu1 %v9162_v58  ;;  %v9199_v57 = vrot.slane %v11762_v56, 7  ;;  %v9206_v58 = vld [vmem:[%s11755_s1 + $0x204] ss:$16 sps:$4 sm:$0xff]   ;;  %11921 = vst [vmem:[#allocation18_spill] sm:$0xff] %v9213_v55  ;;  %v8037_v56 = vld [vmem:[%s11755_s1 + $0x200] ss:$16 sps:$4 sm:$0xff]  }
  0x46   : > { %11920 = vst [vmem:[#allocation17_spill] sm:$0xff] %v9206_v58 }
  0x47   : > { %11919 = vst [vmem:[#allocation16_spill] sm:$0xff] %v9199_v57 }
  0x48   : > { %825 = vmatpush1.bf16.msra.mxu0 %v9167_v59  ;;  %911 = vmatpush1.bf16.msra.mxu1 %v9172_v60  ;;  %v8040_v60 = vld [vmem:[%s11755_s1 + $0x208] ss:$16 sps:$4 sm:$0xff]   ;;  %v209_v59 = vpack.c.bf16 %v9199_v57, %v9199_v57  ;;  %v8043_v57 = vld [vmem:[%s11755_s1 + $0x220] ss:$16 sps:$4 sm:$0xff]  }
  0x49   : > { %826 = vmatprep.subr.bf16.mxu0 %v9179_v61  ;;  %912 = vmatprep.subr.bf16.mxu1 %v9186_v62  ;;  %v8045_v62 = vld [vmem:[%s11755_s1 + $0x224] ss:$16 sps:$4 sm:$0xff]   ;;  %v8048_v61 = vld [vmem:[%s11755_s1 + $0x22c] ss:$16 sps:$4 sm:$0xff]  }
  0x4c   : > { %827 = vmatpush1.bf16.msra.mxu0 %v9191_v63  ;;  %913 = vmatpush1.bf16.msra.mxu1 %v9196_v2  ;;  %v8051_v2 = vld [vmem:[%s11755_s1 + $0x244] ss:$16 sps:$4 sm:$0xff]   ;;  %v11774_v63 = vmov 0  }
  0x4d   : > { %839 = vmatprep.subr.bf16.mxu0 %v9206_v58  ;;  %925 = vmatprep.subr.bf16.mxu1 %v9213_v55  ;;  %v8054_v58 = vld [vmem:[%s11755_s1 + $0x24c] ss:$16 sps:$4 sm:$0xff]   ;;  %v9248_v55 = vld [vmem:[%s11755_s1 + $0x240] ss:$16 sps:$4 sm:$0xff]  }
  0x4e   : > { %11922 = vst [vmem:[#allocation19_spill] sm:$0xff] %v9248_v55 }
  0x4f   : > { %829 = vmatmul.mubr.bf16.vlgmr.msra.gmra.mrb[0].mxu0 %v209_v59  ;;  %915 = vmatmul.mubr.bf16.vlgmr.msra.gmra.mrb[0].mxu1 %v209_v59  ;;  %v9253_v59 = vld [vmem:[%s11755_s1 + $0x248] ss:$16 sps:$4 sm:$0xff]  }
  0x50   : > { %840 = vmatpush1.bf16.msra.mxu0 %v8037_v56  ;;  %926 = vmatpush1.bf16.msra.mxu1 %v8040_v60  ;;  %11923 = vst [vmem:[#allocation20_spill] sm:$0xff] %v9253_v59  ;;  %v9260_v56 = vld [vmem:[%s11755_s1 + $0x264] ss:$16 sps:$4 sm:$0xff]   ;;  %v9265_v60 = vld [vmem:[%s11755_s1 + $0x26c] ss:$16 sps:$4 sm:$0xff]  }
  0x51   : > { %841 = vmatprep.subr.bf16.mxu0 %v8045_v62  ;;  %927 = vmatprep.subr.bf16.mxu1 %v8048_v61  ;;  %11924 = vst [vmem:[#allocation21_spill] sm:$0xff] %v9260_v56  ;;  %11925 = vst [vmem:[#allocation22_spill] sm:$0xff] %v9265_v60  ;;  %v9270_v61 = vld [vmem:[%s11755_s1 + $0x260] ss:$16 sps:$4 sm:$0xff]   ;;  %v9275_v62 = vld [vmem:[%s11755_s1 + $0x268] ss:$16 sps:$4 sm:$0xff]  }
  0x52   : > { %871 = vmatprep.mubr.bf16.mxu0 %v11774_v63  ;;  %957 = vmatprep.mubr.bf16.mxu1 %v11774_v63  ;;  %11926 = vst [vmem:[#allocation23_spill] sm:$0xff] %v9270_v61  ;;  %11927 = vst [vmem:[#allocation24_spill] sm:$0xff] %v9275_v62  ;;  %v9280_v63 = vld [vmem:[%s11755_s1 + $0x284] ss:$16 sps:$4 sm:$0xff]  }
  0x53   : > { %11928 = vst [vmem:[#allocation25_spill] sm:$0xff] %v9280_v63 }
  0x54   : > { %842 = vmatpush1.bf16.msra.mxu0 %v8043_v57  ;;  %928 = vmatpush1.bf16.msra.mxu1 %v8046_v54  ;;  %v9285_v54 = vld [vmem:[%s11755_s1 + $0x28c] ss:$16 sps:$4 sm:$0xff]   ;;  %v9294_v57 = vld [vmem:[%s11755_s1 + $0x280] ss:$16 sps:$4 sm:$0xff]  }
  0x55   : > { %843 = vmatprep.subr.bf16.mxu0 %v8051_v2  ;;  %929 = vmatprep.subr.bf16.mxu1 %v8054_v58  ;;  %11929 = vst [vmem:[#allocation26_spill] sm:$0xff] %v9285_v54  ;;  %11930 = vst [vmem:[#allocation27_spill] sm:$0xff] %v9294_v57  ;;  %v9299_v58 = vld [vmem:[%s11755_s1 + $0x288] ss:$16 sps:$4 sm:$0xff]   ;;  %v9304_v2 = vld [vmem:[%s11755_s1 + $0x2a4] ss:$16 sps:$4 sm:$0xff]  }
  0x56   : > { %11931 = vst [vmem:[#allocation28_spill] sm:$0xff] %v9299_v58  ;;  %11932 = vst [vmem:[#allocation29_spill] sm:$0xff] %v9304_v2 }
  0x58   : > { %844 = vmatpush1.bf16.msra.mxu0 %v9248_v55  ;;  %930 = vmatpush1.bf16.msra.mxu1 %v9253_v59  ;;  %v9323_v59 = vld [vmem:[%s11755_s1 + $0x2a8] ss:$16 sps:$4 sm:$0xff]   ;;  %v11935_v55 = vmov 0.0  }
  0x59   : > { %845 = vmatprep.subr.bf16.mxu0 %v9260_v56  ;;  %931 = vmatprep.subr.bf16.mxu1 %v9265_v60  ;;  %v9309_v56 = vld [vmem:[%s11755_s1 + $0x2ac] ss:$16 sps:$4 sm:$0xff]   ;;  %v9318_v60 = vld [vmem:[%s11755_s1 + $0x2a0] ss:$16 sps:$4 sm:$0xff]   ;;  %v9374_v53 = vrot.slane %v11935_v55, 1 }
  0x5a   : > { %11933 = vst [vmem:[#allocation30_spill] sm:$0xff] %v9309_v56 }
  0x5c   : > { %846 = vmatpush1.bf16.msra.mxu0 %v9270_v61  ;;  %932 = vmatpush1.bf16.msra.mxu1 %v9275_v62  ;;  %v9328_v61 = vld [vmem:[%s11755_s1 + $0x2c4] ss:$16 sps:$4 sm:$0xff]   ;;  %v9347_v62 = vld [vmem:[%s11755_s1 + $0x2c8] ss:$16 sps:$4 sm:$0xff]  }
  0x5d   : > { %847 = vmatprep.subr.bf16.mxu0 %v9280_v63  ;;  %933 = vmatprep.subr.bf16.mxu1 %v9285_v54  ;;  %v9333_v63 = vld [vmem:[%s11755_s1 + $0x2cc] ss:$16 sps:$4 sm:$0xff]   ;;  %v9342_v54 = vld [vmem:[%s11755_s1 + $0x2c0] ss:$16 sps:$4 sm:$0xff]  }
  0x5e   : > { %11934 = vst [vmem:[#allocation31_spill] sm:$0xff] %v9333_v63 }
  0x60   : > { %848 = vmatpush1.bf16.msra.mxu0 %v9294_v57  ;;  %934 = vmatpush1.bf16.msra.mxu1 %v9299_v58  ;;  %v9352_v57 = vld [vmem:[%s11755_s1 + $0x2e4] ss:$16 sps:$4 sm:$0xff]   ;;  %v9371_v58 = vld [vmem:[%s11755_s1 + $0x2e8] ss:$16 sps:$4 sm:$0xff]  }
  0x61   : > { %849 = vmatprep.subr.bf16.mxu0 %v9304_v2  ;;  %935 = vmatprep.subr.bf16.mxu1 %v9309_v56  ;;  %v9357_v2 = vld [vmem:[%s11755_s1 + $0x2ec] ss:$16 sps:$4 sm:$0xff]   ;;  %v9366_v56 = vld [vmem:[%s11755_s1 + $0x2e0] ss:$16 sps:$4 sm:$0xff]  }
  0x64   : > { %850 = vmatpush1.bf16.msra.mxu0 %v9318_v60  ;;  %936 = vmatpush1.bf16.msra.mxu1 %v9323_v59 }
  0x65   : > { %851 = vmatprep.subr.bf16.mxu0 %v9328_v61  ;;  %937 = vmatprep.subr.bf16.mxu1 %v9333_v63  ;;  %v211_v63 = vpack.c.bf16 %v9374_v53, %v9374_v53 }
  0x68   : > { %852 = vmatpush1.bf16.msra.mxu0 %v9342_v54  ;;  %938 = vmatpush1.bf16.msra.mxu1 %v9347_v62 }
  0x69   : > { %853 = vmatprep.subr.bf16.mxu0 %v9352_v57  ;;  %939 = vmatprep.subr.bf16.mxu1 %v9357_v2 }
  0x6c   : > { %854 = vmatpush1.bf16.msra.mxu0 %v9366_v56  ;;  %940 = vmatpush1.bf16.msra.mxu1 %v9371_v58 }
  0x6d   : > { %1632 = vmatprep.subr.bf16.mxu0 %v8823_v0  ;;  %1718 = vmatprep.subr.bf16.mxu1 %v8828_v1  ;;  %v11936_v0 = vld [vmem:[#allocation4_spill] sm:$0xff]  ;;  %v11937_v1 = vld [vmem:[#allocation5_spill] sm:$0xff] }
  0x6f   : > { %872 = vmatmul.mubr.bf16.vlgmr.msra.gmra.mrb[0].mxu0 %v211_v63  ;;  %958 = vmatmul.mubr.bf16.vlgmr.msra.gmra.mrb[0].mxu1 %v211_v63 }
  0x70   : > { %1633 = vmatpush1.bf16.msra.mxu0 %v8834_v3  ;;  %1719 = vmatpush1.bf16.msra.mxu1 %v8839_v4  ;;  %v11938_v3 = vld [vmem:[#allocation6_spill] sm:$0xff]  ;;  %v11939_v4 = vld [vmem:[#allocation7_spill] sm:$0xff] }
  0x71   : > { %1634 = vmatprep.subr.bf16.mxu0 %v8845_v5  ;;  %1720 = vmatprep.subr.bf16.mxu1 %v8852_v6  ;;  %v11940_v5 = vld [vmem:[#allocation8_spill] sm:$0xff]  ;;  %v11941_v6 = vld [vmem:[#allocation9_spill] sm:$0xff] }
  0x74   : > { %1635 = vmatpush1.bf16.msra.mxu0 %v8857_v7  ;;  %1721 = vmatpush1.bf16.msra.mxu1 %v8863_v8  ;;  %v11942_v7 = vld [vmem:[#allocation10_spill] sm:$0xff]  ;;  %v11943_v8 = vld [vmem:[#allocation11_spill] sm:$0xff] }
  0x75   : > { %1636 = vmatprep.subr.bf16.mxu0 %v8869_v9  ;;  %1722 = vmatprep.subr.bf16.mxu1 %v8874_v10  ;;  %v11944_v9 = vld [vmem:[#allocation12_spill] sm:$0xff]  ;;  %v11945_v10 = vld [vmem:[#allocation13_spill] sm:$0xff] }
  0x78   : > { %1637 = vmatpush1.bf16.msra.mxu0 %v8879_v11  ;;  %1723 = vmatpush1.bf16.msra.mxu1 %v8884_v12  ;;  %v11946_v11 = vld [vmem:[#allocation14_spill] sm:$0xff]  ;;  %v11947_v12 = vld [vmem:[#allocation15_spill] sm:$0xff] }
  0x79   : > { %1638 = vmatprep.subr.bf16.mxu0 %v8891_v13  ;;  %1724 = vmatprep.subr.bf16.mxu1 %v8898_v14  ;;  %v11948_v13 = vld [vmem:[#allocation17_spill] sm:$0xff]  ;;  %v11949_v14 = vld [vmem:[#allocation18_spill] sm:$0xff] }
  0x7c   : > { %1639 = vmatpush1.bf16.msra.mxu0 %v8903_v15  ;;  %1725 = vmatpush1.bf16.msra.mxu1 %v8910_v16  ;;  %v212_v15 = vld [vmem:[%s9460_s7] sm:$0xff]  ;;  %v213_v16 = vld [vmem:[%s9460_s7 + $0x8] sm:$0xff] }
  0x7d   : > { %1640 = vmatprep.subr.bf16.mxu0 %v8915_v17  ;;  %1726 = vmatprep.subr.bf16.mxu1 %v8922_v18 }
  0x80   : > { %1641 = vmatpush1.bf16.msra.mxu0 %v8927_v19  ;;  %1727 = vmatpush1.bf16.msra.mxu1 %v8932_v20  ;;  %v216_v19 = vld [vmem:[%s9460_s7 + $0x20] sm:$0xff] }
  0x81   : > { %1642 = vmatprep.subr.bf16.mxu0 %v8939_v21  ;;  %1728 = vmatprep.subr.bf16.mxu1 %v8946_v22 }
  0x84   : > { %1643 = vmatpush1.bf16.msra.mxu0 %v8951_v23  ;;  %1729 = vmatpush1.bf16.msra.mxu1 %v8958_v24  ;;  %v217_v23 = vld [vmem:[%s9460_s7 + $0x28] sm:$0xff] }
  0x85   : > { %1644 = vmatprep.subr.bf16.mxu0 %v8963_v25  ;;  %1730 = vmatprep.subr.bf16.mxu1 %v8970_v26 }
  0x88   : > { %1645 = vmatpush1.bf16.msra.mxu0 %v8975_v27  ;;  %1731 = vmatpush1.bf16.msra.mxu1 %v8980_v28 }
  0x89   : > { %1646 = vmatprep.subr.bf16.mxu0 %v8987_v29  ;;  %1732 = vmatprep.subr.bf16.mxu1 %v8994_v30 }
  0x8c   : > { %1647 = vmatpush1.bf16.msra.mxu0 %v8999_v31  ;;  %1733 = vmatpush1.bf16.msra.mxu1 %v9006_v32 }
  0x8d   : > { %1648 = vmatprep.subr.bf16.mxu0 %v9011_v33  ;;  %1734 = vmatprep.subr.bf16.mxu1 %v9018_v34  ;;  %v215_v33 = vld [vmem:[%s9460_s7 + $0x18] sm:$0xff] }
  0x90   : > { %1649 = vmatpush1.bf16.msra.mxu0 %v9023_v35  ;;  %1735 = vmatpush1.bf16.msra.mxu1 %v9028_v36  ;;  %v214_v36 = vld [vmem:[%s9460_s7 + $0x10] sm:$0xff] }
  0x91   : > { %1650 = vmatprep.subr.bf16.mxu0 %v9035_v37  ;;  %1736 = vmatprep.subr.bf16.mxu1 %v9042_v38  ;;  %v219_v38 = vld [vmem:[%s9460_s7 + $0x38] sm:$0xff] }
  0x94   : > { %1651 = vmatpush1.bf16.msra.mxu0 %v9047_v39  ;;  %1737 = vmatpush1.bf16.msra.mxu1 %v9054_v40  ;;  %v218_v39 = vld [vmem:[%s9460_s7 + $0x30] sm:$0xff] }
  0x95   : > { %1652 = vmatprep.subr.bf16.mxu0 %v9059_v41  ;;  %1738 = vmatprep.subr.bf16.mxu1 %v9066_v42 }
  0x98   : > { %1653 = vmatpush1.bf16.msra.mxu0 %v9071_v43  ;;  %1739 = vmatpush1.bf16.msra.mxu1 %v9076_v44 }
  0x99   : > { %1654 = vmatprep.subr.bf16.mxu0 %v9083_v45  ;;  %1740 = vmatprep.subr.bf16.mxu1 %v9090_v46 }
  0x9c   : > { %1655 = vmatpush1.bf16.msra.mxu0 %v9095_v47  ;;  %1741 = vmatpush1.bf16.msra.mxu1 %v9100_v48 }
  0x9d   : > { %1656 = vmatprep.subr.bf16.mxu0 %v9107_v49  ;;  %1742 = vmatprep.subr.bf16.mxu1 %v9114_v50 }
  0xa0   : > { %1657 = vmatpush1.bf16.msra.mxu0 %v9119_v51  ;;  %1743 = vmatpush1.bf16.msra.mxu1 %v9124_v52 }
  0xa1   : > { %1658 = vmatprep.subr.bf16.mxu0 %v11936_v0  ;;  %1744 = vmatprep.subr.bf16.mxu1 %v11937_v1 }
  0xa4   : > { %1659 = vmatpush1.bf16.msra.mxu0 %v11938_v3  ;;  %1745 = vmatpush1.bf16.msra.mxu1 %v11939_v4 }
  0xa5   : > { %1660 = vmatprep.subr.bf16.mxu0 %v11940_v5  ;;  %1746 = vmatprep.subr.bf16.mxu1 %v11941_v6 }
  0xa8   : > { %1661 = vmatpush1.bf16.msra.mxu0 %v11942_v7  ;;  %1747 = vmatpush1.bf16.msra.mxu1 %v11943_v8 }
  0xa9   : > { %1662 = vmatprep.subr.bf16.mxu0 %v11944_v9  ;;  %1748 = vmatprep.subr.bf16.mxu1 %v11945_v10 }
  0xac   : > { %1663 = vmatpush1.bf16.msra.mxu0 %v11946_v11  ;;  %1749 = vmatpush1.bf16.msra.mxu1 %v11947_v12 }
  0xad   : > { %1675 = vmatprep.subr.bf16.mxu0 %v11948_v13  ;;  %1761 = vmatprep.subr.bf16.mxu1 %v11949_v14 }
 0x142   : > { %v873_v17 = vpop.f32.mrb[0].mxu0  ;;  %v959_v18 = vpop.f32.mrb[0].mxu1 }
 0x143   : > { %v968_v20 = vadd.f32 %v873_v17, %v212_v15  ;;  %v875_v21 = vpop.f32.mrb[1].mxu0  ;;  %v961_v22 = vpop.f32.mrb[1].mxu1  ;;  %v970_v40 = vadd.f32 %v959_v18, %v214_v36  ;;  %v198_v15 = vlaneseq  ;;  %v8774_v36 = vld [vmem:[%s11755_s1 + $0x208] ss:$16 sps:$4 sm:$0xff]  }
 0x144   : > { %v969_v24 = vadd.f32 %v875_v21, %v213_v16  ;;  %v877_v25 = vpop.f32.mrb[2].mxu0  ;;  %v963_v26 = vpop.f32.mrb[2].mxu1  ;;  %v971_v37 = vadd.f32 %v961_v22, %v215_v33 }
 0x145   : > { %v7087_v27 = vmul.f32 -1.442695, %v968_v20  ;;  %v972_v28 = vadd.f32 %v877_v25, %v216_v19  ;;  %v879_v29 = vpop.f32.mrb[3].mxu0  ;;  %v965_v30 = vpop.f32.mrb[3].mxu1  ;;  %v974_v43 = vadd.f32 %v963_v26, %v218_v39  ;;  %v9476_v19 = vshrl.u32 %v198_v15, 7 }
 0x146   : > { %v7085_v31 = vmul.f32 -1.442695, %v969_v24  ;;  %v973_v32 = vadd.f32 %v879_v29, %v217_v23  ;;  %v7089_v41 = vmul.f32 -1.442695, %v971_v37  ;;  %v975_v42 = vadd.f32 %v965_v30, %v219_v38  ;;  %v8775_v37 = vld [vmem:[%s11755_s1 + $0x224] ss:$16 sps:$4 sm:$0xff]  }
 0x147   : > { %8517 = vpow2.f32 %v7087_v27  ;;  %v7088_v34 = vmul.f32 -1.442695, %v972_v28  ;;  %vm200_vm0 = vcmp.lt.s32.totalorder %v9476_v19, 1  ;;  %vm206_vm1 = vcmp.lt.s32.totalorder %v9476_v19, 7  ;;  %v11950_v28 = vld [vmem:[#allocation16_spill] sm:$0xff] }
 0x148   : > { %8519 = vpow2.f32 %v7085_v31  ;;  %v7086_v35 = vmul.f32 -1.442695, %v973_v32  ;;  %v7090_v47 = vmul.f32 -1.442695, %v975_v42  ;;  %v8776_v38 = vld [vmem:[%s11755_s1 + $0x22c] ss:$16 sps:$4 sm:$0xff]  }
 0x149   : > { %8521 = vpow2.f32 %v7088_v34  ;;  %v11951_v39 = vmov 0   ;;  %v8779_v42 = vld [vmem:[%s11755_s1 + $0x244] ss:$16 sps:$4 sm:$0xff]   ;;  %v9652_v15 = vld [vmem:[%s11755_s1 + $0x8c] ss:$16 sps:$4 sm:$0xff]  }
 0x14a   : > { %8523 = vpow2.f32 %v7086_v35  ;;  %v8773_v35 = vld [vmem:[%s11755_s1 + $0x200] ss:$16 sps:$4 sm:$0xff]  }
 0x14b   : > { %8525 = vtanh.f32 %v970_v40  ;;  %v8777_v40 = vld [vmem:[%s11755_s1 + $0x220] ss:$16 sps:$4 sm:$0xff]  }
 0x14c   : > { %8527 = vpow2.f32 %v7089_v41  ;;  %v8778_v41 = vld [vmem:[%s11755_s1 + $0x228] ss:$16 sps:$4 sm:$0xff]  }
 0x14d   : > { %8529 = vtanh.f32 %v974_v43  ;;  %v8780_v43 = vld [vmem:[%s11755_s1 + $0x24c] ss:$16 sps:$4 sm:$0xff]  }
 0x151   : > { %v8518_v44 = vpop.eup %8517 }
 0x152   : > { %v8520_v45 = vpop.eup %8519  ;;  %v998_v46 = vadd.f32 1.0, %v8518_v44  ;;  %v11952_v44 = vld [vmem:[#allocation19_spill] sm:$0xff] }
 0x153   : > { %v984_v48 = vadd.f32 1.0, %v8520_v45  ;;  %v8522_v49 = vpop.eup %8521  ;;  %v11953_v45 = vld [vmem:[#allocation20_spill] sm:$0xff] }
 0x154   : > { %8531 = vrcp.f32 %v998_v46  ;;  %v999_v50 = vadd.f32 1.0, %v8522_v49  ;;  %v8524_v51 = vpop.eup %8523  ;;  %v11954_v46 = vld [vmem:[#allocation21_spill] sm:$0xff]  ;;  %v11957_v49 = vld [vmem:[#allocation24_spill] sm:$0xff] }
 0x155   : > { %8533 = vrcp.f32 %v984_v48  ;;  %v985_v52 = vadd.f32 1.0, %v8524_v51  ;;  %v8526_v55 = vpop.eup %8525  ;;  %v11956_v48 = vld [vmem:[#allocation23_spill] sm:$0xff]  ;;  %v11959_v51 = vld [vmem:[#allocation26_spill] sm:$0xff] }
 0x156   : > { %8535 = vpow2.f32 %v7090_v47  ;;  %v8528_v63 = vpop.eup %8527  ;;  %v11955_v47 = vld [vmem:[#allocation22_spill] sm:$0xff] }
 0x157   : > { %8537 = vrcp.f32 %v999_v50  ;;  %v8530_v0 = vpop.eup %8529  ;;  %v1016_v5 = vadd.f32 1.0, %v8528_v63  ;;  %v11958_v50 = vld [vmem:[#allocation25_spill] sm:$0xff] }
 0x158   : > { %8539 = vrcp.f32 %v985_v52  ;;  %v11960_v52 = vld [vmem:[#allocation27_spill] sm:$0xff]  ;;  %v11962_v63 = vld [vmem:[#allocation29_spill] sm:$0xff] }
 0x159   : > { %8541 = vrcp.f32 %v1016_v5  ;;  %v9604_v5 = vld [vmem:[%s11755_s1 + $0x48] ss:$16 sps:$4 sm:$0xff]  }
 0x15e   : > { %v8532_v1 = vpop.eup %8531 }
 0x15f   : > { %v8534_v3 = vpop.eup %8533  ;;  %v1006_v4 = vmul.f32 %v8532_v1, %v8526_v55  ;;  %v11961_v55 = vld [vmem:[#allocation28_spill] sm:$0xff]  ;;  %v11964_v1 = vld [vmem:[#allocation31_spill] sm:$0xff] }
 0x160   : > { %v8536_v6 = vpop.eup %8535  ;;  %v990_v7 = vmul.f32 0.0, %v8534_v3  ;;  %v9539_v3 = vld [vmem:[%s11755_s1 + $0x4] ss:$16 sps:$4 sm:$0xff]  }
 0x161   : > { %v8538_v8 = vpop.eup %8537  ;;  %v1017_v12 = vadd.f32 1.0, %v8536_v6  ;;  %v9613_v6 = vld [vmem:[%s11755_s1 + $0x64] ss:$16 sps:$4 sm:$0xff]  }
 0x162   : > { %v9470_v9 = vadd.f32 %v1006_v4, %v990_v7  ;;  %v1007_v10 = vmul.f32 %v8538_v8, %v8530_v0  ;;  %v8540_v11 = vpop.eup %8539  ;;  %v11963_v0 = vld [vmem:[#allocation30_spill] sm:$0xff]  ;;  %v9618_v7 = vld [vmem:[%s11755_s1 + $0x6c] ss:$16 sps:$4 sm:$0xff]  }
 0x163   : > { %v991_v13 = vmul.f32 0.0, %v8540_v11  ;;  %v8542_v16 = vpop.eup %8541  ;;  %v9599_v4 = vld [vmem:[%s11755_s1 + $0x40] ss:$16 sps:$4 sm:$0xff]   ;;  %v9637_v11 = vld [vmem:[%s11755_s1 + $0x84] ss:$16 sps:$4 sm:$0xff]  }
 0x164   : > { %8543 = vtanh.f32 %v9470_v9  ;;  %v9623_v8 = vld [vmem:[%s11755_s1 + $0x60] ss:$16 sps:$4 sm:$0xff]  }
 0x165   : > { %v9473_v14 = vadd.f32 %v1007_v10, %v991_v13  ;;  %8545 = vrcp.f32 %v1017_v12  ;;  %v9628_v10 = vld [vmem:[%s11755_s1 + $0x68] ss:$16 sps:$4 sm:$0xff]   ;;  %v9642_v12 = vld [vmem:[%s11755_s1 + $0x80] ss:$16 sps:$4 sm:$0xff]  }
 0x166   : > { %v9647_v13 = vld [vmem:[%s11755_s1 + $0x88] ss:$16 sps:$4 sm:$0xff]  }
 0x167   : > { %8547 = vtanh.f32 %v9473_v14 }
 0x16e   : > { %v8544_v17 = vpop.eup %8543 }
 0x16f   : > { %v1024_v18 = vmul.f32 %v8544_v17, %v8542_v16  ;;  %v8546_v20 = vpop.eup %8545  ;;  %v9661_v16 = vld [vmem:[%s11755_s1 + $0xa4] ss:$16 sps:$4 sm:$0xff]   ;;  %v9666_v17 = vld [vmem:[%s11755_s1 + $0xac] ss:$16 sps:$4 sm:$0xff]  }
 0x171   : > { %v8548_v21 = vpop.eup %8547  ;;  %v1035_v22 = vrot.slane %v1024_v18, 7  ;;  %v1039_v26 = vrot.slane %v1024_v18, 1 }
 0x172   : > { %v1025_v23 = vmul.f32 %v8548_v21, %v8546_v20  ;;  %v9676_v20 = vld [vmem:[%s11755_s1 + $0xa8] ss:$16 sps:$4 sm:$0xff]   ;;  %v9685_v21 = vld [vmem:[%s11755_s1 + $0xc4] ss:$16 sps:$4 sm:$0xff]  }
 0x173   : > { %v1038_v29 = vsel %vm200_vm0, %v11950_v28, %v1035_v22 }
 0x174   : > { %v1045_v24 = vpack.c.bf16 %v1025_v23, %v1024_v18  ;;  %v1036_v25 = vrot.slane %v1025_v23, 7  ;;  %v1040_v27 = vrot.slane %v1025_v23, 1  ;;  %v9671_v18 = vld [vmem:[%s11755_s1 + $0xa0] ss:$16 sps:$4 sm:$0xff]  }
 0x175   : > { %v9695_v23 = vld [vmem:[%s11755_s1 + $0xc0] ss:$16 sps:$4 sm:$0xff]  }
 0x176   : > { %1664 = vmatprep.mubr.bf16.mxu0 %v1045_v24  ;;  %1750 = vmatprep.mubr.bf16.mxu1 %v1045_v24  ;;  %v1037_v30 = vsel %vm200_vm0, %v1035_v22, %v1036_v25  ;;  %v1042_v31 = vsel %vm206_vm1, %v1040_v27, %v9374_v53  ;;  %v1043_v32 = vsel %vm206_vm1, %v1039_v26, %v1040_v27  ;;  %v9690_v22 = vld [vmem:[%s11755_s1 + $0xcc] ss:$16 sps:$4 sm:$0xff]   ;;  %v9700_v24 = vld [vmem:[%s11755_s1 + $0xc8] ss:$16 sps:$4 sm:$0xff]   ;;  %v9709_v25 = vld [vmem:[%s11755_s1 + $0xe4] ss:$16 sps:$4 sm:$0xff]  }
 0x177   : > { %v1044_v33 = vpack.c.bf16 %v1037_v30, %v1038_v29  ;;  %v1046_v34 = vpack.c.bf16 %v1042_v31, %v1043_v32  ;;  %v9714_v26 = vld [vmem:[%s11755_s1 + $0xec] ss:$16 sps:$4 sm:$0xff]   ;;  %v9719_v27 = vld [vmem:[%s11755_s1 + $0xe0] ss:$16 sps:$4 sm:$0xff]   ;;  %v9724_v29 = vld [vmem:[%s11755_s1 + $0xe8] ss:$16 sps:$4 sm:$0xff]  }
 0x178   : > { %v9733_v30 = vld [vmem:[%s11755_s1 + $0x104] ss:$16 sps:$4 sm:$0xff]   ;;  %v9738_v31 = vld [vmem:[%s11755_s1 + $0x10c] ss:$16 sps:$4 sm:$0xff]   ;;  %v9743_v32 = vld [vmem:[%s11755_s1 + $0x100] ss:$16 sps:$4 sm:$0xff]  }
 0x179   : > { %1665 = vmatmul.mubr.bf16.vlgmr.msra.gmra.mrb[4].mxu0 %v1044_v33  ;;  %1751 = vmatmul.mubr.bf16.vlgmr.msra.gmra.mrb[4].mxu1 %v1044_v33  ;;  %11965 = vst [vmem:[#allocation4_spill] sm:$0xff] %v9743_v32  ;;  %v9748_v33 = vld [vmem:[%s11755_s1 + $0x108] ss:$16 sps:$4 sm:$0xff]  }
 0x17a   : > { %1676 = vmatpush1.bf16.msra.mxu0 %v8773_v35  ;;  %1762 = vmatpush1.bf16.msra.mxu1 %v8774_v36  ;;  %11966 = vst [vmem:[#allocation5_spill] sm:$0xff] %v9748_v33  ;;  %v9762_v35 = vld [vmem:[%s11755_s1 + $0x12c] ss:$16 sps:$4 sm:$0xff]   ;;  %v9767_v36 = vld [vmem:[%s11755_s1 + $0x120] ss:$16 sps:$4 sm:$0xff]  }
 0x17b   : > { %1677 = vmatprep.subr.bf16.mxu0 %v8775_v37  ;;  %1763 = vmatprep.subr.bf16.mxu1 %v8776_v38  ;;  %11968 = vst [vmem:[#allocation7_spill] sm:$0xff] %v9762_v35  ;;  %11969 = vst [vmem:[#allocation8_spill] sm:$0xff] %v9767_v36  ;;  %v9772_v37 = vld [vmem:[%s11755_s1 + $0x128] ss:$16 sps:$4 sm:$0xff]   ;;  %v9781_v38 = vld [vmem:[%s11755_s1 + $0x144] ss:$16 sps:$4 sm:$0xff]  }
 0x17c   : > { %1707 = vmatprep.mubr.bf16.mxu0 %v11951_v39  ;;  %1793 = vmatprep.mubr.bf16.mxu1 %v11951_v39  ;;  %11970 = vst [vmem:[#allocation9_spill] sm:$0xff] %v9772_v37  ;;  %11971 = vst [vmem:[#allocation10_spill] sm:$0xff] %v9781_v38 }
 0x17e   : > { %1678 = vmatpush1.bf16.msra.mxu0 %v8777_v40  ;;  %1764 = vmatpush1.bf16.msra.mxu1 %v8778_v41  ;;  %v9786_v40 = vld [vmem:[%s11755_s1 + $0x14c] ss:$16 sps:$4 sm:$0xff]   ;;  %v9791_v41 = vld [vmem:[%s11755_s1 + $0x140] ss:$16 sps:$4 sm:$0xff]  }
 0x17f   : > { %1679 = vmatprep.subr.bf16.mxu0 %v8779_v42  ;;  %1765 = vmatprep.subr.bf16.mxu1 %v8780_v43  ;;  %11972 = vst [vmem:[#allocation11_spill] sm:$0xff] %v9786_v40  ;;  %11973 = vst [vmem:[#allocation12_spill] sm:$0xff] %v9791_v41  ;;  %v9796_v42 = vld [vmem:[%s11755_s1 + $0x148] ss:$16 sps:$4 sm:$0xff]   ;;  %v9805_v43 = vld [vmem:[%s11755_s1 + $0x164] ss:$16 sps:$4 sm:$0xff]  }
 0x180   : > { %11974 = vst [vmem:[#allocation13_spill] sm:$0xff] %v9796_v42  ;;  %11975 = vst [vmem:[#allocation14_spill] sm:$0xff] %v9805_v43 }
 0x182   : > { %1680 = vmatpush1.bf16.msra.mxu0 %v11952_v44  ;;  %1766 = vmatpush1.bf16.msra.mxu1 %v11953_v45  ;;  %v9810_v44 = vld [vmem:[%s11755_s1 + $0x16c] ss:$16 sps:$4 sm:$0xff]   ;;  %v9815_v45 = vld [vmem:[%s11755_s1 + $0x160] ss:$16 sps:$4 sm:$0xff]  }
 0x183   : > { %1681 = vmatprep.subr.bf16.mxu0 %v11954_v46  ;;  %1767 = vmatprep.subr.bf16.mxu1 %v11955_v47  ;;  %11976 = vst [vmem:[#allocation15_spill] sm:$0xff] %v9810_v44  ;;  %11977 = vst [vmem:[#allocation17_spill] sm:$0xff] %v9815_v45  ;;  %v9820_v46 = vld [vmem:[%s11755_s1 + $0x168] ss:$16 sps:$4 sm:$0xff]   ;;  %v9827_v47 = vld [vmem:[%s11755_s1 + $0x184] ss:$16 sps:$4 sm:$0xff]  }
 0x184   : > { %11978 = vst [vmem:[#allocation18_spill] sm:$0xff] %v9820_v46  ;;  %11979 = vst [vmem:[#allocation16_spill] sm:$0xff] %v9827_v47 }
 0x186   : > { %1682 = vmatpush1.bf16.msra.mxu0 %v11956_v48  ;;  %1768 = vmatpush1.bf16.msra.mxu1 %v11957_v49  ;;  %v9832_v48 = vld [vmem:[%s11755_s1 + $0x18c] ss:$16 sps:$4 sm:$0xff]   ;;  %v9838_v49 = vld [vmem:[%s11755_s1 + $0x180] ss:$16 sps:$4 sm:$0xff]  }
 0x187   : > { %1683 = vmatprep.subr.bf16.mxu0 %v11958_v50  ;;  %1769 = vmatprep.subr.bf16.mxu1 %v11959_v51  ;;  %11980 = vst [vmem:[#allocation19_spill] sm:$0xff] %v9832_v48  ;;  %11981 = vst [vmem:[#allocation20_spill] sm:$0xff] %v9838_v49  ;;  %v9845_v50 = vld [vmem:[%s11755_s1 + $0x188] ss:$16 sps:$4 sm:$0xff]   ;;  %v9850_v51 = vld [vmem:[%s11755_s1 + $0x1a4] ss:$16 sps:$4 sm:$0xff]  }
 0x188   : > { %11982 = vst [vmem:[#allocation21_spill] sm:$0xff] %v9845_v50  ;;  %11983 = vst [vmem:[#allocation22_spill] sm:$0xff] %v9850_v51 }
 0x18a   : > { %1684 = vmatpush1.bf16.msra.mxu0 %v11960_v52  ;;  %1770 = vmatpush1.bf16.msra.mxu1 %v11961_v55  ;;  %v9856_v52 = vld [vmem:[%s11755_s1 + $0x1ac] ss:$16 sps:$4 sm:$0xff]   ;;  %v9862_v55 = vld [vmem:[%s11755_s1 + $0x1a0] ss:$16 sps:$4 sm:$0xff]  }
 0x18b   : > { %1685 = vmatprep.subr.bf16.mxu0 %v11962_v63  ;;  %1771 = vmatprep.subr.bf16.mxu1 %v11963_v0  ;;  %11984 = vst [vmem:[#allocation23_spill] sm:$0xff] %v9856_v52  ;;  %11985 = vst [vmem:[#allocation24_spill] sm:$0xff] %v9862_v55  ;;  %v9869_v63 = vld [vmem:[%s11755_s1 + $0x1a8] ss:$16 sps:$4 sm:$0xff]   ;;  %v9874_v0 = vld [vmem:[%s11755_s1 + $0x1c4] ss:$16 sps:$4 sm:$0xff]  }
 0x18c   : > { %11986 = vst [vmem:[#allocation25_spill] sm:$0xff] %v9869_v63  ;;  %11987 = vst [vmem:[#allocation26_spill] sm:$0xff] %v9874_v0 }
 0x18e   : > { %1686 = vmatpush1.bf16.msra.mxu0 %v9318_v60  ;;  %1772 = vmatpush1.bf16.msra.mxu1 %v9323_v59  ;;  %v9544_v59 = vld [vmem:[%s11755_s1 + $0xc] ss:$16 sps:$4 sm:$0xff]   ;;  %v9551_v60 = vld [vmem:[%s11755_s1] ss:$16 sps:$4 sm:$0xff]  }
 0x18f   : > { %1687 = vmatprep.subr.bf16.mxu0 %v9328_v61  ;;  %1773 = vmatprep.subr.bf16.mxu1 %v11964_v1  ;;  %v9556_v61 = vld [vmem:[%s11755_s1 + $0x8] ss:$16 sps:$4 sm:$0xff]   ;;  %v9880_v1 = vld [vmem:[%s11755_s1 + $0x1cc] ss:$16 sps:$4 sm:$0xff]  }
 0x190   : > { %11988 = vst [vmem:[#allocation27_spill] sm:$0xff] %v9880_v1 }
 0x192   : > { %1688 = vmatpush1.bf16.msra.mxu0 %v9342_v54  ;;  %1774 = vmatpush1.bf16.msra.mxu1 %v9347_v62  ;;  %v9568_v62 = vld [vmem:[%s11755_s1 + $0x2c] ss:$16 sps:$4 sm:$0xff]   ;;  %v9575_v54 = vld [vmem:[%s11755_s1 + $0x20] ss:$16 sps:$4 sm:$0xff]  }
 0x193   : > { %1689 = vmatprep.subr.bf16.mxu0 %v9352_v57  ;;  %1775 = vmatprep.subr.bf16.mxu1 %v9357_v2  ;;  %v9580_v57 = vld [vmem:[%s11755_s1 + $0x28] ss:$16 sps:$4 sm:$0xff]   ;;  %v9592_v2 = vld [vmem:[%s11755_s1 + $0x4c] ss:$16 sps:$4 sm:$0xff]  }
 0x196   : > { %1690 = vmatpush1.bf16.msra.mxu0 %v9366_v56  ;;  %1776 = vmatpush1.bf16.msra.mxu1 %v9371_v58  ;;  %v9563_v56 = vld [vmem:[%s11755_s1 + $0x24] ss:$16 sps:$4 sm:$0xff]  }
 0x197   : > { %2468 = vmatprep.subr.bf16.mxu0 %v9539_v3  ;;  %2554 = vmatprep.subr.bf16.mxu1 %v9544_v59  ;;  %v9587_v58 = vld [vmem:[%s11755_s1 + $0x44] ss:$16 sps:$4 sm:$0xff]  }
 0x199   : > { %1708 = vmatmul.mubr.bf16.vlgmr.msra.gmra.mrb[4].mxu0 %v1046_v34  ;;  %1794 = vmatmul.mubr.bf16.vlgmr.msra.gmra.mrb[4].mxu1 %v1046_v34  ;;  %v9757_v34 = vld [vmem:[%s11755_s1 + $0x124] ss:$16 sps:$4 sm:$0xff]  }
 0x19a   : > { %2469 = vmatpush1.bf16.msra.mxu0 %v9551_v60  ;;  %2555 = vmatpush1.bf16.msra.mxu1 %v9556_v61  ;;  %11967 = vst [vmem:[#allocation6_spill] sm:$0xff] %v9757_v34 }
 0x19b   : > { %2470 = vmatprep.subr.bf16.mxu0 %v9563_v56  ;;  %2556 = vmatprep.subr.bf16.mxu1 %v9568_v62 }
 0x19e   : > { %2471 = vmatpush1.bf16.msra.mxu0 %v9575_v54  ;;  %2557 = vmatpush1.bf16.msra.mxu1 %v9580_v57 }
 0x19f   : > { %2472 = vmatprep.subr.bf16.mxu0 %v9587_v58  ;;  %2558 = vmatprep.subr.bf16.mxu1 %v9592_v2 }
 0x1a2   : > { %2473 = vmatpush1.bf16.msra.mxu0 %v9599_v4  ;;  %2559 = vmatpush1.bf16.msra.mxu1 %v9604_v5 }
 0x1a3   : > { %2474 = vmatprep.subr.bf16.mxu0 %v9613_v6  ;;  %2560 = vmatprep.subr.bf16.mxu1 %v9618_v7 }
 0x1a6   : > { %2475 = vmatpush1.bf16.msra.mxu0 %v9623_v8  ;;  %2561 = vmatpush1.bf16.msra.mxu1 %v9628_v10 }
 0x1a7   : > { %2476 = vmatprep.subr.bf16.mxu0 %v9637_v11  ;;  %2562 = vmatprep.subr.bf16.mxu1 %v9652_v15 }
 0x1aa   : > { %2477 = vmatpush1.bf16.msra.mxu0 %v9642_v12  ;;  %2563 = vmatpush1.bf16.msra.mxu1 %v9647_v13 }
 0x1ab   : > { %2478 = vmatprep.subr.bf16.mxu0 %v9661_v16  ;;  %2564 = vmatprep.subr.bf16.mxu1 %v9666_v17 }
 0x1ae   : > { %2479 = vmatpush1.bf16.msra.mxu0 %v9671_v18  ;;  %2565 = vmatpush1.bf16.msra.mxu1 %v9676_v20 }
 0x1af   : > { %2480 = vmatprep.subr.bf16.mxu0 %v9685_v21  ;;  %2566 = vmatprep.subr.bf16.mxu1 %v9690_v22 }
 0x1b2   : > { %2481 = vmatpush1.bf16.msra.mxu0 %v9695_v23  ;;  %2567 = vmatpush1.bf16.msra.mxu1 %v9700_v24 }
 0x1b3   : > { %2482 = vmatprep.subr.bf16.mxu0 %v9709_v25  ;;  %2568 = vmatprep.subr.bf16.mxu1 %v9714_v26 }
 0x1b6   : > { %2483 = vmatpush1.bf16.msra.mxu0 %v9719_v27  ;;  %2569 = vmatpush1.bf16.msra.mxu1 %v9724_v29 }
 0x1b7   : > { %2484 = vmatprep.subr.bf16.mxu0 %v9733_v30  ;;  %2570 = vmatprep.subr.bf16.mxu1 %v9738_v31 }
 0x1ba   : > { %2485 = vmatpush1.bf16.msra.mxu0 %v9743_v32  ;;  %2571 = vmatpush1.bf16.msra.mxu1 %v9748_v33 }
 0x1bb   : > { %2486 = vmatprep.subr.bf16.mxu0 %v9757_v34  ;;  %2572 = vmatprep.subr.bf16.mxu1 %v9762_v35  ;;  %v7098_v34 = vld [vmem:[%s9460_s7 + $0x78] sm:$0xff] }
 0x1be   : > { %2487 = vmatpush1.bf16.msra.mxu0 %v9767_v36  ;;  %2573 = vmatpush1.bf16.msra.mxu1 %v9772_v37  ;;  %v7094_v37 = vld [vmem:[%s9460_s7 + $0x58] sm:$0xff] }
 0x1bf   : > { %2488 = vmatprep.subr.bf16.mxu0 %v9781_v38  ;;  %2574 = vmatprep.subr.bf16.mxu1 %v9786_v40 }
 0x1c2   : > { %2489 = vmatpush1.bf16.msra.mxu0 %v9791_v41  ;;  %2575 = vmatpush1.bf16.msra.mxu1 %v9796_v42 }
 0x1c3   : > { %2490 = vmatprep.subr.bf16.mxu0 %v9805_v43  ;;  %2576 = vmatprep.subr.bf16.mxu1 %v9810_v44 }
 0x1c6   : > { %2491 = vmatpush1.bf16.msra.mxu0 %v9815_v45  ;;  %2577 = vmatpush1.bf16.msra.mxu1 %v9820_v46  ;;  %v7096_v45 = vld [vmem:[%s9460_s7 + $0x68] sm:$0xff] }
 0x1c7   : > { %2492 = vmatprep.subr.bf16.mxu0 %v9827_v47  ;;  %2578 = vmatprep.subr.bf16.mxu1 %v9832_v48  ;;  %v7095_v48 = vld [vmem:[%s9460_s7 + $0x60] sm:$0xff] }
 0x1ca   : > { %2493 = vmatpush1.bf16.msra.mxu0 %v9838_v49  ;;  %2579 = vmatpush1.bf16.msra.mxu1 %v9845_v50  ;;  %v9898_v50 = vld [vmem:[%s11755_s1 + $0x1e4] ss:$16 sps:$4 sm:$0xff]  }
 0x1cb   : > { %2494 = vmatprep.subr.bf16.mxu0 %v9850_v51  ;;  %2580 = vmatprep.subr.bf16.mxu1 %v9856_v52  ;;  %v9886_v51 = vld [vmem:[%s11755_s1 + $0x1c0] ss:$16 sps:$4 sm:$0xff]   ;;  %v9893_v52 = vld [vmem:[%s11755_s1 + $0x1c8] ss:$16 sps:$4 sm:$0xff]   ;;  %11991 = vst [vmem:[#allocation30_spill] sm:$0xff] %v9898_v50 }
 0x1cc   : > { %11989 = vst [vmem:[#allocation28_spill] sm:$0xff] %v9886_v51  ;;  %11990 = vst [vmem:[#allocation29_spill] sm:$0xff] %v9893_v52 }
 0x1ce   : > { %2495 = vmatpush1.bf16.msra.mxu0 %v9862_v55  ;;  %2581 = vmatpush1.bf16.msra.mxu1 %v9869_v63  ;;  %v9904_v63 = vld [vmem:[%s11755_s1 + $0x1ec] ss:$16 sps:$4 sm:$0xff]  }
 0x1cf   : > { %2496 = vmatprep.subr.bf16.mxu0 %v9874_v0  ;;  %2582 = vmatprep.subr.bf16.mxu1 %v9880_v1  ;;  %11992 = vst [vmem:[#allocation31_spill] sm:$0xff] %v9904_v63  ;;  %v9910_v0 = vld [vmem:[%s11755_s1 + $0x1e0] ss:$16 sps:$4 sm:$0xff]   ;;  %v9917_v1 = vld [vmem:[%s11755_s1 + $0x1e8] ss:$16 sps:$4 sm:$0xff]  }
 0x1d0   : > { %11993 = vst [vmem:[#allocation32_spill] sm:$0xff] %v9910_v0  ;;  %11994 = vst [vmem:[#allocation33_spill] sm:$0xff] %v9917_v1 }
 0x1d2   : > { %2497 = vmatpush1.bf16.msra.mxu0 %v9886_v51  ;;  %2583 = vmatpush1.bf16.msra.mxu1 %v9893_v52  ;;  %v9923_v51 = vld [vmem:[%s11755_s1 + $0x204] ss:$16 sps:$4 sm:$0xff]   ;;  %v9929_v52 = vld [vmem:[%s11755_s1 + $0x20c] ss:$16 sps:$4 sm:$0xff]  }
 0x1d3   : > { %2498 = vmatprep.subr.bf16.mxu0 %v9898_v50  ;;  %2584 = vmatprep.subr.bf16.mxu1 %v9904_v63  ;;  %11995 = vst [vmem:[#allocation34_spill] sm:$0xff] %v9923_v51  ;;  %11996 = vst [vmem:[#allocation35_spill] sm:$0xff] %v9929_v52  ;;  %v7091_v50 = vld [vmem:[%s9460_s7 + $0x40] sm:$0xff]  ;;  %v7092_v63 = vld [vmem:[%s9460_s7 + $0x48] sm:$0xff] }
 0x1d6   : > { %2499 = vmatpush1.bf16.msra.mxu0 %v9910_v0  ;;  %2585 = vmatpush1.bf16.msra.mxu1 %v9917_v1 }
 0x1d7   : > { %2511 = vmatprep.subr.bf16.mxu0 %v9923_v51  ;;  %2597 = vmatprep.subr.bf16.mxu1 %v9929_v52 }
 0x26c   : > { %v1709_v55 = vpop.f32.mrb[4].mxu0  ;;  %v1795_v49 = vpop.f32.mrb[4].mxu1 }
 0x26d   : > { %v1804_v47 = vadd.f32 %v7091_v50, %v1709_v55  ;;  %v1711_v46 = vpop.f32.mrb[5].mxu0  ;;  %v1797_v0 = vpop.f32.mrb[5].mxu1  ;;  %v7093_v55 = vld [vmem:[%s9460_s7 + $0x50] sm:$0xff] }
 0x26e   : > { %v1805_v44 = vadd.f32 %v7092_v63, %v1711_v46  ;;  %v1713_v43 = vpop.f32.mrb[6].mxu0  ;;  %v1799_v42 = vpop.f32.mrb[6].mxu1  ;;  %v1807_v35 = vadd.f32 %v7094_v37, %v1797_v0  ;;  %v7097_v46 = vld [vmem:[%s9460_s7 + $0x70] sm:$0xff]  ;;  %v1806_v63 = vadd.f32 %v7093_v55, %v1795_v49 }
 0x26f   : > { %v7197_v1 = vmul.f32 -1.442695, %v1804_v47  ;;  %v1808_v51 = vadd.f32 %v7095_v48, %v1713_v43  ;;  %v1715_v41 = vpop.f32.mrb[7].mxu0  ;;  %v1801_v52 = vpop.f32.mrb[7].mxu1  ;;  %v1810_v47 = vadd.f32 %v7097_v46, %v1799_v42 }
 0x270   : > { %v7195_v40 = vmul.f32 -1.442695, %v1805_v44  ;;  %v1809_v38 = vadd.f32 %v7096_v45, %v1715_v41  ;;  %v7199_v33 = vmul.f32 -1.442695, %v1807_v35  ;;  %v1811_v32 = vadd.f32 %v7098_v34, %v1801_v52 }
 0x271   : > { %8549 = vpow2.f32 %v7197_v1  ;;  %v7198_v36 = vmul.f32 -1.442695, %v1808_v51 }
 0x272   : > { %8551 = vpow2.f32 %v7195_v40  ;;  %v7196_v50 = vmul.f32 -1.442695, %v1809_v38  ;;  %v7200_v41 = vmul.f32 -1.442695, %v1811_v32 }
 0x273   : > { %8553 = vpow2.f32 %v7198_v36 }
 0x274   : > { %8555 = vpow2.f32 %v7196_v50 }
 0x275   : > { %8557 = vtanh.f32 %v1806_v63 }
 0x276   : > { %8559 = vpow2.f32 %v7199_v33 }
 0x277   : > { %8561 = vtanh.f32 %v1810_v47 }
 0x27b   : > { %v8550_v43 = vpop.eup %8549 }
 0x27c   : > { %v8552_v48 = vpop.eup %8551  ;;  %v1834_v44 = vadd.f32 1.0, %v8550_v43 }
 0x27d   : > { %v1820_v45 = vadd.f32 1.0, %v8552_v48  ;;  %v8554_v40 = vpop.eup %8553 }
 0x27e   : > { %8563 = vrcp.f32 %v1834_v44  ;;  %v1835_v37 = vadd.f32 1.0, %v8554_v40  ;;  %v8556_v36 = vpop.eup %8555 }
 0x27f   : > { %8565 = vrcp.f32 %v1820_v45  ;;  %v1821_v38 = vadd.f32 1.0, %v8556_v36  ;;  %v8558_v35 = vpop.eup %8557 }
 0x280   : > { %8567 = vpow2.f32 %v7200_v41  ;;  %v8560_v34 = vpop.eup %8559 }
 0x281   : > { %8569 = vrcp.f32 %v1835_v37  ;;  %v8562_v42 = vpop.eup %8561  ;;  %v1852_v0 = vadd.f32 1.0, %v8560_v34 }
 0x282   : > { %8571 = vrcp.f32 %v1821_v38 }
 0x283   : > { %8573 = vrcp.f32 %v1852_v0 }
 0x288   : > { %v8564_v49 = vpop.eup %8563 }
 0x289   : > { %v8566_v51 = vpop.eup %8565  ;;  %v1842_v52 = vmul.f32 %v8564_v49, %v8558_v35  ;;  %v9961_v49 = vld [vmem:[%s11755_s1 + $0x208] ss:$16 sps:$4 sm:$0xff]  }
 0x28a   : > { %v8568_v33 = vpop.eup %8567  ;;  %v1826_v32 = vmul.f32 %v8566_v51, %v9470_v9 }
 0x28b   : > { %v8570_v1 = vpop.eup %8569  ;;  %v1853_v63 = vadd.f32 1.0, %v8568_v33 }
 0x28c   : > { %v9943_v50 = vadd.f32 %v1842_v52, %v1826_v32  ;;  %v1843_v55 = vmul.f32 %v8570_v1, %v8562_v42  ;;  %v8572_v46 = vpop.eup %8571  ;;  %v9956_v42 = vld [vmem:[%s11755_s1 + $0x200] ss:$16 sps:$4 sm:$0xff]   ;;  %v9973_v32 = vld [vmem:[%s11755_s1 + $0x224] ss:$16 sps:$4 sm:$0xff]   ;;  %v9978_v1 = vld [vmem:[%s11755_s1 + $0x22c] ss:$16 sps:$4 sm:$0xff]  }
 0x28d   : > { %v1827_v47 = vmul.f32 %v8572_v46, %v9473_v14  ;;  %v8574_v48 = vpop.eup %8573  ;;  %v9987_v46 = vld [vmem:[%s11755_s1 + $0x220] ss:$16 sps:$4 sm:$0xff]  }
 0x28e   : > { %8575 = vtanh.f32 %v9943_v50 }
 0x28f   : > { %v9947_v43 = vadd.f32 %v1843_v55, %v1827_v47  ;;  %8577 = vrcp.f32 %v1853_v63  ;;  %v9992_v63 = vld [vmem:[%s11755_s1 + $0x228] ss:$16 sps:$4 sm:$0xff]   ;;  %v9999_v47 = vld [vmem:[%s11755_s1 + $0x244] ss:$16 sps:$4 sm:$0xff]  }
 0x291   : > { %8579 = vtanh.f32 %v9947_v43 }
 0x298   : > { %v8576_v44 = vpop.eup %8575 }
 0x299   : > { %v1860_v41 = vmul.f32 %v8576_v44, %v8574_v48  ;;  %v8578_v9 = vpop.eup %8577  ;;  %v10004_v48 = vld [vmem:[%s11755_s1 + $0x24c] ss:$16 sps:$4 sm:$0xff]   ;;  %v10013_v44 = vld [vmem:[%s11755_s1 + $0x240] ss:$16 sps:$4 sm:$0xff]  }
 0x29b   : > { %v8580_v45 = vpop.eup %8579  ;;  %v1871_v40 = vrot.slane %v1860_v41, 7  ;;  %v1875_v35 = vrot.slane %v1860_v41, 1 }
 0x29c   : > { %v1861_v37 = vmul.f32 %v8580_v45, %v8578_v9  ;;  %v10025_v9 = vld [vmem:[%s11755_s1 + $0x264] ss:$16 sps:$4 sm:$0xff]   ;;  %v10030_v45 = vld [vmem:[%s11755_s1 + $0x26c] ss:$16 sps:$4 sm:$0xff]  }
 0x29d   : > { %v1874_v14 = vsel %vm200_vm0, %v11950_v28, %v1871_v40 }
 0x29e   : > { %v1881_v36 = vpack.c.bf16 %v1861_v37, %v1860_v41  ;;  %v1872_v38 = vrot.slane %v1861_v37, 7  ;;  %v1876_v34 = vrot.slane %v1861_v37, 1  ;;  %v10018_v41 = vld [vmem:[%s11755_s1 + $0x248] ss:$16 sps:$4 sm:$0xff]  }
 0x29f   : > { %v10042_v37 = vld [vmem:[%s11755_s1 + $0x268] ss:$16 sps:$4 sm:$0xff]  }
 0x2a0   : > { %2500 = vmatprep.mubr.bf16.mxu0 %v1881_v36  ;;  %2586 = vmatprep.mubr.bf16.mxu1 %v1881_v36  ;;  %v1873_v51 = vsel %vm200_vm0, %v1871_v40, %v1872_v38  ;;  %v1878_v52 = vsel %vm206_vm1, %v1876_v34, %v9374_v53  ;;  %v1879_v0 = vsel %vm206_vm1, %v1875_v35, %v1876_v34  ;;  %v10037_v40 = vld [vmem:[%s11755_s1 + $0x260] ss:$16 sps:$4 sm:$0xff]   ;;  %v10049_v36 = vld [vmem:[%s11755_s1 + $0x284] ss:$16 sps:$4 sm:$0xff]   ;;  %v10054_v38 = vld [vmem:[%s11755_s1 + $0x28c] ss:$16 sps:$4 sm:$0xff]  }
 0x2a1   : > { %v1880_v33 = vpack.c.bf16 %v1873_v51, %v1874_v14  ;;  %v9980_v55 = vpack.c.bf16 %v1878_v52, %v1879_v0  ;;  %v10061_v35 = vld [vmem:[%s11755_s1 + $0x280] ss:$16 sps:$4 sm:$0xff]   ;;  %v10066_v34 = vld [vmem:[%s11755_s1 + $0x288] ss:$16 sps:$4 sm:$0xff]   ;;  %v10073_v14 = vld [vmem:[%s11755_s1 + $0x2a4] ss:$16 sps:$4 sm:$0xff]  }
 0x2a2   : > { %11997 = vst [vmem:[#allocation36_spill] sm:$0xff] %v10066_v34  ;;  %11998 = vst [vmem:[#allocation37_spill] sm:$0xff] %v10073_v14  ;;  %v10078_v51 = vld [vmem:[%s11755_s1 + $0x2ac] ss:$16 sps:$4 sm:$0xff]   ;;  %v10085_v52 = vld [vmem:[%s11755_s1 + $0x2a0] ss:$16 sps:$4 sm:$0xff]  }
 0x2a3   : > { %2501 = vmatmul.mubr.bf16.vlgmr.msra.gmra.mrb[8].mxu0 %v1880_v33  ;;  %2587 = vmatmul.mubr.bf16.vlgmr.msra.gmra.mrb[8].mxu1 %v1880_v33  ;;  %11999 = vst [vmem:[#allocation38_spill] sm:$0xff] %v10078_v51  ;;  %12000 = vst [vmem:[#allocation39_spill] sm:$0xff] %v10085_v52  ;;  %v10090_v0 = vld [vmem:[%s11755_s1 + $0x2a8] ss:$16 sps:$4 sm:$0xff]   ;;  %v10097_v33 = vld [vmem:[%s11755_s1 + $0x2c4] ss:$16 sps:$4 sm:$0xff]  }
 0x2a4   : > { %2512 = vmatpush1.bf16.msra.mxu0 %v9956_v42  ;;  %2598 = vmatpush1.bf16.msra.mxu1 %v9961_v49  ;;  %12001 = vst [vmem:[#allocation40_spill] sm:$0xff] %v10090_v0  ;;  %12002 = vst [vmem:[#allocation41_spill] sm:$0xff] %v10097_v33 }
 0x2a5   : > { %2513 = vmatprep.subr.bf16.mxu0 %v9973_v32  ;;  %2599 = vmatprep.subr.bf16.mxu1 %v9978_v1 }
 0x2a6   : > { %2543 = vmatprep.mubr.bf16.mxu0 %v11951_v39  ;;  %2629 = vmatprep.mubr.bf16.mxu1 %v11951_v39 }
 0x2a8   : > { %2514 = vmatpush1.bf16.msra.mxu0 %v9987_v46  ;;  %2600 = vmatpush1.bf16.msra.mxu1 %v9992_v63 }
 0x2a9   : > { %2515 = vmatprep.subr.bf16.mxu0 %v9999_v47  ;;  %2601 = vmatprep.subr.bf16.mxu1 %v10004_v48 }
 0x2ac   : > { %2516 = vmatpush1.bf16.msra.mxu0 %v10013_v44  ;;  %2602 = vmatpush1.bf16.msra.mxu1 %v10018_v41 }
 0x2ad   : > { %2517 = vmatprep.subr.bf16.mxu0 %v10025_v9  ;;  %2603 = vmatprep.subr.bf16.mxu1 %v10030_v45 }
 0x2b0   : > { %2518 = vmatpush1.bf16.msra.mxu0 %v10037_v40  ;;  %2604 = vmatpush1.bf16.msra.mxu1 %v10042_v37 }
 0x2b1   : > { %2519 = vmatprep.subr.bf16.mxu0 %v10049_v36  ;;  %2605 = vmatprep.subr.bf16.mxu1 %v10054_v38 }
 0x2b4   : > { %2520 = vmatpush1.bf16.msra.mxu0 %v10061_v35  ;;  %2606 = vmatpush1.bf16.msra.mxu1 %v10066_v34  ;;  %v10102_v34 = vld [vmem:[%s11755_s1 + $0x2cc] ss:$16 sps:$4 sm:$0xff]  }
 0x2b5   : > { %2521 = vmatprep.subr.bf16.mxu0 %v10073_v14  ;;  %2607 = vmatprep.subr.bf16.mxu1 %v10078_v51  ;;  %12003 = vst [vmem:[#allocation42_spill] sm:$0xff] %v10102_v34  ;;  %v10109_v14 = vld [vmem:[%s11755_s1 + $0x2c0] ss:$16 sps:$4 sm:$0xff]   ;;  %v10114_v51 = vld [vmem:[%s11755_s1 + $0x2c8] ss:$16 sps:$4 sm:$0xff]  }
 0x2b8   : > { %2522 = vmatpush1.bf16.msra.mxu0 %v10085_v52  ;;  %2608 = vmatpush1.bf16.msra.mxu1 %v10090_v0  ;;  %v10121_v52 = vld [vmem:[%s11755_s1 + $0x2e4] ss:$16 sps:$4 sm:$0xff]   ;;  %v10126_v0 = vld [vmem:[%s11755_s1 + $0x2ec] ss:$16 sps:$4 sm:$0xff]  }
 0x2b9   : > { %2523 = vmatprep.subr.bf16.mxu0 %v10097_v33  ;;  %2609 = vmatprep.subr.bf16.mxu1 %v10102_v34  ;;  %v10133_v33 = vld [vmem:[%s11755_s1 + $0x2e0] ss:$16 sps:$4 sm:$0xff]   ;;  %v10138_v34 = vld [vmem:[%s11755_s1 + $0x2e8] ss:$16 sps:$4 sm:$0xff]  }
 0x2bc   : > { %2524 = vmatpush1.bf16.msra.mxu0 %v10109_v14  ;;  %2610 = vmatpush1.bf16.msra.mxu1 %v10114_v51 }
 0x2bd   : > { %2525 = vmatprep.subr.bf16.mxu0 %v10121_v52  ;;  %2611 = vmatprep.subr.bf16.mxu1 %v10126_v0 }
 0x2c0   : > { %2526 = vmatpush1.bf16.msra.mxu0 %v10133_v33  ;;  %2612 = vmatpush1.bf16.msra.mxu1 %v10138_v34 }
 0x2c1   : > { %3304 = vmatprep.subr.bf16.mxu0 %v9539_v3  ;;  %3390 = vmatprep.subr.bf16.mxu1 %v9544_v59  ;;  %v12004_v3 = vld [vmem:[#allocation4_spill] sm:$0xff]  ;;  %v12005_v59 = vld [vmem:[#allocation5_spill] sm:$0xff] }
 0x2c3   : > { %2544 = vmatmul.mubr.bf16.vlgmr.msra.gmra.mrb[8].mxu0 %v9980_v55  ;;  %2630 = vmatmul.mubr.bf16.vlgmr.msra.gmra.mrb[8].mxu1 %v9980_v55 }
 0x2c4   : > { %3305 = vmatpush1.bf16.msra.mxu0 %v9551_v60  ;;  %3391 = vmatpush1.bf16.msra.mxu1 %v9556_v61  ;;  %v12006_v60 = vld [vmem:[#allocation6_spill] sm:$0xff]  ;;  %v12007_v61 = vld [vmem:[#allocation7_spill] sm:$0xff] }
 0x2c5   : > { %3306 = vmatprep.subr.bf16.mxu0 %v9563_v56  ;;  %3392 = vmatprep.subr.bf16.mxu1 %v9568_v62  ;;  %v12008_v56 = vld [vmem:[#allocation8_spill] sm:$0xff]  ;;  %v12009_v62 = vld [vmem:[#allocation9_spill] sm:$0xff] }
 0x2c8   : > { %3307 = vmatpush1.bf16.msra.mxu0 %v9575_v54  ;;  %3393 = vmatpush1.bf16.msra.mxu1 %v9580_v57  ;;  %v12010_v54 = vld [vmem:[#allocation10_spill] sm:$0xff]  ;;  %v12011_v57 = vld [vmem:[#allocation11_spill] sm:$0xff] }
 0x2c9   : > { %3308 = vmatprep.subr.bf16.mxu0 %v9587_v58  ;;  %3394 = vmatprep.subr.bf16.mxu1 %v9592_v2  ;;  %v12012_v58 = vld [vmem:[#allocation12_spill] sm:$0xff]  ;;  %v12013_v2 = vld [vmem:[#allocation13_spill] sm:$0xff] }
 0x2cc   : > { %3309 = vmatpush1.bf16.msra.mxu0 %v9599_v4  ;;  %3395 = vmatpush1.bf16.msra.mxu1 %v9604_v5  ;;  %v12014_v4 = vld [vmem:[#allocation14_spill] sm:$0xff]  ;;  %v12015_v5 = vld [vmem:[#allocation15_spill] sm:$0xff] }
 0x2cd   : > { %3310 = vmatprep.subr.bf16.mxu0 %v9613_v6  ;;  %3396 = vmatprep.subr.bf16.mxu1 %v9618_v7  ;;  %v12016_v6 = vld [vmem:[#allocation17_spill] sm:$0xff]  ;;  %v12017_v7 = vld [vmem:[#allocation18_spill] sm:$0xff] }
 0x2d0   : > { %3311 = vmatpush1.bf16.msra.mxu0 %v9623_v8  ;;  %3397 = vmatpush1.bf16.msra.mxu1 %v9628_v10  ;;  %v12018_v8 = vld [vmem:[#allocation16_spill] sm:$0xff]  ;;  %v12019_v10 = vld [vmem:[#allocation19_spill] sm:$0xff] }
 0x2d1   : > { %3312 = vmatprep.subr.bf16.mxu0 %v9637_v11  ;;  %3398 = vmatprep.subr.bf16.mxu1 %v9652_v15  ;;  %v12020_v11 = vld [vmem:[#allocation20_spill] sm:$0xff]  ;;  %v12023_v15 = vld [vmem:[#allocation23_spill] sm:$0xff] }
 0x2d4   : > { %3313 = vmatpush1.bf16.msra.mxu0 %v9642_v12  ;;  %3399 = vmatpush1.bf16.msra.mxu1 %v9647_v13  ;;  %v12021_v12 = vld [vmem:[#allocation21_spill] sm:$0xff]  ;;  %v12022_v13 = vld [vmem:[#allocation22_spill] sm:$0xff] }
 0x2d5   : > { %3314 = vmatprep.subr.bf16.mxu0 %v9661_v16  ;;  %3400 = vmatprep.subr.bf16.mxu1 %v9666_v17  ;;  %v12024_v16 = vld [vmem:[#allocation24_spill] sm:$0xff]  ;;  %v12025_v17 = vld [vmem:[#allocation25_spill] sm:$0xff] }
 0x2d8   : > { %3315 = vmatpush1.bf16.msra.mxu0 %v9671_v18  ;;  %3401 = vmatpush1.bf16.msra.mxu1 %v9676_v20  ;;  %v12026_v18 = vld [vmem:[#allocation26_spill] sm:$0xff]  ;;  %v12027_v20 = vld [vmem:[#allocation27_spill] sm:$0xff] }
 0x2d9   : > { %3316 = vmatprep.subr.bf16.mxu0 %v9685_v21  ;;  %3402 = vmatprep.subr.bf16.mxu1 %v9690_v22  ;;  %v12028_v21 = vld [vmem:[#allocation28_spill] sm:$0xff]  ;;  %v12029_v22 = vld [vmem:[#allocation29_spill] sm:$0xff] }
 0x2dc   : > { %3317 = vmatpush1.bf16.msra.mxu0 %v9695_v23  ;;  %3403 = vmatpush1.bf16.msra.mxu1 %v9700_v24  ;;  %v12030_v23 = vld [vmem:[#allocation30_spill] sm:$0xff]  ;;  %v12031_v24 = vld [vmem:[#allocation31_spill] sm:$0xff] }
 0x2dd   : > { %3318 = vmatprep.subr.bf16.mxu0 %v9709_v25  ;;  %3404 = vmatprep.subr.bf16.mxu1 %v9714_v26  ;;  %v12032_v25 = vld [vmem:[#allocation32_spill] sm:$0xff]  ;;  %v12033_v26 = vld [vmem:[#allocation33_spill] sm:$0xff] }
 0x2e0   : > { %3319 = vmatpush1.bf16.msra.mxu0 %v9719_v27  ;;  %3405 = vmatpush1.bf16.msra.mxu1 %v9724_v29  ;;  %v12034_v27 = vld [vmem:[#allocation34_spill] sm:$0xff]  ;;  %v12035_v29 = vld [vmem:[#allocation35_spill] sm:$0xff] }
 0x2e1   : > { %3320 = vmatprep.subr.bf16.mxu0 %v9733_v30  ;;  %3406 = vmatprep.subr.bf16.mxu1 %v9738_v31  ;;  %v7201_v30 = vld [vmem:[%s9460_s7 + $0x80] sm:$0xff]  ;;  %v7202_v31 = vld [vmem:[%s9460_s7 + $0x88] sm:$0xff] }
 0x2e4   : > { %3321 = vmatpush1.bf16.msra.mxu0 %v12004_v3  ;;  %3407 = vmatpush1.bf16.msra.mxu1 %v12005_v59  ;;  %v7205_v59 = vld [vmem:[%s9460_s7 + $0xa0] sm:$0xff] }
 0x2e5   : > { %3322 = vmatprep.subr.bf16.mxu0 %v12006_v60  ;;  %3408 = vmatprep.subr.bf16.mxu1 %v12007_v61 }
 0x2e8   : > { %3323 = vmatpush1.bf16.msra.mxu0 %v12008_v56  ;;  %3409 = vmatpush1.bf16.msra.mxu1 %v12009_v62  ;;  %v7206_v62 = vld [vmem:[%s9460_s7 + $0xa8] sm:$0xff] }
 0x2e9   : > { %3324 = vmatprep.subr.bf16.mxu0 %v12010_v54  ;;  %3410 = vmatprep.subr.bf16.mxu1 %v12011_v57 }
 0x2ec   : > { %3325 = vmatpush1.bf16.msra.mxu0 %v12012_v58  ;;  %3411 = vmatpush1.bf16.msra.mxu1 %v12013_v2 }
 0x2ed   : > { %3326 = vmatprep.subr.bf16.mxu0 %v12014_v4  ;;  %3412 = vmatprep.subr.bf16.mxu1 %v12015_v5 }
 0x2f0   : > { %3327 = vmatpush1.bf16.msra.mxu0 %v12016_v6  ;;  %3413 = vmatpush1.bf16.msra.mxu1 %v12017_v7 }
 0x2f1   : > { %3328 = vmatprep.subr.bf16.mxu0 %v12018_v8  ;;  %3414 = vmatprep.subr.bf16.mxu1 %v12019_v10  ;;  %v7204_v10 = vld [vmem:[%s9460_s7 + $0x98] sm:$0xff] }
 0x2f4   : > { %3329 = vmatpush1.bf16.msra.mxu0 %v12020_v11  ;;  %3415 = vmatpush1.bf16.msra.mxu1 %v12021_v12 }
 0x2f5   : > { %3330 = vmatprep.subr.bf16.mxu0 %v12022_v13  ;;  %3416 = vmatprep.subr.bf16.mxu1 %v12023_v15  ;;  %v7203_v13 = vld [vmem:[%s9460_s7 + $0x90] sm:$0xff] }
 0x2f8   : > { %3331 = vmatpush1.bf16.msra.mxu0 %v12024_v16  ;;  %3417 = vmatpush1.bf16.msra.mxu1 %v12025_v17  ;;  %v7208_v16 = vld [vmem:[%s9460_s7 + $0xb8] sm:$0xff]  ;;  %v7207_v17 = vld [vmem:[%s9460_s7 + $0xb0] sm:$0xff] }
 0x2f9   : > { %3332 = vmatprep.subr.bf16.mxu0 %v12026_v18  ;;  %3418 = vmatprep.subr.bf16.mxu1 %v12027_v20 }
 0x2fc   : > { %3333 = vmatpush1.bf16.msra.mxu0 %v12028_v21  ;;  %3419 = vmatpush1.bf16.msra.mxu1 %v12029_v22 }
 0x2fd   : > { %3334 = vmatprep.subr.bf16.mxu0 %v12030_v23  ;;  %3420 = vmatprep.subr.bf16.mxu1 %v12031_v24 }
 0x300   : > { %3335 = vmatpush1.bf16.msra.mxu0 %v12032_v25  ;;  %3421 = vmatpush1.bf16.msra.mxu1 %v12033_v26 }
 0x301   : > { %3347 = vmatprep.subr.bf16.mxu0 %v12034_v27  ;;  %3433 = vmatprep.subr.bf16.mxu1 %v12035_v29 }
 0x396   : > { %v2545_v55 = vpop.f32.mrb[8].mxu0  ;;  %v2631_v3 = vpop.f32.mrb[8].mxu1 }
 0x397   : > { %v2640_v60 = vadd.f32 %v7201_v30, %v2545_v55  ;;  %v2547_v61 = vpop.f32.mrb[9].mxu0  ;;  %v2633_v56 = vpop.f32.mrb[9].mxu1  ;;  %v2642_v18 = vadd.f32 %v7203_v13, %v2631_v3 }
 0x398   : > { %v2641_v54 = vadd.f32 %v7202_v31, %v2547_v61  ;;  %v2549_v57 = vpop.f32.mrb[10].mxu0  ;;  %v2635_v58 = vpop.f32.mrb[10].mxu1  ;;  %v2643_v15 = vadd.f32 %v7204_v10, %v2633_v56 }
 0x399   : > { %v7307_v2 = vmul.f32 -1.442695, %v2640_v60  ;;  %v2644_v4 = vadd.f32 %v7205_v59, %v2549_v57  ;;  %v2551_v5 = vpop.f32.mrb[11].mxu0  ;;  %v2637_v6 = vpop.f32.mrb[11].mxu1  ;;  %v2646_v22 = vadd.f32 %v7207_v17, %v2635_v58 }
 0x39a   : > { %v7305_v7 = vmul.f32 -1.442695, %v2641_v54  ;;  %v2645_v8 = vadd.f32 %v7206_v62, %v2551_v5  ;;  %v7309_v20 = vmul.f32 -1.442695, %v2643_v15  ;;  %v2647_v21 = vadd.f32 %v7208_v16, %v2637_v6 }
 0x39b   : > { %8581 = vpow2.f32 %v7307_v2  ;;  %v7308_v11 = vmul.f32 -1.442695, %v2644_v4 }
 0x39c   : > { %8583 = vpow2.f32 %v7305_v7  ;;  %v7306_v12 = vmul.f32 -1.442695, %v2645_v8  ;;  %v7310_v26 = vmul.f32 -1.442695, %v2647_v21 }
 0x39d   : > { %8585 = vpow2.f32 %v7308_v11 }
 0x39e   : > { %8587 = vpow2.f32 %v7306_v12 }
 0x39f   : > { %8589 = vtanh.f32 %v2642_v18 }
 0x3a0   : > { %8591 = vpow2.f32 %v7309_v20 }
 0x3a1   : > { %8593 = vtanh.f32 %v2646_v22 }
 0x3a5   : > { %v8582_v23 = vpop.eup %8581 }
 0x3a6   : > { %v8584_v24 = vpop.eup %8583  ;;  %v2670_v25 = vadd.f32 1.0, %v8582_v23 }
 0x3a7   : > { %v2656_v27 = vadd.f32 1.0, %v8584_v24  ;;  %v8586_v29 = vpop.eup %8585 }
 0x3a8   : > { %8595 = vrcp.f32 %v2670_v25  ;;  %v2671_v30 = vadd.f32 1.0, %v8586_v29  ;;  %v8588_v31 = vpop.eup %8587  ;;  %v10369_v29 = vld [vmem:[%s11755_s1 + $0x84] ss:$16 sps:$4 sm:$0xff]  }
 0x3a9   : > { %8597 = vrcp.f32 %v2656_v27  ;;  %v2657_v55 = vadd.f32 1.0, %v8588_v31  ;;  %v8590_v3 = vpop.eup %8589  ;;  %v10379_v31 = vld [vmem:[%s11755_s1 + $0x88] ss:$16 sps:$4 sm:$0xff]  }
 0x3aa   : > { %8599 = vpow2.f32 %v7310_v26  ;;  %v8592_v59 = vpop.eup %8591 }
 0x3ab   : > { %8601 = vrcp.f32 %v2671_v30  ;;  %v8594_v60 = vpop.eup %8593  ;;  %v2688_v54 = vadd.f32 1.0, %v8592_v59  ;;  %v10374_v30 = vld [vmem:[%s11755_s1 + $0x80] ss:$16 sps:$4 sm:$0xff]   ;;  %v10398_v59 = vld [vmem:[%s11755_s1 + $0xac] ss:$16 sps:$4 sm:$0xff]  }
 0x3ac   : > { %8603 = vrcp.f32 %v2657_v55  ;;  %v10384_v55 = vld [vmem:[%s11755_s1 + $0x8c] ss:$16 sps:$4 sm:$0xff]  }
 0x3ad   : > { %8605 = vrcp.f32 %v2688_v54  ;;  %v10427_v54 = vld [vmem:[%s11755_s1 + $0xc0] ss:$16 sps:$4 sm:$0xff]  }
 0x3b2   : > { %v8596_v61 = vpop.eup %8595 }
 0x3b3   : > { %v8598_v56 = vpop.eup %8597  ;;  %v2678_v62 = vmul.f32 %v8596_v61, %v8590_v3  ;;  %v10393_v3 = vld [vmem:[%s11755_s1 + $0xa4] ss:$16 sps:$4 sm:$0xff]   ;;  %v10408_v61 = vld [vmem:[%s11755_s1 + $0xa8] ss:$16 sps:$4 sm:$0xff]  }
 0x3b4   : > { %v8600_v57 = vpop.eup %8599  ;;  %v2662_v58 = vmul.f32 %v8598_v56, %v9943_v50  ;;  %v10417_v56 = vld [vmem:[%s11755_s1 + $0xc4] ss:$16 sps:$4 sm:$0xff]  }
 0x3b5   : > { %v8602_v2 = vpop.eup %8601  ;;  %v2689_v7 = vadd.f32 1.0, %v8600_v57  ;;  %v10432_v57 = vld [vmem:[%s11755_s1 + $0xc8] ss:$16 sps:$4 sm:$0xff]  }
 0x3b6   : > { %v10221_v4 = vadd.f32 %v2678_v62, %v2662_v58  ;;  %v2679_v5 = vmul.f32 %v8602_v2, %v8594_v60  ;;  %v8604_v6 = vpop.eup %8603  ;;  %v10403_v60 = vld [vmem:[%s11755_s1 + $0xa0] ss:$16 sps:$4 sm:$0xff]   ;;  %v10422_v62 = vld [vmem:[%s11755_s1 + $0xcc] ss:$16 sps:$4 sm:$0xff]   ;;  %v10441_v58 = vld [vmem:[%s11755_s1 + $0xe4] ss:$16 sps:$4 sm:$0xff]  }
 0x3b7   : > { %v2663_v8 = vmul.f32 %v8604_v6, %v9947_v43  ;;  %v8606_v11 = vpop.eup %8605  ;;  %v10446_v2 = vld [vmem:[%s11755_s1 + $0xec] ss:$16 sps:$4 sm:$0xff]   ;;  %v10456_v6 = vld [vmem:[%s11755_s1 + $0xe8] ss:$16 sps:$4 sm:$0xff]  }
 0x3b8   : > { %8607 = vtanh.f32 %v10221_v4 }
 0x3b9   : > { %v10225_v10 = vadd.f32 %v2679_v5, %v2663_v8  ;;  %8609 = vrcp.f32 %v2689_v7  ;;  %v10451_v5 = vld [vmem:[%s11755_s1 + $0xe0] ss:$16 sps:$4 sm:$0xff]   ;;  %v10465_v7 = vld [vmem:[%s11755_s1 + $0x104] ss:$16 sps:$4 sm:$0xff]   ;;  %v10470_v8 = vld [vmem:[%s11755_s1 + $0x10c] ss:$16 sps:$4 sm:$0xff]  }
 0x3bb   : > { %8611 = vtanh.f32 %v10225_v10 }
 0x3c2   : > { %v8608_v12 = vpop.eup %8607 }
 0x3c3   : > { %v2696_v13 = vmul.f32 %v8608_v12, %v8606_v11  ;;  %v8610_v50 = vpop.eup %8609  ;;  %v10475_v11 = vld [vmem:[%s11755_s1 + $0x100] ss:$16 sps:$4 sm:$0xff]   ;;  %v10480_v12 = vld [vmem:[%s11755_s1 + $0x108] ss:$16 sps:$4 sm:$0xff]  }
 0x3c4   : > { %12043 = vst [vmem:[#allocation4_spill] sm:$0xff] %v10475_v11  ;;  %12044 = vst [vmem:[#allocation5_spill] sm:$0xff] %v10480_v12 }
 0x3c5   : > { %v8612_v15 = vpop.eup %8611  ;;  %v2707_v16 = vrot.slane %v2696_v13, 7  ;;  %v2711_v21 = vrot.slane %v2696_v13, 1 }
 0x3c6   : > { %v2697_v17 = vmul.f32 %v8612_v15, %v8610_v50  ;;  %v10494_v50 = vld [vmem:[%s11755_s1 + $0x12c] ss:$16 sps:$4 sm:$0xff]   ;;  %v10499_v15 = vld [vmem:[%s11755_s1 + $0x120] ss:$16 sps:$4 sm:$0xff]  }
 0x3c7   : > { %v2710_v43 = vsel %vm200_vm0, %v11950_v28, %v2707_v16  ;;  %12046 = vst [vmem:[#allocation7_spill] sm:$0xff] %v10494_v50  ;;  %12047 = vst [vmem:[#allocation8_spill] sm:$0xff] %v10499_v15 }
 0x3c8   : > { %v2717_v18 = vpack.c.bf16 %v2697_v17, %v2696_v13  ;;  %v2708_v20 = vrot.slane %v2697_v17, 7  ;;  %v2712_v22 = vrot.slane %v2697_v17, 1  ;;  %v10489_v13 = vld [vmem:[%s11755_s1 + $0x124] ss:$16 sps:$4 sm:$0xff]  }
 0x3c9   : > { %12045 = vst [vmem:[#allocation6_spill] sm:$0xff] %v10489_v13  ;;  %v10513_v17 = vld [vmem:[%s11755_s1 + $0x144] ss:$16 sps:$4 sm:$0xff]  }
 0x3ca   : > { %3336 = vmatprep.mubr.bf16.mxu0 %v2717_v18  ;;  %3422 = vmatprep.mubr.bf16.mxu1 %v2717_v18  ;;  %v2709_v23 = vsel %vm200_vm0, %v2707_v16, %v2708_v20  ;;  %v2714_v24 = vsel %vm206_vm1, %v2712_v22, %v9374_v53  ;;  %v2715_v25 = vsel %vm206_vm1, %v2711_v21, %v2712_v22  ;;  %v10504_v16 = vld [vmem:[%s11755_s1 + $0x128] ss:$16 sps:$4 sm:$0xff]   ;;  %v10518_v18 = vld [vmem:[%s11755_s1 + $0x14c] ss:$16 sps:$4 sm:$0xff]   ;;  %v10523_v20 = vld [vmem:[%s11755_s1 + $0x140] ss:$16 sps:$4 sm:$0xff]  }
 0x3cb   : > { %v2716_v26 = vpack.c.bf16 %v2709_v23, %v2710_v43  ;;  %v2718_v27 = vpack.c.bf16 %v2714_v24, %v2715_v25  ;;  %12048 = vst [vmem:[#allocation9_spill] sm:$0xff] %v10504_v16  ;;  %12049 = vst [vmem:[#allocation10_spill] sm:$0xff] %v10513_v17  ;;  %v10528_v21 = vld [vmem:[%s11755_s1 + $0x148] ss:$16 sps:$4 sm:$0xff]   ;;  %v10537_v22 = vld [vmem:[%s11755_s1 + $0x164] ss:$16 sps:$4 sm:$0xff]  }
 0x3cc   : > { %12050 = vst [vmem:[#allocation11_spill] sm:$0xff] %v10518_v18  ;;  %12051 = vst [vmem:[#allocation12_spill] sm:$0xff] %v10523_v20  ;;  %v10542_v43 = vld [vmem:[%s11755_s1 + $0x16c] ss:$16 sps:$4 sm:$0xff]   ;;  %v10547_v23 = vld [vmem:[%s11755_s1 + $0x160] ss:$16 sps:$4 sm:$0xff]  }
 0x3cd   : > { %3337 = vmatmul.mubr.bf16.vlgmr.msra.gmra.mrb[12].mxu0 %v2716_v26  ;;  %3423 = vmatmul.mubr.bf16.vlgmr.msra.gmra.mrb[12].mxu1 %v2716_v26  ;;  %12052 = vst [vmem:[#allocation13_spill] sm:$0xff] %v10528_v21  ;;  %12053 = vst [vmem:[#allocation14_spill] sm:$0xff] %v10537_v22  ;;  %v10552_v24 = vld [vmem:[%s11755_s1 + $0x168] ss:$16 sps:$4 sm:$0xff]   ;;  %v10559_v25 = vld [vmem:[%s11755_s1 + $0x184] ss:$16 sps:$4 sm:$0xff]  }
 0x3ce   : > { %3348 = vmatpush1.bf16.msra.mxu0 %v9956_v42  ;;  %3434 = vmatpush1.bf16.msra.mxu1 %v9961_v49  ;;  %v12036_v42 = vld [vmem:[#allocation36_spill] sm:$0xff]  ;;  %v12037_v49 = vld [vmem:[#allocation37_spill] sm:$0xff]  ;;  %12054 = vst [vmem:[#allocation15_spill] sm:$0xff] %v10542_v43  ;;  %12055 = vst [vmem:[#allocation17_spill] sm:$0xff] %v10547_v23 }
 0x3cf   : > { %3349 = vmatprep.subr.bf16.mxu0 %v9973_v32  ;;  %3435 = vmatprep.subr.bf16.mxu1 %v9978_v1  ;;  %v12038_v32 = vld [vmem:[#allocation38_spill] sm:$0xff]  ;;  %v12039_v1 = vld [vmem:[#allocation39_spill] sm:$0xff]  ;;  %12056 = vst [vmem:[#allocation18_spill] sm:$0xff] %v10552_v24  ;;  %12057 = vst [vmem:[#allocation16_spill] sm:$0xff] %v10559_v25 }
 0x3d0   : > { %3379 = vmatprep.mubr.bf16.mxu0 %v11951_v39  ;;  %3465 = vmatprep.mubr.bf16.mxu1 %v11951_v39  ;;  %v10564_v26 = vld [vmem:[%s11755_s1 + $0x18c] ss:$16 sps:$4 sm:$0xff]  }
 0x3d1   : > { %12058 = vst [vmem:[#allocation19_spill] sm:$0xff] %v10564_v26 }
 0x3d2   : > { %3350 = vmatpush1.bf16.msra.mxu0 %v9987_v46  ;;  %3436 = vmatpush1.bf16.msra.mxu1 %v9992_v63  ;;  %v12040_v46 = vld [vmem:[#allocation40_spill] sm:$0xff]  ;;  %v12041_v63 = vld [vmem:[#allocation41_spill] sm:$0xff] }
 0x3d3   : > { %3351 = vmatprep.subr.bf16.mxu0 %v9999_v47  ;;  %3437 = vmatprep.subr.bf16.mxu1 %v10004_v48  ;;  %v12042_v47 = vld [vmem:[#allocation42_spill] sm:$0xff] }
 0x3d4   : > { %v10271_v48 = vld [vmem:[%s11755_s1 + $0x4] ss:$16 sps:$4 sm:$0xff]  }
 0x3d6   : > { %3352 = vmatpush1.bf16.msra.mxu0 %v10013_v44  ;;  %3438 = vmatpush1.bf16.msra.mxu1 %v10018_v41  ;;  %v10276_v44 = vld [vmem:[%s11755_s1 + $0xc] ss:$16 sps:$4 sm:$0xff]   ;;  %v10283_v41 = vld [vmem:[%s11755_s1] ss:$16 sps:$4 sm:$0xff]  }
 0x3d7   : > { %3353 = vmatprep.subr.bf16.mxu0 %v10025_v9  ;;  %3439 = vmatprep.subr.bf16.mxu1 %v10030_v45  ;;  %v10288_v9 = vld [vmem:[%s11755_s1 + $0x8] ss:$16 sps:$4 sm:$0xff]   ;;  %v10295_v45 = vld [vmem:[%s11755_s1 + $0x24] ss:$16 sps:$4 sm:$0xff]  }
 0x3da   : > { %3354 = vmatpush1.bf16.msra.mxu0 %v10037_v40  ;;  %3440 = vmatpush1.bf16.msra.mxu1 %v10042_v37  ;;  %v10300_v40 = vld [vmem:[%s11755_s1 + $0x2c] ss:$16 sps:$4 sm:$0xff]   ;;  %v10307_v37 = vld [vmem:[%s11755_s1 + $0x20] ss:$16 sps:$4 sm:$0xff]  }
 0x3db   : > { %3355 = vmatprep.subr.bf16.mxu0 %v10049_v36  ;;  %3441 = vmatprep.subr.bf16.mxu1 %v10054_v38  ;;  %v10312_v36 = vld [vmem:[%s11755_s1 + $0x28] ss:$16 sps:$4 sm:$0xff]   ;;  %v10319_v38 = vld [vmem:[%s11755_s1 + $0x44] ss:$16 sps:$4 sm:$0xff]  }
 0x3de   : > { %3356 = vmatpush1.bf16.msra.mxu0 %v10061_v35  ;;  %3442 = vmatpush1.bf16.msra.mxu1 %v12036_v42  ;;  %v10324_v35 = vld [vmem:[%s11755_s1 + $0x4c] ss:$16 sps:$4 sm:$0xff]   ;;  %v10577_v42 = vld [vmem:[%s11755_s1 + $0x188] ss:$16 sps:$4 sm:$0xff]  }
 0x3df   : > { %3357 = vmatprep.subr.bf16.mxu0 %v12037_v49  ;;  %3443 = vmatprep.subr.bf16.mxu1 %v12038_v32  ;;  %12060 = vst [vmem:[#allocation21_spill] sm:$0xff] %v10577_v42  ;;  %v10582_v49 = vld [vmem:[%s11755_s1 + $0x1a4] ss:$16 sps:$4 sm:$0xff]   ;;  %v10588_v32 = vld [vmem:[%s11755_s1 + $0x1ac] ss:$16 sps:$4 sm:$0xff]  }
 0x3e0   : > { %12061 = vst [vmem:[#allocation22_spill] sm:$0xff] %v10582_v49  ;;  %12062 = vst [vmem:[#allocation23_spill] sm:$0xff] %v10588_v32 }
 0x3e2   : > { %3358 = vmatpush1.bf16.msra.mxu0 %v12039_v1  ;;  %3444 = vmatpush1.bf16.msra.mxu1 %v12040_v46  ;;  %v10594_v1 = vld [vmem:[%s11755_s1 + $0x1a0] ss:$16 sps:$4 sm:$0xff]   ;;  %v10601_v46 = vld [vmem:[%s11755_s1 + $0x1a8] ss:$16 sps:$4 sm:$0xff]  }
 0x3e3   : > { %3359 = vmatprep.subr.bf16.mxu0 %v12041_v63  ;;  %3445 = vmatprep.subr.bf16.mxu1 %v12042_v47  ;;  %12063 = vst [vmem:[#allocation24_spill] sm:$0xff] %v10594_v1  ;;  %12064 = vst [vmem:[#allocation25_spill] sm:$0xff] %v10601_v46  ;;  %v10606_v63 = vld [vmem:[%s11755_s1 + $0x1c4] ss:$16 sps:$4 sm:$0xff]   ;;  %v10612_v47 = vld [vmem:[%s11755_s1 + $0x1cc] ss:$16 sps:$4 sm:$0xff]  }
 0x3e4   : > { %12065 = vst [vmem:[#allocation26_spill] sm:$0xff] %v10606_v63  ;;  %12066 = vst [vmem:[#allocation27_spill] sm:$0xff] %v10612_v47 }
 0x3e6   : > { %3360 = vmatpush1.bf16.msra.mxu0 %v10109_v14  ;;  %3446 = vmatpush1.bf16.msra.mxu1 %v10114_v51  ;;  %v10336_v14 = vld [vmem:[%s11755_s1 + $0x48] ss:$16 sps:$4 sm:$0xff]   ;;  %v10345_v51 = vld [vmem:[%s11755_s1 + $0x64] ss:$16 sps:$4 sm:$0xff]  }
 0x3e7   : > { %3361 = vmatprep.subr.bf16.mxu0 %v10121_v52  ;;  %3447 = vmatprep.subr.bf16.mxu1 %v10126_v0  ;;  %v10350_v52 = vld [vmem:[%s11755_s1 + $0x6c] ss:$16 sps:$4 sm:$0xff]   ;;  %v10355_v0 = vld [vmem:[%s11755_s1 + $0x60] ss:$16 sps:$4 sm:$0xff]  }
 0x3ea   : > { %3362 = vmatpush1.bf16.msra.mxu0 %v10133_v33  ;;  %3448 = vmatpush1.bf16.msra.mxu1 %v10138_v34  ;;  %v10331_v34 = vld [vmem:[%s11755_s1 + $0x40] ss:$16 sps:$4 sm:$0xff]   ;;  %v10360_v33 = vld [vmem:[%s11755_s1 + $0x68] ss:$16 sps:$4 sm:$0xff]  }
 0x3eb   : > { %4140 = vmatprep.subr.bf16.mxu0 %v10271_v48  ;;  %4226 = vmatprep.subr.bf16.mxu1 %v10276_v44 }
 0x3ed   : > { %3380 = vmatmul.mubr.bf16.vlgmr.msra.gmra.mrb[12].mxu0 %v2718_v27  ;;  %3466 = vmatmul.mubr.bf16.vlgmr.msra.gmra.mrb[12].mxu1 %v2718_v27  ;;  %v10570_v27 = vld [vmem:[%s11755_s1 + $0x180] ss:$16 sps:$4 sm:$0xff]  }
 0x3ee   : > { %4141 = vmatpush1.bf16.msra.mxu0 %v10283_v41  ;;  %4227 = vmatpush1.bf16.msra.mxu1 %v10288_v9  ;;  %12059 = vst [vmem:[#allocation20_spill] sm:$0xff] %v10570_v27 }
 0x3ef   : > { %4142 = vmatprep.subr.bf16.mxu0 %v10295_v45  ;;  %4228 = vmatprep.subr.bf16.mxu1 %v10300_v40 }
 0x3f2   : > { %4143 = vmatpush1.bf16.msra.mxu0 %v10307_v37  ;;  %4229 = vmatpush1.bf16.msra.mxu1 %v10312_v36 }
 0x3f3   : > { %4144 = vmatprep.subr.bf16.mxu0 %v10319_v38  ;;  %4230 = vmatprep.subr.bf16.mxu1 %v10324_v35 }
 0x3f6   : > { %4145 = vmatpush1.bf16.msra.mxu0 %v10331_v34  ;;  %4231 = vmatpush1.bf16.msra.mxu1 %v10336_v14 }
 0x3f7   : > { %4146 = vmatprep.subr.bf16.mxu0 %v10345_v51  ;;  %4232 = vmatprep.subr.bf16.mxu1 %v10350_v52 }
 0x3fa   : > { %4147 = vmatpush1.bf16.msra.mxu0 %v10355_v0  ;;  %4233 = vmatpush1.bf16.msra.mxu1 %v10360_v33 }
 0x3fb   : > { %4148 = vmatprep.subr.bf16.mxu0 %v10369_v29  ;;  %4234 = vmatprep.subr.bf16.mxu1 %v10384_v55 }
 0x3fe   : > { %4149 = vmatpush1.bf16.msra.mxu0 %v10374_v30  ;;  %4235 = vmatpush1.bf16.msra.mxu1 %v10379_v31 }
 0x3ff   : > { %4150 = vmatprep.subr.bf16.mxu0 %v10393_v3  ;;  %4236 = vmatprep.subr.bf16.mxu1 %v10398_v59 }
 0x402   : > { %4151 = vmatpush1.bf16.msra.mxu0 %v10403_v60  ;;  %4237 = vmatpush1.bf16.msra.mxu1 %v10408_v61 }
 0x403   : > { %4152 = vmatprep.subr.bf16.mxu0 %v10417_v56  ;;  %4238 = vmatprep.subr.bf16.mxu1 %v10422_v62 }
 0x406   : > { %4153 = vmatpush1.bf16.msra.mxu0 %v10427_v54  ;;  %4239 = vmatpush1.bf16.msra.mxu1 %v10432_v57 }
 0x407   : > { %4154 = vmatprep.subr.bf16.mxu0 %v10441_v58  ;;  %4240 = vmatprep.subr.bf16.mxu1 %v10446_v2 }
 0x40a   : > { %4155 = vmatpush1.bf16.msra.mxu0 %v10451_v5  ;;  %4241 = vmatpush1.bf16.msra.mxu1 %v10456_v6 }
 0x40b   : > { %4156 = vmatprep.subr.bf16.mxu0 %v10465_v7  ;;  %4242 = vmatprep.subr.bf16.mxu1 %v10470_v8 }
 0x40e   : > { %4157 = vmatpush1.bf16.msra.mxu0 %v10475_v11  ;;  %4243 = vmatpush1.bf16.msra.mxu1 %v10480_v12 }
 0x40f   : > { %4158 = vmatprep.subr.bf16.mxu0 %v10489_v13  ;;  %4244 = vmatprep.subr.bf16.mxu1 %v10494_v50  ;;  %v7318_v13 = vld [vmem:[%s9460_s7 + $0xf8] sm:$0xff] }
 0x412   : > { %4159 = vmatpush1.bf16.msra.mxu0 %v10499_v15  ;;  %4245 = vmatpush1.bf16.msra.mxu1 %v10504_v16  ;;  %v7314_v16 = vld [vmem:[%s9460_s7 + $0xd8] sm:$0xff] }
 0x413   : > { %4160 = vmatprep.subr.bf16.mxu0 %v10513_v17  ;;  %4246 = vmatprep.subr.bf16.mxu1 %v10518_v18 }
 0x416   : > { %4161 = vmatpush1.bf16.msra.mxu0 %v10523_v20  ;;  %4247 = vmatpush1.bf16.msra.mxu1 %v10528_v21 }
 0x417   : > { %4162 = vmatprep.subr.bf16.mxu0 %v10537_v22  ;;  %4248 = vmatprep.subr.bf16.mxu1 %v10542_v43 }
 0x41a   : > { %4163 = vmatpush1.bf16.msra.mxu0 %v10547_v23  ;;  %4249 = vmatpush1.bf16.msra.mxu1 %v10552_v24  ;;  %v7316_v23 = vld [vmem:[%s9460_s7 + $0xe8] sm:$0xff] }
 0x41b   : > { %4164 = vmatprep.subr.bf16.mxu0 %v10559_v25  ;;  %4250 = vmatprep.subr.bf16.mxu1 %v10564_v26  ;;  %v7315_v26 = vld [vmem:[%s9460_s7 + $0xe0] sm:$0xff] }
 0x41e   : > { %4165 = vmatpush1.bf16.msra.mxu0 %v10570_v27  ;;  %4251 = vmatpush1.bf16.msra.mxu1 %v10577_v42  ;;  %v10630_v42 = vld [vmem:[%s11755_s1 + $0x1e4] ss:$16 sps:$4 sm:$0xff]  }
 0x41f   : > { %4166 = vmatprep.subr.bf16.mxu0 %v10582_v49  ;;  %4252 = vmatprep.subr.bf16.mxu1 %v10588_v32  ;;  %v10618_v49 = vld [vmem:[%s11755_s1 + $0x1c0] ss:$16 sps:$4 sm:$0xff]   ;;  %v10625_v32 = vld [vmem:[%s11755_s1 + $0x1c8] ss:$16 sps:$4 sm:$0xff]   ;;  %12069 = vst [vmem:[#allocation30_spill] sm:$0xff] %v10630_v42 }
 0x420   : > { %12067 = vst [vmem:[#allocation28_spill] sm:$0xff] %v10618_v49  ;;  %12068 = vst [vmem:[#allocation29_spill] sm:$0xff] %v10625_v32 }
 0x422   : > { %4167 = vmatpush1.bf16.msra.mxu0 %v10594_v1  ;;  %4253 = vmatpush1.bf16.msra.mxu1 %v10601_v46  ;;  %v10636_v46 = vld [vmem:[%s11755_s1 + $0x1ec] ss:$16 sps:$4 sm:$0xff]  }
 0x423   : > { %4168 = vmatprep.subr.bf16.mxu0 %v10606_v63  ;;  %4254 = vmatprep.subr.bf16.mxu1 %v10612_v47  ;;  %12070 = vst [vmem:[#allocation31_spill] sm:$0xff] %v10636_v46  ;;  %v10642_v63 = vld [vmem:[%s11755_s1 + $0x1e0] ss:$16 sps:$4 sm:$0xff]   ;;  %v10649_v47 = vld [vmem:[%s11755_s1 + $0x1e8] ss:$16 sps:$4 sm:$0xff]  }
 0x424   : > { %12071 = vst [vmem:[#allocation32_spill] sm:$0xff] %v10642_v63  ;;  %12072 = vst [vmem:[#allocation33_spill] sm:$0xff] %v10649_v47 }
 0x426   : > { %4169 = vmatpush1.bf16.msra.mxu0 %v10618_v49  ;;  %4255 = vmatpush1.bf16.msra.mxu1 %v10625_v32  ;;  %v10655_v49 = vld [vmem:[%s11755_s1 + $0x204] ss:$16 sps:$4 sm:$0xff]   ;;  %v10661_v32 = vld [vmem:[%s11755_s1 + $0x20c] ss:$16 sps:$4 sm:$0xff]  }
 0x427   : > { %4170 = vmatprep.subr.bf16.mxu0 %v10630_v42  ;;  %4256 = vmatprep.subr.bf16.mxu1 %v10636_v46  ;;  %12073 = vst [vmem:[#allocation34_spill] sm:$0xff] %v10655_v49  ;;  %12074 = vst [vmem:[#allocation35_spill] sm:$0xff] %v10661_v32  ;;  %v7311_v42 = vld [vmem:[%s9460_s7 + $0xc0] sm:$0xff]  ;;  %v7312_v46 = vld [vmem:[%s9460_s7 + $0xc8] sm:$0xff] }
 0x42a   : > { %4171 = vmatpush1.bf16.msra.mxu0 %v10642_v63  ;;  %4257 = vmatpush1.bf16.msra.mxu1 %v10649_v47 }
 0x42b   : > { %4183 = vmatprep.subr.bf16.mxu0 %v10655_v49  ;;  %4269 = vmatprep.subr.bf16.mxu1 %v10661_v32 }
 0x4c0   : > { %v3381_v1 = vpop.f32.mrb[12].mxu0  ;;  %v3467_v27 = vpop.f32.mrb[12].mxu1 }
 0x4c1   : > { %v3476_v25 = vadd.f32 %v7311_v42, %v3381_v1  ;;  %v3383_v24 = vpop.f32.mrb[13].mxu0  ;;  %v3469_v63 = vpop.f32.mrb[13].mxu1  ;;  %v7313_v1 = vld [vmem:[%s9460_s7 + $0xd0] sm:$0xff] }
 0x4c2   : > { %v3477_v43 = vadd.f32 %v7312_v46, %v3383_v24  ;;  %v3385_v22 = vpop.f32.mrb[14].mxu0  ;;  %v3471_v21 = vpop.f32.mrb[14].mxu1  ;;  %v3479_v50 = vadd.f32 %v7314_v16, %v3469_v63  ;;  %v7317_v24 = vld [vmem:[%s9460_s7 + $0xf0] sm:$0xff]  ;;  %v3478_v46 = vadd.f32 %v7313_v1, %v3467_v27 }
 0x4c3   : > { %v7417_v47 = vmul.f32 -1.442695, %v3476_v25  ;;  %v3480_v49 = vadd.f32 %v7315_v26, %v3385_v22  ;;  %v3387_v20 = vpop.f32.mrb[15].mxu0  ;;  %v3473_v32 = vpop.f32.mrb[15].mxu1  ;;  %v3482_v25 = vadd.f32 %v7317_v24, %v3471_v21 }
 0x4c4   : > { %v7415_v18 = vmul.f32 -1.442695, %v3477_v43  ;;  %v3481_v17 = vadd.f32 %v7316_v23, %v3387_v20  ;;  %v7419_v12 = vmul.f32 -1.442695, %v3479_v50  ;;  %v3483_v11 = vadd.f32 %v7318_v13, %v3473_v32 }
 0x4c5   : > { %8613 = vpow2.f32 %v7417_v47  ;;  %v7418_v15 = vmul.f32 -1.442695, %v3480_v49 }
 0x4c6   : > { %8615 = vpow2.f32 %v7415_v18  ;;  %v7416_v42 = vmul.f32 -1.442695, %v3481_v17  ;;  %v7420_v20 = vmul.f32 -1.442695, %v3483_v11 }
 0x4c7   : > { %8617 = vpow2.f32 %v7418_v15 }
 0x4c8   : > { %8619 = vpow2.f32 %v7416_v42 }
 0x4c9   : > { %8621 = vtanh.f32 %v3478_v46 }
 0x4ca   : > { %8623 = vpow2.f32 %v7419_v12 }
 0x4cb   : > { %8625 = vtanh.f32 %v3482_v25 }
 0x4cf   : > { %v8614_v22 = vpop.eup %8613 }
 0x4d0   : > { %v8616_v26 = vpop.eup %8615  ;;  %v3506_v43 = vadd.f32 1.0, %v8614_v22 }
 0x4d1   : > { %v3492_v23 = vadd.f32 1.0, %v8616_v26  ;;  %v8618_v18 = vpop.eup %8617 }
 0x4d2   : > { %8627 = vrcp.f32 %v3506_v43  ;;  %v3507_v16 = vadd.f32 1.0, %v8618_v18  ;;  %v8620_v15 = vpop.eup %8619 }
 0x4d3   : > { %8629 = vrcp.f32 %v3492_v23  ;;  %v3493_v17 = vadd.f32 1.0, %v8620_v15  ;;  %v8622_v50 = vpop.eup %8621 }
 0x4d4   : > { %8631 = vpow2.f32 %v7420_v20  ;;  %v8624_v13 = vpop.eup %8623 }
 0x4d5   : > { %8633 = vrcp.f32 %v3507_v16  ;;  %v8626_v21 = vpop.eup %8625  ;;  %v3524_v63 = vadd.f32 1.0, %v8624_v13 }
 0x4d6   : > { %8635 = vrcp.f32 %v3493_v17 }
 0x4d7   : > { %8637 = vrcp.f32 %v3524_v63 }
 0x4dc   : > { %v8628_v27 = vpop.eup %8627 }
 0x4dd   : > { %v8630_v49 = vpop.eup %8629  ;;  %v3514_v32 = vmul.f32 %v8628_v27, %v8622_v50  ;;  %v10693_v27 = vld [vmem:[%s11755_s1 + $0x208] ss:$16 sps:$4 sm:$0xff]  }
 0x4de   : > { %v8632_v12 = vpop.eup %8631  ;;  %v3498_v11 = vmul.f32 %v8630_v49, %v10221_v4 }
 0x4df   : > { %v8634_v47 = vpop.eup %8633  ;;  %v3525_v46 = vadd.f32 1.0, %v8632_v12 }
 0x4e0   : > { %v10675_v42 = vadd.f32 %v3514_v32, %v3498_v11  ;;  %v3515_v1 = vmul.f32 %v8634_v47, %v8626_v21  ;;  %v8636_v24 = vpop.eup %8635  ;;  %v10688_v21 = vld [vmem:[%s11755_s1 + $0x200] ss:$16 sps:$4 sm:$0xff]   ;;  %v10705_v11 = vld [vmem:[%s11755_s1 + $0x224] ss:$16 sps:$4 sm:$0xff]   ;;  %v10710_v47 = vld [vmem:[%s11755_s1 + $0x22c] ss:$16 sps:$4 sm:$0xff]  }
 0x4e1   : > { %v3499_v25 = vmul.f32 %v8636_v24, %v10225_v10  ;;  %v8638_v26 = vpop.eup %8637  ;;  %v10719_v24 = vld [vmem:[%s11755_s1 + $0x220] ss:$16 sps:$4 sm:$0xff]  }
 0x4e2   : > { %8639 = vtanh.f32 %v10675_v42 }
 0x4e3   : > { %v10679_v22 = vadd.f32 %v3515_v1, %v3499_v25  ;;  %8641 = vrcp.f32 %v3525_v46  ;;  %v10724_v46 = vld [vmem:[%s11755_s1 + $0x228] ss:$16 sps:$4 sm:$0xff]   ;;  %v10731_v25 = vld [vmem:[%s11755_s1 + $0x244] ss:$16 sps:$4 sm:$0xff]  }
 0x4e5   : > { %8643 = vtanh.f32 %v10679_v22 }
 0x4ec   : > { %v8640_v43 = vpop.eup %8639 }
 0x4ed   : > { %v3532_v20 = vmul.f32 %v8640_v43, %v8638_v26  ;;  %v8642_v4 = vpop.eup %8641  ;;  %v10736_v26 = vld [vmem:[%s11755_s1 + $0x24c] ss:$16 sps:$4 sm:$0xff]   ;;  %v10745_v43 = vld [vmem:[%s11755_s1 + $0x240] ss:$16 sps:$4 sm:$0xff]  }
 0x4ef   : > { %v8644_v23 = vpop.eup %8643  ;;  %v3543_v18 = vrot.slane %v3532_v20, 7  ;;  %v3547_v50 = vrot.slane %v3532_v20, 1 }
 0x4f0   : > { %v3533_v16 = vmul.f32 %v8644_v23, %v8642_v4  ;;  %v10757_v4 = vld [vmem:[%s11755_s1 + $0x264] ss:$16 sps:$4 sm:$0xff]   ;;  %v10762_v23 = vld [vmem:[%s11755_s1 + $0x26c] ss:$16 sps:$4 sm:$0xff]  }
 0x4f1   : > { %v3546_v10 = vsel %vm200_vm0, %v11950_v28, %v3543_v18 }
 0x4f2   : > { %v3553_v15 = vpack.c.bf16 %v3533_v16, %v3532_v20  ;;  %v3544_v17 = vrot.slane %v3533_v16, 7  ;;  %v3548_v13 = vrot.slane %v3533_v16, 1  ;;  %v10750_v20 = vld [vmem:[%s11755_s1 + $0x248] ss:$16 sps:$4 sm:$0xff]  }
 0x4f3   : > { %v10774_v16 = vld [vmem:[%s11755_s1 + $0x268] ss:$16 sps:$4 sm:$0xff]  }
 0x4f4   : > { %4172 = vmatprep.mubr.bf16.mxu0 %v3553_v15  ;;  %4258 = vmatprep.mubr.bf16.mxu1 %v3553_v15  ;;  %v3545_v49 = vsel %vm200_vm0, %v3543_v18, %v3544_v17  ;;  %v3550_v32 = vsel %vm206_vm1, %v3548_v13, %v9374_v53  ;;  %v3551_v63 = vsel %vm206_vm1, %v3547_v50, %v3548_v13  ;;  %v10769_v18 = vld [vmem:[%s11755_s1 + $0x260] ss:$16 sps:$4 sm:$0xff]   ;;  %v10781_v15 = vld [vmem:[%s11755_s1 + $0x284] ss:$16 sps:$4 sm:$0xff]   ;;  %v10786_v17 = vld [vmem:[%s11755_s1 + $0x28c] ss:$16 sps:$4 sm:$0xff]  }
 0x4f5   : > { %v3552_v12 = vpack.c.bf16 %v3545_v49, %v3546_v10  ;;  %v10712_v1 = vpack.c.bf16 %v3550_v32, %v3551_v63  ;;  %v10793_v50 = vld [vmem:[%s11755_s1 + $0x280] ss:$16 sps:$4 sm:$0xff]   ;;  %v10798_v13 = vld [vmem:[%s11755_s1 + $0x288] ss:$16 sps:$4 sm:$0xff]   ;;  %v10805_v10 = vld [vmem:[%s11755_s1 + $0x2a4] ss:$16 sps:$4 sm:$0xff]  }
 0x4f6   : > { %12075 = vst [vmem:[#allocation36_spill] sm:$0xff] %v10798_v13  ;;  %12076 = vst [vmem:[#allocation37_spill] sm:$0xff] %v10805_v10  ;;  %v10810_v49 = vld [vmem:[%s11755_s1 + $0x2ac] ss:$16 sps:$4 sm:$0xff]   ;;  %v10817_v32 = vld [vmem:[%s11755_s1 + $0x2a0] ss:$16 sps:$4 sm:$0xff]  }
 0x4f7   : > { %4173 = vmatmul.mubr.bf16.vlgmr.msra.gmra.mrb[16].mxu0 %v3552_v12  ;;  %4259 = vmatmul.mubr.bf16.vlgmr.msra.gmra.mrb[16].mxu1 %v3552_v12  ;;  %12077 = vst [vmem:[#allocation38_spill] sm:$0xff] %v10810_v49  ;;  %12078 = vst [vmem:[#allocation39_spill] sm:$0xff] %v10817_v32  ;;  %v10822_v63 = vld [vmem:[%s11755_s1 + $0x2a8] ss:$16 sps:$4 sm:$0xff]   ;;  %v10829_v12 = vld [vmem:[%s11755_s1 + $0x2c4] ss:$16 sps:$4 sm:$0xff]  }
 0x4f8   : > { %4184 = vmatpush1.bf16.msra.mxu0 %v10688_v21  ;;  %4270 = vmatpush1.bf16.msra.mxu1 %v10693_v27  ;;  %12079 = vst [vmem:[#allocation40_spill] sm:$0xff] %v10822_v63  ;;  %12080 = vst [vmem:[#allocation41_spill] sm:$0xff] %v10829_v12 }
 0x4f9   : > { %4185 = vmatprep.subr.bf16.mxu0 %v10705_v11  ;;  %4271 = vmatprep.subr.bf16.mxu1 %v10710_v47 }
 0x4fa   : > { %4215 = vmatprep.mubr.bf16.mxu0 %v11951_v39  ;;  %4301 = vmatprep.mubr.bf16.mxu1 %v11951_v39 }
 0x4fc   : > { %4186 = vmatpush1.bf16.msra.mxu0 %v10719_v24  ;;  %4272 = vmatpush1.bf16.msra.mxu1 %v10724_v46 }
 0x4fd   : > { %4187 = vmatprep.subr.bf16.mxu0 %v10731_v25  ;;  %4273 = vmatprep.subr.bf16.mxu1 %v10736_v26 }
 0x500   : > { %4188 = vmatpush1.bf16.msra.mxu0 %v10745_v43  ;;  %4274 = vmatpush1.bf16.msra.mxu1 %v10750_v20 }
 0x501   : > { %4189 = vmatprep.subr.bf16.mxu0 %v10757_v4  ;;  %4275 = vmatprep.subr.bf16.mxu1 %v10762_v23 }
 0x504   : > { %4190 = vmatpush1.bf16.msra.mxu0 %v10769_v18  ;;  %4276 = vmatpush1.bf16.msra.mxu1 %v10774_v16 }
 0x505   : > { %4191 = vmatprep.subr.bf16.mxu0 %v10781_v15  ;;  %4277 = vmatprep.subr.bf16.mxu1 %v10786_v17 }
 0x508   : > { %4192 = vmatpush1.bf16.msra.mxu0 %v10793_v50  ;;  %4278 = vmatpush1.bf16.msra.mxu1 %v10798_v13  ;;  %v10834_v13 = vld [vmem:[%s11755_s1 + $0x2cc] ss:$16 sps:$4 sm:$0xff]  }
 0x509   : > { %4193 = vmatprep.subr.bf16.mxu0 %v10805_v10  ;;  %4279 = vmatprep.subr.bf16.mxu1 %v10810_v49  ;;  %12081 = vst [vmem:[#allocation42_spill] sm:$0xff] %v10834_v13  ;;  %v10841_v10 = vld [vmem:[%s11755_s1 + $0x2c0] ss:$16 sps:$4 sm:$0xff]   ;;  %v10846_v49 = vld [vmem:[%s11755_s1 + $0x2c8] ss:$16 sps:$4 sm:$0xff]  }
 0x50c   : > { %4194 = vmatpush1.bf16.msra.mxu0 %v10817_v32  ;;  %4280 = vmatpush1.bf16.msra.mxu1 %v10822_v63  ;;  %v10853_v32 = vld [vmem:[%s11755_s1 + $0x2e4] ss:$16 sps:$4 sm:$0xff]   ;;  %v10858_v63 = vld [vmem:[%s11755_s1 + $0x2ec] ss:$16 sps:$4 sm:$0xff]  }
 0x50d   : > { %4195 = vmatprep.subr.bf16.mxu0 %v10829_v12  ;;  %4281 = vmatprep.subr.bf16.mxu1 %v10834_v13  ;;  %v10865_v12 = vld [vmem:[%s11755_s1 + $0x2e0] ss:$16 sps:$4 sm:$0xff]   ;;  %v10870_v13 = vld [vmem:[%s11755_s1 + $0x2e8] ss:$16 sps:$4 sm:$0xff]  }
 0x510   : > { %4196 = vmatpush1.bf16.msra.mxu0 %v10841_v10  ;;  %4282 = vmatpush1.bf16.msra.mxu1 %v10846_v49 }
 0x511   : > { %4197 = vmatprep.subr.bf16.mxu0 %v10853_v32  ;;  %4283 = vmatprep.subr.bf16.mxu1 %v10858_v63 }
 0x514   : > { %4198 = vmatpush1.bf16.msra.mxu0 %v10865_v12  ;;  %4284 = vmatpush1.bf16.msra.mxu1 %v10870_v13 }
 0x515   : > { %4976 = vmatprep.subr.bf16.mxu0 %v10271_v48  ;;  %5062 = vmatprep.subr.bf16.mxu1 %v10276_v44  ;;  %v12082_v48 = vld [vmem:[#allocation4_spill] sm:$0xff]  ;;  %v12083_v44 = vld [vmem:[#allocation5_spill] sm:$0xff] }
 0x517   : > { %4216 = vmatmul.mubr.bf16.vlgmr.msra.gmra.mrb[16].mxu0 %v10712_v1  ;;  %4302 = vmatmul.mubr.bf16.vlgmr.msra.gmra.mrb[16].mxu1 %v10712_v1 }
 0x518   : > { %4977 = vmatpush1.bf16.msra.mxu0 %v10283_v41  ;;  %5063 = vmatpush1.bf16.msra.mxu1 %v10288_v9  ;;  %v12084_v41 = vld [vmem:[#allocation6_spill] sm:$0xff]  ;;  %v12085_v9 = vld [vmem:[#allocation7_spill] sm:$0xff] }
 0x519   : > { %4978 = vmatprep.subr.bf16.mxu0 %v10295_v45  ;;  %5064 = vmatprep.subr.bf16.mxu1 %v10300_v40  ;;  %v12086_v45 = vld [vmem:[#allocation8_spill] sm:$0xff]  ;;  %v12087_v40 = vld [vmem:[#allocation9_spill] sm:$0xff] }
 0x51c   : > { %4979 = vmatpush1.bf16.msra.mxu0 %v10307_v37  ;;  %5065 = vmatpush1.bf16.msra.mxu1 %v10312_v36  ;;  %v12088_v37 = vld [vmem:[#allocation10_spill] sm:$0xff]  ;;  %v12089_v36 = vld [vmem:[#allocation11_spill] sm:$0xff] }
 0x51d   : > { %4980 = vmatprep.subr.bf16.mxu0 %v10319_v38  ;;  %5066 = vmatprep.subr.bf16.mxu1 %v10324_v35  ;;  %v12090_v38 = vld [vmem:[#allocation12_spill] sm:$0xff]  ;;  %v12091_v35 = vld [vmem:[#allocation13_spill] sm:$0xff] }
 0x520   : > { %4981 = vmatpush1.bf16.msra.mxu0 %v10331_v34  ;;  %5067 = vmatpush1.bf16.msra.mxu1 %v10336_v14  ;;  %v12092_v34 = vld [vmem:[#allocation14_spill] sm:$0xff]  ;;  %v12093_v14 = vld [vmem:[#allocation15_spill] sm:$0xff] }
 0x521   : > { %4982 = vmatprep.subr.bf16.mxu0 %v10345_v51  ;;  %5068 = vmatprep.subr.bf16.mxu1 %v10350_v52  ;;  %v12094_v51 = vld [vmem:[#allocation17_spill] sm:$0xff]  ;;  %v12095_v52 = vld [vmem:[#allocation18_spill] sm:$0xff] }
 0x524   : > { %4983 = vmatpush1.bf16.msra.mxu0 %v10355_v0  ;;  %5069 = vmatpush1.bf16.msra.mxu1 %v10360_v33  ;;  %v12096_v0 = vld [vmem:[#allocation16_spill] sm:$0xff]  ;;  %v12097_v33 = vld [vmem:[#allocation19_spill] sm:$0xff] }
 0x525   : > { %4984 = vmatprep.subr.bf16.mxu0 %v10369_v29  ;;  %5070 = vmatprep.subr.bf16.mxu1 %v10384_v55  ;;  %v12098_v29 = vld [vmem:[#allocation20_spill] sm:$0xff]  ;;  %v12101_v55 = vld [vmem:[#allocation23_spill] sm:$0xff] }
 0x528   : > { %4985 = vmatpush1.bf16.msra.mxu0 %v10374_v30  ;;  %5071 = vmatpush1.bf16.msra.mxu1 %v10379_v31  ;;  %v12099_v30 = vld [vmem:[#allocation21_spill] sm:$0xff]  ;;  %v12100_v31 = vld [vmem:[#allocation22_spill] sm:$0xff] }
 0x529   : > { %4986 = vmatprep.subr.bf16.mxu0 %v10393_v3  ;;  %5072 = vmatprep.subr.bf16.mxu1 %v10398_v59  ;;  %v12102_v3 = vld [vmem:[#allocation24_spill] sm:$0xff]  ;;  %v12103_v59 = vld [vmem:[#allocation25_spill] sm:$0xff] }
 0x52c   : > { %4987 = vmatpush1.bf16.msra.mxu0 %v10403_v60  ;;  %5073 = vmatpush1.bf16.msra.mxu1 %v10408_v61  ;;  %v12104_v60 = vld [vmem:[#allocation26_spill] sm:$0xff]  ;;  %v12105_v61 = vld [vmem:[#allocation27_spill] sm:$0xff] }
 0x52d   : > { %4988 = vmatprep.subr.bf16.mxu0 %v10417_v56  ;;  %5074 = vmatprep.subr.bf16.mxu1 %v10422_v62  ;;  %v12106_v56 = vld [vmem:[#allocation28_spill] sm:$0xff]  ;;  %v12107_v62 = vld [vmem:[#allocation29_spill] sm:$0xff] }
 0x530   : > { %4989 = vmatpush1.bf16.msra.mxu0 %v10427_v54  ;;  %5075 = vmatpush1.bf16.msra.mxu1 %v10432_v57  ;;  %v12108_v54 = vld [vmem:[#allocation30_spill] sm:$0xff]  ;;  %v12109_v57 = vld [vmem:[#allocation31_spill] sm:$0xff] }
 0x531   : > { %4990 = vmatprep.subr.bf16.mxu0 %v10441_v58  ;;  %5076 = vmatprep.subr.bf16.mxu1 %v10446_v2  ;;  %v12110_v58 = vld [vmem:[#allocation32_spill] sm:$0xff]  ;;  %v12111_v2 = vld [vmem:[#allocation33_spill] sm:$0xff] }
 0x534   : > { %4991 = vmatpush1.bf16.msra.mxu0 %v10451_v5  ;;  %5077 = vmatpush1.bf16.msra.mxu1 %v10456_v6  ;;  %v12112_v5 = vld [vmem:[#allocation34_spill] sm:$0xff]  ;;  %v12113_v6 = vld [vmem:[#allocation35_spill] sm:$0xff] }
 0x535   : > { %4992 = vmatprep.subr.bf16.mxu0 %v10465_v7  ;;  %5078 = vmatprep.subr.bf16.mxu1 %v10470_v8  ;;  %v7421_v7 = vld [vmem:[%s9460_s7 + $0x100] sm:$0xff]  ;;  %v7422_v8 = vld [vmem:[%s9460_s7 + $0x108] sm:$0xff] }
 0x538   : > { %4993 = vmatpush1.bf16.msra.mxu0 %v12082_v48  ;;  %5079 = vmatpush1.bf16.msra.mxu1 %v12083_v44  ;;  %v7425_v44 = vld [vmem:[%s9460_s7 + $0x120] sm:$0xff] }
 0x539   : > { %4994 = vmatprep.subr.bf16.mxu0 %v12084_v41  ;;  %5080 = vmatprep.subr.bf16.mxu1 %v12085_v9 }
 0x53c   : > { %4995 = vmatpush1.bf16.msra.mxu0 %v12086_v45  ;;  %5081 = vmatpush1.bf16.msra.mxu1 %v12087_v40  ;;  %v7426_v40 = vld [vmem:[%s9460_s7 + $0x128] sm:$0xff] }
 0x53d   : > { %4996 = vmatprep.subr.bf16.mxu0 %v12088_v37  ;;  %5082 = vmatprep.subr.bf16.mxu1 %v12089_v36 }
 0x540   : > { %4997 = vmatpush1.bf16.msra.mxu0 %v12090_v38  ;;  %5083 = vmatpush1.bf16.msra.mxu1 %v12091_v35 }
 0x541   : > { %4998 = vmatprep.subr.bf16.mxu0 %v12092_v34  ;;  %5084 = vmatprep.subr.bf16.mxu1 %v12093_v14 }
 0x544   : > { %4999 = vmatpush1.bf16.msra.mxu0 %v12094_v51  ;;  %5085 = vmatpush1.bf16.msra.mxu1 %v12095_v52 }
 0x545   : > { %5000 = vmatprep.subr.bf16.mxu0 %v12096_v0  ;;  %5086 = vmatprep.subr.bf16.mxu1 %v12097_v33  ;;  %v7424_v33 = vld [vmem:[%s9460_s7 + $0x118] sm:$0xff] }
 0x548   : > { %5001 = vmatpush1.bf16.msra.mxu0 %v12098_v29  ;;  %5087 = vmatpush1.bf16.msra.mxu1 %v12099_v30 }
 0x549   : > { %5002 = vmatprep.subr.bf16.mxu0 %v12100_v31  ;;  %5088 = vmatprep.subr.bf16.mxu1 %v12101_v55  ;;  %v7423_v31 = vld [vmem:[%s9460_s7 + $0x110] sm:$0xff] }
 0x54c   : > { %5003 = vmatpush1.bf16.msra.mxu0 %v12102_v3  ;;  %5089 = vmatpush1.bf16.msra.mxu1 %v12103_v59  ;;  %v7428_v3 = vld [vmem:[%s9460_s7 + $0x138] sm:$0xff]  ;;  %v7427_v59 = vld [vmem:[%s9460_s7 + $0x130] sm:$0xff] }
 0x54d   : > { %5004 = vmatprep.subr.bf16.mxu0 %v12104_v60  ;;  %5090 = vmatprep.subr.bf16.mxu1 %v12105_v61 }
 0x550   : > { %5005 = vmatpush1.bf16.msra.mxu0 %v12106_v56  ;;  %5091 = vmatpush1.bf16.msra.mxu1 %v12107_v62 }
 0x551   : > { %5006 = vmatprep.subr.bf16.mxu0 %v12108_v54  ;;  %5092 = vmatprep.subr.bf16.mxu1 %v12109_v57 }
 0x554   : > { %5007 = vmatpush1.bf16.msra.mxu0 %v12110_v58  ;;  %5093 = vmatpush1.bf16.msra.mxu1 %v12111_v2 }
 0x555   : > { %5019 = vmatprep.subr.bf16.mxu0 %v12112_v5  ;;  %5105 = vmatprep.subr.bf16.mxu1 %v12113_v6 }
 0x5ea   : > { %v4217_v1 = vpop.f32.mrb[16].mxu0  ;;  %v4303_v48 = vpop.f32.mrb[16].mxu1 }
 0x5eb   : > { %v4312_v41 = vadd.f32 %v7421_v7, %v4217_v1  ;;  %v4219_v9 = vpop.f32.mrb[17].mxu0  ;;  %v4305_v45 = vpop.f32.mrb[17].mxu1  ;;  %v4314_v60 = vadd.f32 %v7423_v31, %v4303_v48 }
 0x5ec   : > { %v4313_v37 = vadd.f32 %v7422_v8, %v4219_v9  ;;  %v4221_v36 = vpop.f32.mrb[18].mxu0  ;;  %v4307_v38 = vpop.f32.mrb[18].mxu1  ;;  %v4315_v55 = vadd.f32 %v7424_v33, %v4305_v45 }
 0x5ed   : > { %v7527_v35 = vmul.f32 -1.442695, %v4312_v41  ;;  %v4316_v34 = vadd.f32 %v7425_v44, %v4221_v36  ;;  %v4223_v14 = vpop.f32.mrb[19].mxu0  ;;  %v4309_v51 = vpop.f32.mrb[19].mxu1  ;;  %v4318_v62 = vadd.f32 %v7427_v59, %v4307_v38 }
 0x5ee   : > { %v7525_v52 = vmul.f32 -1.442695, %v4313_v37  ;;  %v4317_v0 = vadd.f32 %v7426_v40, %v4223_v14  ;;  %v7529_v61 = vmul.f32 -1.442695, %v4315_v55  ;;  %v4319_v56 = vadd.f32 %v7428_v3, %v4309_v51 }
 0x5ef   : > { %8645 = vpow2.f32 %v7527_v35  ;;  %v7528_v29 = vmul.f32 -1.442695, %v4316_v34 }
 0x5f0   : > { %8647 = vpow2.f32 %v7525_v52  ;;  %v7526_v30 = vmul.f32 -1.442695, %v4317_v0  ;;  %v7530_v2 = vmul.f32 -1.442695, %v4319_v56 }
 0x5f1   : > { %8649 = vpow2.f32 %v7528_v29 }
 0x5f2   : > { %8651 = vpow2.f32 %v7526_v30 }
 0x5f3   : > { %8653 = vtanh.f32 %v4314_v60 }
 0x5f4   : > { %8655 = vpow2.f32 %v7529_v61 }
 0x5f5   : > { %8657 = vtanh.f32 %v4318_v62 }
 0x5f9   : > { %v8646_v54 = vpop.eup %8645 }
 0x5fa   : > { %v8648_v57 = vpop.eup %8647  ;;  %v4342_v58 = vadd.f32 1.0, %v8646_v54 }
 0x5fb   : > { %v4328_v5 = vadd.f32 1.0, %v8648_v57  ;;  %v8650_v6 = vpop.eup %8649 }
 0x5fc   : > { %8659 = vrcp.f32 %v4342_v58  ;;  %v4343_v7 = vadd.f32 1.0, %v8650_v6  ;;  %v8652_v8 = vpop.eup %8651  ;;  %v11101_v6 = vld [vmem:[%s11755_s1 + $0x84] ss:$16 sps:$4 sm:$0xff]  }
 0x5fd   : > { %8661 = vrcp.f32 %v4328_v5  ;;  %v4329_v1 = vadd.f32 1.0, %v8652_v8  ;;  %v8654_v48 = vpop.eup %8653  ;;  %v11111_v8 = vld [vmem:[%s11755_s1 + $0x88] ss:$16 sps:$4 sm:$0xff]  }
 0x5fe   : > { %8663 = vpow2.f32 %v7530_v2  ;;  %v8656_v44 = vpop.eup %8655 }
 0x5ff   : > { %8665 = vrcp.f32 %v4343_v7  ;;  %v8658_v41 = vpop.eup %8657  ;;  %v4360_v37 = vadd.f32 1.0, %v8656_v44  ;;  %v11106_v7 = vld [vmem:[%s11755_s1 + $0x80] ss:$16 sps:$4 sm:$0xff]   ;;  %v11130_v44 = vld [vmem:[%s11755_s1 + $0xac] ss:$16 sps:$4 sm:$0xff]  }
 0x600   : > { %8667 = vrcp.f32 %v4329_v1  ;;  %v11116_v1 = vld [vmem:[%s11755_s1 + $0x8c] ss:$16 sps:$4 sm:$0xff]  }
 0x601   : > { %8669 = vrcp.f32 %v4360_v37  ;;  %v11159_v37 = vld [vmem:[%s11755_s1 + $0xc0] ss:$16 sps:$4 sm:$0xff]  }
 0x606   : > { %v8660_v9 = vpop.eup %8659 }
 0x607   : > { %v8662_v45 = vpop.eup %8661  ;;  %v4350_v40 = vmul.f32 %v8660_v9, %v8654_v48  ;;  %v11125_v48 = vld [vmem:[%s11755_s1 + $0xa4] ss:$16 sps:$4 sm:$0xff]   ;;  %v11140_v9 = vld [vmem:[%s11755_s1 + $0xa8] ss:$16 sps:$4 sm:$0xff]  }
 0x608   : > { %v8664_v36 = vpop.eup %8663  ;;  %v4334_v38 = vmul.f32 %v8662_v45, %v10675_v42  ;;  %v11149_v45 = vld [vmem:[%s11755_s1 + $0xc4] ss:$16 sps:$4 sm:$0xff]  }
 0x609   : > { %v8666_v35 = vpop.eup %8665  ;;  %v4361_v52 = vadd.f32 1.0, %v8664_v36  ;;  %v11164_v36 = vld [vmem:[%s11755_s1 + $0xc8] ss:$16 sps:$4 sm:$0xff]  }
 0x60a   : > { %v10953_v34 = vadd.f32 %v4350_v40, %v4334_v38  ;;  %v4351_v14 = vmul.f32 %v8666_v35, %v8658_v41  ;;  %v8668_v51 = vpop.eup %8667  ;;  %v11135_v41 = vld [vmem:[%s11755_s1 + $0xa0] ss:$16 sps:$4 sm:$0xff]   ;;  %v11154_v40 = vld [vmem:[%s11755_s1 + $0xcc] ss:$16 sps:$4 sm:$0xff]   ;;  %v11173_v38 = vld [vmem:[%s11755_s1 + $0xe4] ss:$16 sps:$4 sm:$0xff]  }
 0x60b   : > { %v4335_v0 = vmul.f32 %v8668_v51, %v10679_v22  ;;  %v8670_v29 = vpop.eup %8669  ;;  %v11178_v35 = vld [vmem:[%s11755_s1 + $0xec] ss:$16 sps:$4 sm:$0xff]   ;;  %v11188_v51 = vld [vmem:[%s11755_s1 + $0xe8] ss:$16 sps:$4 sm:$0xff]  }
 0x60c   : > { %8671 = vtanh.f32 %v10953_v34 }
 0x60d   : > { %v10957_v33 = vadd.f32 %v4351_v14, %v4335_v0  ;;  %8673 = vrcp.f32 %v4361_v52  ;;  %v11183_v14 = vld [vmem:[%s11755_s1 + $0xe0] ss:$16 sps:$4 sm:$0xff]   ;;  %v11197_v52 = vld [vmem:[%s11755_s1 + $0x104] ss:$16 sps:$4 sm:$0xff]   ;;  %v11202_v0 = vld [vmem:[%s11755_s1 + $0x10c] ss:$16 sps:$4 sm:$0xff]  }
 0x60f   : > { %8675 = vtanh.f32 %v10957_v33 }
 0x616   : > { %v8672_v30 = vpop.eup %8671 }
 0x617   : > { %v4368_v31 = vmul.f32 %v8672_v30, %v8670_v29  ;;  %v8674_v42 = vpop.eup %8673  ;;  %v11207_v29 = vld [vmem:[%s11755_s1 + $0x100] ss:$16 sps:$4 sm:$0xff]   ;;  %v11212_v30 = vld [vmem:[%s11755_s1 + $0x108] ss:$16 sps:$4 sm:$0xff]  }
 0x618   : > { %12121 = vst [vmem:[#allocation4_spill] sm:$0xff] %v11207_v29  ;;  %12122 = vst [vmem:[#allocation5_spill] sm:$0xff] %v11212_v30 }
 0x619   : > { %v8676_v55 = vpop.eup %8675  ;;  %v4379_v3 = vrot.slane %v4368_v31, 7  ;;  %v4383_v56 = vrot.slane %v4368_v31, 1 }
 0x61a   : > { %v4369_v59 = vmul.f32 %v8676_v55, %v8674_v42  ;;  %v11226_v42 = vld [vmem:[%s11755_s1 + $0x12c] ss:$16 sps:$4 sm:$0xff]   ;;  %v11231_v55 = vld [vmem:[%s11755_s1 + $0x120] ss:$16 sps:$4 sm:$0xff]  }
 0x61b   : > { %v4382_v22 = vsel %vm200_vm0, %v11950_v28, %v4379_v3  ;;  %12124 = vst [vmem:[#allocation7_spill] sm:$0xff] %v11226_v42  ;;  %12125 = vst [vmem:[#allocation8_spill] sm:$0xff] %v11231_v55 }
 0x61c   : > { %v4389_v60 = vpack.c.bf16 %v4369_v59, %v4368_v31  ;;  %v4380_v61 = vrot.slane %v4369_v59, 7  ;;  %v4384_v62 = vrot.slane %v4369_v59, 1  ;;  %v11221_v31 = vld [vmem:[%s11755_s1 + $0x124] ss:$16 sps:$4 sm:$0xff]  }
 0x61d   : > { %12123 = vst [vmem:[#allocation6_spill] sm:$0xff] %v11221_v31  ;;  %v11245_v59 = vld [vmem:[%s11755_s1 + $0x144] ss:$16 sps:$4 sm:$0xff]  }
 0x61e   : > { %5008 = vmatprep.mubr.bf16.mxu0 %v4389_v60  ;;  %5094 = vmatprep.mubr.bf16.mxu1 %v4389_v60  ;;  %v4381_v54 = vsel %vm200_vm0, %v4379_v3, %v4380_v61  ;;  %v4386_v57 = vsel %vm206_vm1, %v4384_v62, %v9374_v53  ;;  %v4387_v58 = vsel %vm206_vm1, %v4383_v56, %v4384_v62  ;;  %v11236_v3 = vld [vmem:[%s11755_s1 + $0x128] ss:$16 sps:$4 sm:$0xff]   ;;  %v11250_v60 = vld [vmem:[%s11755_s1 + $0x14c] ss:$16 sps:$4 sm:$0xff]   ;;  %v11255_v61 = vld [vmem:[%s11755_s1 + $0x140] ss:$16 sps:$4 sm:$0xff]  }
 0x61f   : > { %v4388_v2 = vpack.c.bf16 %v4381_v54, %v4382_v22  ;;  %v4390_v5 = vpack.c.bf16 %v4386_v57, %v4387_v58  ;;  %12126 = vst [vmem:[#allocation9_spill] sm:$0xff] %v11236_v3  ;;  %12127 = vst [vmem:[#allocation10_spill] sm:$0xff] %v11245_v59  ;;  %v11260_v56 = vld [vmem:[%s11755_s1 + $0x148] ss:$16 sps:$4 sm:$0xff]   ;;  %v11269_v62 = vld [vmem:[%s11755_s1 + $0x164] ss:$16 sps:$4 sm:$0xff]  }
 0x620   : > { %12128 = vst [vmem:[#allocation11_spill] sm:$0xff] %v11250_v60  ;;  %12129 = vst [vmem:[#allocation12_spill] sm:$0xff] %v11255_v61  ;;  %v11274_v22 = vld [vmem:[%s11755_s1 + $0x16c] ss:$16 sps:$4 sm:$0xff]   ;;  %v11279_v54 = vld [vmem:[%s11755_s1 + $0x160] ss:$16 sps:$4 sm:$0xff]  }
 0x621   : > { %5009 = vmatmul.mubr.bf16.vlgmr.msra.gmra.mrb[20].mxu0 %v4388_v2  ;;  %5095 = vmatmul.mubr.bf16.vlgmr.msra.gmra.mrb[20].mxu1 %v4388_v2  ;;  %12130 = vst [vmem:[#allocation13_spill] sm:$0xff] %v11260_v56  ;;  %12131 = vst [vmem:[#allocation14_spill] sm:$0xff] %v11269_v62  ;;  %v11284_v57 = vld [vmem:[%s11755_s1 + $0x168] ss:$16 sps:$4 sm:$0xff]   ;;  %v11291_v58 = vld [vmem:[%s11755_s1 + $0x184] ss:$16 sps:$4 sm:$0xff]  }
 0x622   : > { %5020 = vmatpush1.bf16.msra.mxu0 %v10688_v21  ;;  %5106 = vmatpush1.bf16.msra.mxu1 %v10693_v27  ;;  %v12114_v21 = vld [vmem:[#allocation36_spill] sm:$0xff]  ;;  %v12115_v27 = vld [vmem:[#allocation37_spill] sm:$0xff]  ;;  %12132 = vst [vmem:[#allocation15_spill] sm:$0xff] %v11274_v22  ;;  %12133 = vst [vmem:[#allocation17_spill] sm:$0xff] %v11279_v54 }
 0x623   : > { %5021 = vmatprep.subr.bf16.mxu0 %v10705_v11  ;;  %5107 = vmatprep.subr.bf16.mxu1 %v10710_v47  ;;  %v12116_v11 = vld [vmem:[#allocation38_spill] sm:$0xff]  ;;  %v12117_v47 = vld [vmem:[#allocation39_spill] sm:$0xff]  ;;  %12134 = vst [vmem:[#allocation18_spill] sm:$0xff] %v11284_v57  ;;  %12135 = vst [vmem:[#allocation16_spill] sm:$0xff] %v11291_v58 }
 0x624   : > { %5051 = vmatprep.mubr.bf16.mxu0 %v11951_v39  ;;  %5137 = vmatprep.mubr.bf16.mxu1 %v11951_v39  ;;  %v11296_v2 = vld [vmem:[%s11755_s1 + $0x18c] ss:$16 sps:$4 sm:$0xff]  }
 0x625   : > { %12136 = vst [vmem:[#allocation19_spill] sm:$0xff] %v11296_v2 }
 0x626   : > { %5022 = vmatpush1.bf16.msra.mxu0 %v10719_v24  ;;  %5108 = vmatpush1.bf16.msra.mxu1 %v10724_v46  ;;  %v12118_v24 = vld [vmem:[#allocation40_spill] sm:$0xff]  ;;  %v12119_v46 = vld [vmem:[#allocation41_spill] sm:$0xff] }
 0x627   : > { %5023 = vmatprep.subr.bf16.mxu0 %v10731_v25  ;;  %5109 = vmatprep.subr.bf16.mxu1 %v10736_v26  ;;  %v12120_v25 = vld [vmem:[#allocation42_spill] sm:$0xff] }
 0x628   : > { %v11003_v26 = vld [vmem:[%s11755_s1 + $0x4] ss:$16 sps:$4 sm:$0xff]  }
 0x62a   : > { %5024 = vmatpush1.bf16.msra.mxu0 %v10745_v43  ;;  %5110 = vmatpush1.bf16.msra.mxu1 %v10750_v20  ;;  %v11008_v43 = vld [vmem:[%s11755_s1 + $0xc] ss:$16 sps:$4 sm:$0xff]   ;;  %v11015_v20 = vld [vmem:[%s11755_s1] ss:$16 sps:$4 sm:$0xff]  }
 0x62b   : > { %5025 = vmatprep.subr.bf16.mxu0 %v10757_v4  ;;  %5111 = vmatprep.subr.bf16.mxu1 %v10762_v23  ;;  %v11020_v4 = vld [vmem:[%s11755_s1 + $0x8] ss:$16 sps:$4 sm:$0xff]   ;;  %v11027_v23 = vld [vmem:[%s11755_s1 + $0x24] ss:$16 sps:$4 sm:$0xff]  }
 0x62e   : > { %5026 = vmatpush1.bf16.msra.mxu0 %v10769_v18  ;;  %5112 = vmatpush1.bf16.msra.mxu1 %v10774_v16  ;;  %v11032_v18 = vld [vmem:[%s11755_s1 + $0x2c] ss:$16 sps:$4 sm:$0xff]   ;;  %v11039_v16 = vld [vmem:[%s11755_s1 + $0x20] ss:$16 sps:$4 sm:$0xff]  }
 0x62f   : > { %5027 = vmatprep.subr.bf16.mxu0 %v10781_v15  ;;  %5113 = vmatprep.subr.bf16.mxu1 %v10786_v17  ;;  %v11044_v15 = vld [vmem:[%s11755_s1 + $0x28] ss:$16 sps:$4 sm:$0xff]   ;;  %v11051_v17 = vld [vmem:[%s11755_s1 + $0x44] ss:$16 sps:$4 sm:$0xff]  }
 0x632   : > { %5028 = vmatpush1.bf16.msra.mxu0 %v10793_v50  ;;  %5114 = vmatpush1.bf16.msra.mxu1 %v12114_v21  ;;  %v11056_v50 = vld [vmem:[%s11755_s1 + $0x4c] ss:$16 sps:$4 sm:$0xff]   ;;  %v11309_v21 = vld [vmem:[%s11755_s1 + $0x188] ss:$16 sps:$4 sm:$0xff]  }
 0x633   : > { %5029 = vmatprep.subr.bf16.mxu0 %v12115_v27  ;;  %5115 = vmatprep.subr.bf16.mxu1 %v12116_v11  ;;  %12138 = vst [vmem:[#allocation21_spill] sm:$0xff] %v11309_v21  ;;  %v11314_v27 = vld [vmem:[%s11755_s1 + $0x1a4] ss:$16 sps:$4 sm:$0xff]   ;;  %v11320_v11 = vld [vmem:[%s11755_s1 + $0x1ac] ss:$16 sps:$4 sm:$0xff]  }
 0x634   : > { %12139 = vst [vmem:[#allocation22_spill] sm:$0xff] %v11314_v27  ;;  %12140 = vst [vmem:[#allocation23_spill] sm:$0xff] %v11320_v11 }
 0x636   : > { %5030 = vmatpush1.bf16.msra.mxu0 %v12117_v47  ;;  %5116 = vmatpush1.bf16.msra.mxu1 %v12118_v24  ;;  %v11326_v47 = vld [vmem:[%s11755_s1 + $0x1a0] ss:$16 sps:$4 sm:$0xff]   ;;  %v11333_v24 = vld [vmem:[%s11755_s1 + $0x1a8] ss:$16 sps:$4 sm:$0xff]  }
 0x637   : > { %5031 = vmatprep.subr.bf16.mxu0 %v12119_v46  ;;  %5117 = vmatprep.subr.bf16.mxu1 %v12120_v25  ;;  %12141 = vst [vmem:[#allocation24_spill] sm:$0xff] %v11326_v47  ;;  %12142 = vst [vmem:[#allocation25_spill] sm:$0xff] %v11333_v24  ;;  %v11338_v46 = vld [vmem:[%s11755_s1 + $0x1c4] ss:$16 sps:$4 sm:$0xff]   ;;  %v11344_v25 = vld [vmem:[%s11755_s1 + $0x1cc] ss:$16 sps:$4 sm:$0xff]  }
 0x638   : > { %12143 = vst [vmem:[#allocation26_spill] sm:$0xff] %v11338_v46  ;;  %12144 = vst [vmem:[#allocation27_spill] sm:$0xff] %v11344_v25 }
 0x63a   : > { %5032 = vmatpush1.bf16.msra.mxu0 %v10841_v10  ;;  %5118 = vmatpush1.bf16.msra.mxu1 %v10846_v49  ;;  %v11068_v10 = vld [vmem:[%s11755_s1 + $0x48] ss:$16 sps:$4 sm:$0xff]   ;;  %v11077_v49 = vld [vmem:[%s11755_s1 + $0x64] ss:$16 sps:$4 sm:$0xff]  }
 0x63b   : > { %5033 = vmatprep.subr.bf16.mxu0 %v10853_v32  ;;  %5119 = vmatprep.subr.bf16.mxu1 %v10858_v63  ;;  %v11082_v32 = vld [vmem:[%s11755_s1 + $0x6c] ss:$16 sps:$4 sm:$0xff]   ;;  %v11087_v63 = vld [vmem:[%s11755_s1 + $0x60] ss:$16 sps:$4 sm:$0xff]  }
 0x63e   : > { %5034 = vmatpush1.bf16.msra.mxu0 %v10865_v12  ;;  %5120 = vmatpush1.bf16.msra.mxu1 %v10870_v13  ;;  %v11063_v13 = vld [vmem:[%s11755_s1 + $0x40] ss:$16 sps:$4 sm:$0xff]   ;;  %v11092_v12 = vld [vmem:[%s11755_s1 + $0x68] ss:$16 sps:$4 sm:$0xff]  }
 0x63f   : > { %5812 = vmatprep.subr.bf16.mxu0 %v11003_v26  ;;  %5898 = vmatprep.subr.bf16.mxu1 %v11008_v43 }
 0x641   : > { %5052 = vmatmul.mubr.bf16.vlgmr.msra.gmra.mrb[20].mxu0 %v4390_v5  ;;  %5138 = vmatmul.mubr.bf16.vlgmr.msra.gmra.mrb[20].mxu1 %v4390_v5  ;;  %v11302_v5 = vld [vmem:[%s11755_s1 + $0x180] ss:$16 sps:$4 sm:$0xff]  }
 0x642   : > { %5813 = vmatpush1.bf16.msra.mxu0 %v11015_v20  ;;  %5899 = vmatpush1.bf16.msra.mxu1 %v11020_v4  ;;  %12137 = vst [vmem:[#allocation20_spill] sm:$0xff] %v11302_v5 }
 0x643   : > { %5814 = vmatprep.subr.bf16.mxu0 %v11027_v23  ;;  %5900 = vmatprep.subr.bf16.mxu1 %v11032_v18 }
 0x646   : > { %5815 = vmatpush1.bf16.msra.mxu0 %v11039_v16  ;;  %5901 = vmatpush1.bf16.msra.mxu1 %v11044_v15 }
 0x647   : > { %5816 = vmatprep.subr.bf16.mxu0 %v11051_v17  ;;  %5902 = vmatprep.subr.bf16.mxu1 %v11056_v50 }
 0x64a   : > { %5817 = vmatpush1.bf16.msra.mxu0 %v11063_v13  ;;  %5903 = vmatpush1.bf16.msra.mxu1 %v11068_v10 }
 0x64b   : > { %5818 = vmatprep.subr.bf16.mxu0 %v11077_v49  ;;  %5904 = vmatprep.subr.bf16.mxu1 %v11082_v32 }
 0x64e   : > { %5819 = vmatpush1.bf16.msra.mxu0 %v11087_v63  ;;  %5905 = vmatpush1.bf16.msra.mxu1 %v11092_v12 }
 0x64f   : > { %5820 = vmatprep.subr.bf16.mxu0 %v11101_v6  ;;  %5906 = vmatprep.subr.bf16.mxu1 %v11116_v1 }
 0x652   : > { %5821 = vmatpush1.bf16.msra.mxu0 %v11106_v7  ;;  %5907 = vmatpush1.bf16.msra.mxu1 %v11111_v8 }
 0x653   : > { %5822 = vmatprep.subr.bf16.mxu0 %v11125_v48  ;;  %5908 = vmatprep.subr.bf16.mxu1 %v11130_v44 }
 0x656   : > { %5823 = vmatpush1.bf16.msra.mxu0 %v11135_v41  ;;  %5909 = vmatpush1.bf16.msra.mxu1 %v11140_v9 }
 0x657   : > { %5824 = vmatprep.subr.bf16.mxu0 %v11149_v45  ;;  %5910 = vmatprep.subr.bf16.mxu1 %v11154_v40 }
 0x65a   : > { %5825 = vmatpush1.bf16.msra.mxu0 %v11159_v37  ;;  %5911 = vmatpush1.bf16.msra.mxu1 %v11164_v36 }
 0x65b   : > { %5826 = vmatprep.subr.bf16.mxu0 %v11173_v38  ;;  %5912 = vmatprep.subr.bf16.mxu1 %v11178_v35 }
 0x65e   : > { %5827 = vmatpush1.bf16.msra.mxu0 %v11183_v14  ;;  %5913 = vmatpush1.bf16.msra.mxu1 %v11188_v51 }
 0x65f   : > { %5828 = vmatprep.subr.bf16.mxu0 %v11197_v52  ;;  %5914 = vmatprep.subr.bf16.mxu1 %v11202_v0 }
 0x662   : > { %5829 = vmatpush1.bf16.msra.mxu0 %v11207_v29  ;;  %5915 = vmatpush1.bf16.msra.mxu1 %v11212_v30 }
 0x663   : > { %5830 = vmatprep.subr.bf16.mxu0 %v11221_v31  ;;  %5916 = vmatprep.subr.bf16.mxu1 %v11226_v42  ;;  %v7538_v31 = vld [vmem:[%s9460_s7 + $0x178] sm:$0xff] }
 0x666   : > { %5831 = vmatpush1.bf16.msra.mxu0 %v11231_v55  ;;  %5917 = vmatpush1.bf16.msra.mxu1 %v11236_v3  ;;  %v7534_v3 = vld [vmem:[%s9460_s7 + $0x158] sm:$0xff] }
 0x667   : > { %5832 = vmatprep.subr.bf16.mxu0 %v11245_v59  ;;  %5918 = vmatprep.subr.bf16.mxu1 %v11250_v60 }
 0x66a   : > { %5833 = vmatpush1.bf16.msra.mxu0 %v11255_v61  ;;  %5919 = vmatpush1.bf16.msra.mxu1 %v11260_v56 }
 0x66b   : > { %5834 = vmatprep.subr.bf16.mxu0 %v11269_v62  ;;  %5920 = vmatprep.subr.bf16.mxu1 %v11274_v22 }
 0x66e   : > { %5835 = vmatpush1.bf16.msra.mxu0 %v11279_v54  ;;  %5921 = vmatpush1.bf16.msra.mxu1 %v11284_v57  ;;  %v7536_v54 = vld [vmem:[%s9460_s7 + $0x168] sm:$0xff] }
 0x66f   : > { %5836 = vmatprep.subr.bf16.mxu0 %v11291_v58  ;;  %5922 = vmatprep.subr.bf16.mxu1 %v11296_v2  ;;  %v7535_v2 = vld [vmem:[%s9460_s7 + $0x160] sm:$0xff] }
 0x672   : > { %5837 = vmatpush1.bf16.msra.mxu0 %v11302_v5  ;;  %5923 = vmatpush1.bf16.msra.mxu1 %v11309_v21  ;;  %v11362_v21 = vld [vmem:[%s11755_s1 + $0x1e4] ss:$16 sps:$4 sm:$0xff]  }
 0x673   : > { %5838 = vmatprep.subr.bf16.mxu0 %v11314_v27  ;;  %5924 = vmatprep.subr.bf16.mxu1 %v11320_v11  ;;  %v11350_v27 = vld [vmem:[%s11755_s1 + $0x1c0] ss:$16 sps:$4 sm:$0xff]   ;;  %v11357_v11 = vld [vmem:[%s11755_s1 + $0x1c8] ss:$16 sps:$4 sm:$0xff]   ;;  %12147 = vst [vmem:[#allocation30_spill] sm:$0xff] %v11362_v21 }
 0x674   : > { %12145 = vst [vmem:[#allocation28_spill] sm:$0xff] %v11350_v27  ;;  %12146 = vst [vmem:[#allocation29_spill] sm:$0xff] %v11357_v11 }
 0x676   : > { %5839 = vmatpush1.bf16.msra.mxu0 %v11326_v47  ;;  %5925 = vmatpush1.bf16.msra.mxu1 %v11333_v24  ;;  %v11368_v24 = vld [vmem:[%s11755_s1 + $0x1ec] ss:$16 sps:$4 sm:$0xff]  }
 0x677   : > { %5840 = vmatprep.subr.bf16.mxu0 %v11338_v46  ;;  %5926 = vmatprep.subr.bf16.mxu1 %v11344_v25  ;;  %12148 = vst [vmem:[#allocation31_spill] sm:$0xff] %v11368_v24  ;;  %v11374_v46 = vld [vmem:[%s11755_s1 + $0x1e0] ss:$16 sps:$4 sm:$0xff]   ;;  %v11381_v25 = vld [vmem:[%s11755_s1 + $0x1e8] ss:$16 sps:$4 sm:$0xff]  }
 0x678   : > { %12149 = vst [vmem:[#allocation32_spill] sm:$0xff] %v11374_v46  ;;  %12150 = vst [vmem:[#allocation33_spill] sm:$0xff] %v11381_v25 }
 0x67a   : > { %5841 = vmatpush1.bf16.msra.mxu0 %v11350_v27  ;;  %5927 = vmatpush1.bf16.msra.mxu1 %v11357_v11  ;;  %v11387_v27 = vld [vmem:[%s11755_s1 + $0x204] ss:$16 sps:$4 sm:$0xff]   ;;  %v11393_v11 = vld [vmem:[%s11755_s1 + $0x20c] ss:$16 sps:$4 sm:$0xff]  }
 0x67b   : > { %5842 = vmatprep.subr.bf16.mxu0 %v11362_v21  ;;  %5928 = vmatprep.subr.bf16.mxu1 %v11368_v24  ;;  %12151 = vst [vmem:[#allocation34_spill] sm:$0xff] %v11387_v27  ;;  %12152 = vst [vmem:[#allocation35_spill] sm:$0xff] %v11393_v11  ;;  %v7531_v21 = vld [vmem:[%s9460_s7 + $0x140] sm:$0xff]  ;;  %v7532_v24 = vld [vmem:[%s9460_s7 + $0x148] sm:$0xff] }
 0x67e   : > { %5843 = vmatpush1.bf16.msra.mxu0 %v11374_v46  ;;  %5929 = vmatpush1.bf16.msra.mxu1 %v11381_v25 }
 0x67f   : > { %5855 = vmatprep.subr.bf16.mxu0 %v11387_v27  ;;  %5941 = vmatprep.subr.bf16.mxu1 %v11393_v11 }
 0x714   : > { %v5053_v47 = vpop.f32.mrb[20].mxu0  ;;  %v5139_v5 = vpop.f32.mrb[20].mxu1 }
 0x715   : > { %v5148_v58 = vadd.f32 %v7531_v21, %v5053_v47  ;;  %v5055_v57 = vpop.f32.mrb[21].mxu0  ;;  %v5141_v46 = vpop.f32.mrb[21].mxu1  ;;  %v7533_v47 = vld [vmem:[%s9460_s7 + $0x150] sm:$0xff] }
 0x716   : > { %v5149_v22 = vadd.f32 %v7532_v24, %v5055_v57  ;;  %v5057_v62 = vpop.f32.mrb[22].mxu0  ;;  %v5143_v56 = vpop.f32.mrb[22].mxu1  ;;  %v5151_v42 = vadd.f32 %v7534_v3, %v5141_v46  ;;  %v7537_v57 = vld [vmem:[%s9460_s7 + $0x170] sm:$0xff]  ;;  %v5150_v24 = vadd.f32 %v7533_v47, %v5139_v5 }
 0x717   : > { %v7637_v25 = vmul.f32 -1.442695, %v5148_v58  ;;  %v5152_v27 = vadd.f32 %v7535_v2, %v5057_v62  ;;  %v5059_v61 = vpop.f32.mrb[23].mxu0  ;;  %v5145_v11 = vpop.f32.mrb[23].mxu1  ;;  %v5154_v58 = vadd.f32 %v7537_v57, %v5143_v56 }
 0x718   : > { %v7635_v60 = vmul.f32 -1.442695, %v5149_v22  ;;  %v5153_v59 = vadd.f32 %v7536_v54, %v5059_v61  ;;  %v7639_v30 = vmul.f32 -1.442695, %v5151_v42  ;;  %v5155_v29 = vadd.f32 %v7538_v31, %v5145_v11 }
 0x719   : > { %8677 = vpow2.f32 %v7637_v25  ;;  %v7638_v55 = vmul.f32 -1.442695, %v5152_v27 }
 0x71a   : > { %8679 = vpow2.f32 %v7635_v60  ;;  %v7636_v21 = vmul.f32 -1.442695, %v5153_v59  ;;  %v7640_v61 = vmul.f32 -1.442695, %v5155_v29 }
 0x71b   : > { %8681 = vpow2.f32 %v7638_v55 }
 0x71c   : > { %8683 = vpow2.f32 %v7636_v21 }
 0x71d   : > { %8685 = vtanh.f32 %v5150_v24 }
 0x71e   : > { %8687 = vpow2.f32 %v7639_v30 }
 0x71f   : > { %8689 = vtanh.f32 %v5154_v58 }
 0x723   : > { %v8678_v62 = vpop.eup %8677 }
 0x724   : > { %v8680_v2 = vpop.eup %8679  ;;  %v5178_v22 = vadd.f32 1.0, %v8678_v62 }
 0x725   : > { %v5164_v54 = vadd.f32 1.0, %v8680_v2  ;;  %v8682_v60 = vpop.eup %8681 }
 0x726   : > { %8691 = vrcp.f32 %v5178_v22  ;;  %v5179_v3 = vadd.f32 1.0, %v8682_v60  ;;  %v8684_v55 = vpop.eup %8683 }
 0x727   : > { %8693 = vrcp.f32 %v5164_v54  ;;  %v5165_v59 = vadd.f32 1.0, %v8684_v55  ;;  %v8686_v42 = vpop.eup %8685 }
 0x728   : > { %8695 = vpow2.f32 %v7640_v61  ;;  %v8688_v31 = vpop.eup %8687 }
 0x729   : > { %8697 = vrcp.f32 %v5179_v3  ;;  %v8690_v56 = vpop.eup %8689  ;;  %v5196_v46 = vadd.f32 1.0, %v8688_v31 }
 0x72a   : > { %8699 = vrcp.f32 %v5165_v59 }
 0x72b   : > { %8701 = vrcp.f32 %v5196_v46 }
 0x730   : > { %v8692_v5 = vpop.eup %8691 }
 0x731   : > { %v8694_v27 = vpop.eup %8693  ;;  %v5186_v11 = vmul.f32 %v8692_v5, %v8686_v42  ;;  %v11425_v5 = vld [vmem:[%s11755_s1 + $0x208] ss:$16 sps:$4 sm:$0xff]  }
 0x732   : > { %v8696_v30 = vpop.eup %8695  ;;  %v5170_v29 = vmul.f32 %v8694_v27, %v10953_v34 }
 0x733   : > { %v8698_v25 = vpop.eup %8697  ;;  %v5197_v24 = vadd.f32 1.0, %v8696_v30 }
 0x734   : > { %v11407_v21 = vadd.f32 %v5186_v11, %v5170_v29  ;;  %v5187_v47 = vmul.f32 %v8698_v25, %v8690_v56  ;;  %v8700_v57 = vpop.eup %8699  ;;  %v11420_v56 = vld [vmem:[%s11755_s1 + $0x200] ss:$16 sps:$4 sm:$0xff]   ;;  %v11437_v29 = vld [vmem:[%s11755_s1 + $0x224] ss:$16 sps:$4 sm:$0xff]   ;;  %v11442_v25 = vld [vmem:[%s11755_s1 + $0x22c] ss:$16 sps:$4 sm:$0xff]  }
 0x735   : > { %v5171_v58 = vmul.f32 %v8700_v57, %v10957_v33  ;;  %v8702_v2 = vpop.eup %8701  ;;  %v11451_v57 = vld [vmem:[%s11755_s1 + $0x220] ss:$16 sps:$4 sm:$0xff]  }
 0x736   : > { %8703 = vtanh.f32 %v11407_v21 }
 0x737   : > { %v11411_v62 = vadd.f32 %v5187_v47, %v5171_v58  ;;  %8705 = vrcp.f32 %v5197_v24  ;;  %v11456_v24 = vld [vmem:[%s11755_s1 + $0x228] ss:$16 sps:$4 sm:$0xff]   ;;  %v11463_v58 = vld [vmem:[%s11755_s1 + $0x244] ss:$16 sps:$4 sm:$0xff]  }
 0x739   : > { %8707 = vtanh.f32 %v11411_v62 }
 0x740   : > { %v8704_v22 = vpop.eup %8703 }
 0x741   : > { %v5204_v61 = vmul.f32 %v8704_v22, %v8702_v2  ;;  %v8706_v34 = vpop.eup %8705  ;;  %v11468_v2 = vld [vmem:[%s11755_s1 + $0x24c] ss:$16 sps:$4 sm:$0xff]   ;;  %v11477_v22 = vld [vmem:[%s11755_s1 + $0x240] ss:$16 sps:$4 sm:$0xff]  }
 0x743   : > { %v8708_v54 = vpop.eup %8707  ;;  %v5215_v60 = vrot.slane %v5204_v61, 7  ;;  %v5219_v42 = vrot.slane %v5204_v61, 1 }
 0x744   : > { %v5205_v3 = vmul.f32 %v8708_v54, %v8706_v34  ;;  %v11489_v34 = vld [vmem:[%s11755_s1 + $0x264] ss:$16 sps:$4 sm:$0xff]   ;;  %v11494_v54 = vld [vmem:[%s11755_s1 + $0x26c] ss:$16 sps:$4 sm:$0xff]  }
 0x745   : > { %v5218_v33 = vsel %vm200_vm0, %v11950_v28, %v5215_v60 }
 0x746   : > { %v5225_v55 = vpack.c.bf16 %v5205_v3, %v5204_v61  ;;  %v5216_v59 = vrot.slane %v5205_v3, 7  ;;  %v5220_v31 = vrot.slane %v5205_v3, 1  ;;  %v11482_v61 = vld [vmem:[%s11755_s1 + $0x248] ss:$16 sps:$4 sm:$0xff]  }
 0x747   : > { %v11506_v3 = vld [vmem:[%s11755_s1 + $0x268] ss:$16 sps:$4 sm:$0xff]  }
 0x748   : > { %5844 = vmatprep.mubr.bf16.mxu0 %v5225_v55  ;;  %5930 = vmatprep.mubr.bf16.mxu1 %v5225_v55  ;;  %v5217_v27 = vsel %vm200_vm0, %v5215_v60, %v5216_v59  ;;  %v5222_v11 = vsel %vm206_vm1, %v5220_v31, %v9374_v53  ;;  %v5223_v46 = vsel %vm206_vm1, %v5219_v42, %v5220_v31  ;;  %v11501_v60 = vld [vmem:[%s11755_s1 + $0x260] ss:$16 sps:$4 sm:$0xff]   ;;  %v11513_v55 = vld [vmem:[%s11755_s1 + $0x284] ss:$16 sps:$4 sm:$0xff]   ;;  %v11518_v59 = vld [vmem:[%s11755_s1 + $0x28c] ss:$16 sps:$4 sm:$0xff]  }
 0x749   : > { %v5224_v30 = vpack.c.bf16 %v5217_v27, %v5218_v33  ;;  %v11444_v47 = vpack.c.bf16 %v5222_v11, %v5223_v46  ;;  %v11525_v42 = vld [vmem:[%s11755_s1 + $0x280] ss:$16 sps:$4 sm:$0xff]   ;;  %v11530_v31 = vld [vmem:[%s11755_s1 + $0x288] ss:$16 sps:$4 sm:$0xff]   ;;  %v11537_v33 = vld [vmem:[%s11755_s1 + $0x2a4] ss:$16 sps:$4 sm:$0xff]  }
 0x74a   : > { %12153 = vst [vmem:[#allocation36_spill] sm:$0xff] %v11530_v31  ;;  %12154 = vst [vmem:[#allocation37_spill] sm:$0xff] %v11537_v33  ;;  %v11542_v27 = vld [vmem:[%s11755_s1 + $0x2ac] ss:$16 sps:$4 sm:$0xff]   ;;  %v11549_v11 = vld [vmem:[%s11755_s1 + $0x2a0] ss:$16 sps:$4 sm:$0xff]  }
 0x74b   : > { %5845 = vmatmul.mubr.bf16.vlgmr.msra.gmra.mrb[24].mxu0 %v5224_v30  ;;  %5931 = vmatmul.mubr.bf16.vlgmr.msra.gmra.mrb[24].mxu1 %v5224_v30  ;;  %12155 = vst [vmem:[#allocation38_spill] sm:$0xff] %v11542_v27  ;;  %12156 = vst [vmem:[#allocation39_spill] sm:$0xff] %v11549_v11  ;;  %v11554_v46 = vld [vmem:[%s11755_s1 + $0x2a8] ss:$16 sps:$4 sm:$0xff]   ;;  %v11561_v30 = vld [vmem:[%s11755_s1 + $0x2c4] ss:$16 sps:$4 sm:$0xff]  }
 0x74c   : > { %5856 = vmatpush1.bf16.msra.mxu0 %v11420_v56  ;;  %5942 = vmatpush1.bf16.msra.mxu1 %v11425_v5  ;;  %12157 = vst [vmem:[#allocation40_spill] sm:$0xff] %v11554_v46  ;;  %12158 = vst [vmem:[#allocation41_spill] sm:$0xff] %v11561_v30 }
 0x74d   : > { %5857 = vmatprep.subr.bf16.mxu0 %v11437_v29  ;;  %5943 = vmatprep.subr.bf16.mxu1 %v11442_v25 }
 0x74e   : > { %5887 = vmatprep.mubr.bf16.mxu0 %v11951_v39  ;;  %5973 = vmatprep.mubr.bf16.mxu1 %v11951_v39 }
 0x750   : > { %5858 = vmatpush1.bf16.msra.mxu0 %v11451_v57  ;;  %5944 = vmatpush1.bf16.msra.mxu1 %v11456_v24 }
 0x751   : > { %5859 = vmatprep.subr.bf16.mxu0 %v11463_v58  ;;  %5945 = vmatprep.subr.bf16.mxu1 %v11468_v2  ;;  %v12193_v19 = vld [vmem:[#allocation37_spill] sm:$0xff] }
 0x754   : > { %5860 = vmatpush1.bf16.msra.mxu0 %v11477_v22  ;;  %5946 = vmatpush1.bf16.msra.mxu1 %v11482_v61 }
 0x755   : > { %5861 = vmatprep.subr.bf16.mxu0 %v11489_v34  ;;  %5947 = vmatprep.subr.bf16.mxu1 %v11494_v54 }
 0x758   : > { %5862 = vmatpush1.bf16.msra.mxu0 %v11501_v60  ;;  %5948 = vmatpush1.bf16.msra.mxu1 %v11506_v3 }
 0x759   : > { %5863 = vmatprep.subr.bf16.mxu0 %v11513_v55  ;;  %5949 = vmatprep.subr.bf16.mxu1 %v11518_v59 }
 0x75c   : > { %5864 = vmatpush1.bf16.msra.mxu0 %v11525_v42  ;;  %5950 = vmatpush1.bf16.msra.mxu1 %v11530_v31  ;;  %v11566_v31 = vld [vmem:[%s11755_s1 + $0x2cc] ss:$16 sps:$4 sm:$0xff]  }
 0x75d   : > { %5865 = vmatprep.subr.bf16.mxu0 %v11537_v33  ;;  %5951 = vmatprep.subr.bf16.mxu1 %v11542_v27  ;;  %12159 = vst [vmem:[#allocation42_spill] sm:$0xff] %v11566_v31  ;;  %v11573_v33 = vld [vmem:[%s11755_s1 + $0x2c0] ss:$16 sps:$4 sm:$0xff]   ;;  %v11578_v27 = vld [vmem:[%s11755_s1 + $0x2c8] ss:$16 sps:$4 sm:$0xff]  }
 0x760   : > { %5866 = vmatpush1.bf16.msra.mxu0 %v11549_v11  ;;  %5952 = vmatpush1.bf16.msra.mxu1 %v11554_v46  ;;  %v11585_v11 = vld [vmem:[%s11755_s1 + $0x2e4] ss:$16 sps:$4 sm:$0xff]   ;;  %v11590_v46 = vld [vmem:[%s11755_s1 + $0x2ec] ss:$16 sps:$4 sm:$0xff]  }
 0x761   : > { %5867 = vmatprep.subr.bf16.mxu0 %v11561_v30  ;;  %5953 = vmatprep.subr.bf16.mxu1 %v11566_v31  ;;  %v11597_v30 = vld [vmem:[%s11755_s1 + $0x2e0] ss:$16 sps:$4 sm:$0xff]   ;;  %v11602_v31 = vld [vmem:[%s11755_s1 + $0x2e8] ss:$16 sps:$4 sm:$0xff]  }
 0x764   : > { %5868 = vmatpush1.bf16.msra.mxu0 %v11573_v33  ;;  %5954 = vmatpush1.bf16.msra.mxu1 %v11578_v27 }
 0x765   : > { %5869 = vmatprep.subr.bf16.mxu0 %v11585_v11  ;;  %5955 = vmatprep.subr.bf16.mxu1 %v11590_v46 }
 0x768   : > { %5870 = vmatpush1.bf16.msra.mxu0 %v11597_v30  ;;  %5956 = vmatpush1.bf16.msra.mxu1 %v11602_v31 }
 0x769   : > { %6648 = vmatprep.subr.bf16.mxu0 %v11003_v26  ;;  %6734 = vmatprep.subr.bf16.mxu1 %v11008_v43  ;;  %v12160_v26 = vld [vmem:[#allocation4_spill] sm:$0xff]  ;;  %v12161_v43 = vld [vmem:[#allocation5_spill] sm:$0xff] }
 0x76b   : > { %5888 = vmatmul.mubr.bf16.vlgmr.msra.gmra.mrb[24].mxu0 %v11444_v47  ;;  %5974 = vmatmul.mubr.bf16.vlgmr.msra.gmra.mrb[24].mxu1 %v11444_v47 }
 0x76c   : > { %6649 = vmatpush1.bf16.msra.mxu0 %v11015_v20  ;;  %6735 = vmatpush1.bf16.msra.mxu1 %v11020_v4  ;;  %v12162_v20 = vld [vmem:[#allocation6_spill] sm:$0xff]  ;;  %v12163_v4 = vld [vmem:[#allocation7_spill] sm:$0xff] }
 0x76d   : > { %6650 = vmatprep.subr.bf16.mxu0 %v11027_v23  ;;  %6736 = vmatprep.subr.bf16.mxu1 %v11032_v18  ;;  %v12164_v23 = vld [vmem:[#allocation8_spill] sm:$0xff]  ;;  %v12165_v18 = vld [vmem:[#allocation9_spill] sm:$0xff] }
 0x770   : > { %6651 = vmatpush1.bf16.msra.mxu0 %v11039_v16  ;;  %6737 = vmatpush1.bf16.msra.mxu1 %v11044_v15  ;;  %v12166_v16 = vld [vmem:[#allocation10_spill] sm:$0xff]  ;;  %v12167_v15 = vld [vmem:[#allocation11_spill] sm:$0xff] }
 0x771   : > { %6652 = vmatprep.subr.bf16.mxu0 %v11051_v17  ;;  %6738 = vmatprep.subr.bf16.mxu1 %v11056_v50  ;;  %v12168_v17 = vld [vmem:[#allocation12_spill] sm:$0xff]  ;;  %v12169_v50 = vld [vmem:[#allocation13_spill] sm:$0xff] }
 0x774   : > { %6653 = vmatpush1.bf16.msra.mxu0 %v11063_v13  ;;  %6739 = vmatpush1.bf16.msra.mxu1 %v11068_v10  ;;  %v12170_v13 = vld [vmem:[#allocation14_spill] sm:$0xff]  ;;  %v12171_v10 = vld [vmem:[#allocation15_spill] sm:$0xff] }
 0x775   : > { %6654 = vmatprep.subr.bf16.mxu0 %v11077_v49  ;;  %6740 = vmatprep.subr.bf16.mxu1 %v11082_v32  ;;  %v12172_v49 = vld [vmem:[#allocation17_spill] sm:$0xff]  ;;  %v12173_v32 = vld [vmem:[#allocation18_spill] sm:$0xff] }
 0x778   : > { %6655 = vmatpush1.bf16.msra.mxu0 %v11087_v63  ;;  %6741 = vmatpush1.bf16.msra.mxu1 %v11092_v12  ;;  %v12174_v63 = vld [vmem:[#allocation16_spill] sm:$0xff]  ;;  %v12175_v12 = vld [vmem:[#allocation19_spill] sm:$0xff] }
 0x779   : > { %6656 = vmatprep.subr.bf16.mxu0 %v11101_v6  ;;  %6742 = vmatprep.subr.bf16.mxu1 %v11116_v1  ;;  %v12176_v6 = vld [vmem:[#allocation20_spill] sm:$0xff]  ;;  %v12179_v1 = vld [vmem:[#allocation23_spill] sm:$0xff] }
 0x77c   : > { %6657 = vmatpush1.bf16.msra.mxu0 %v11106_v7  ;;  %6743 = vmatpush1.bf16.msra.mxu1 %v11111_v8  ;;  %v12177_v7 = vld [vmem:[#allocation21_spill] sm:$0xff]  ;;  %v12178_v8 = vld [vmem:[#allocation22_spill] sm:$0xff] }
 0x77d   : > { %6658 = vmatprep.subr.bf16.mxu0 %v11125_v48  ;;  %6744 = vmatprep.subr.bf16.mxu1 %v11130_v44  ;;  %v12180_v48 = vld [vmem:[#allocation24_spill] sm:$0xff]  ;;  %v12181_v44 = vld [vmem:[#allocation25_spill] sm:$0xff] }
 0x780   : > { %6659 = vmatpush1.bf16.msra.mxu0 %v11135_v41  ;;  %6745 = vmatpush1.bf16.msra.mxu1 %v11140_v9  ;;  %v12182_v41 = vld [vmem:[#allocation26_spill] sm:$0xff]  ;;  %v12183_v9 = vld [vmem:[#allocation27_spill] sm:$0xff] }
 0x781   : > { %6660 = vmatprep.subr.bf16.mxu0 %v11149_v45  ;;  %6746 = vmatprep.subr.bf16.mxu1 %v11154_v40  ;;  %v12184_v45 = vld [vmem:[#allocation28_spill] sm:$0xff]  ;;  %v12185_v40 = vld [vmem:[#allocation29_spill] sm:$0xff] }
 0x784   : > { %6661 = vmatpush1.bf16.msra.mxu0 %v11159_v37  ;;  %6747 = vmatpush1.bf16.msra.mxu1 %v11164_v36  ;;  %v12186_v37 = vld [vmem:[#allocation30_spill] sm:$0xff]  ;;  %v12187_v36 = vld [vmem:[#allocation31_spill] sm:$0xff] }
 0x785   : > { %6662 = vmatprep.subr.bf16.mxu0 %v11173_v38  ;;  %6748 = vmatprep.subr.bf16.mxu1 %v11178_v35  ;;  %v12188_v38 = vld [vmem:[#allocation32_spill] sm:$0xff]  ;;  %v12189_v35 = vld [vmem:[#allocation33_spill] sm:$0xff] }
 0x788   : > { %6663 = vmatpush1.bf16.msra.mxu0 %v11183_v14  ;;  %6749 = vmatpush1.bf16.msra.mxu1 %v11188_v51  ;;  %v12190_v14 = vld [vmem:[#allocation34_spill] sm:$0xff]  ;;  %v12191_v51 = vld [vmem:[#allocation35_spill] sm:$0xff] }
 0x789   : > { %6664 = vmatprep.subr.bf16.mxu0 %v11197_v52  ;;  %6750 = vmatprep.subr.bf16.mxu1 %v11202_v0  ;;  %v7641_v52 = vld [vmem:[%s9460_s7 + $0x180] sm:$0xff]  ;;  %v7642_v0 = vld [vmem:[%s9460_s7 + $0x188] sm:$0xff] }
 0x78c   : > { %6665 = vmatpush1.bf16.msra.mxu0 %v12160_v26  ;;  %6751 = vmatpush1.bf16.msra.mxu1 %v12161_v43  ;;  %v7645_v43 = vld [vmem:[%s9460_s7 + $0x1a0] sm:$0xff] }
 0x78d   : > { %6666 = vmatprep.subr.bf16.mxu0 %v12162_v20  ;;  %6752 = vmatprep.subr.bf16.mxu1 %v12163_v4 }
 0x790   : > { %6667 = vmatpush1.bf16.msra.mxu0 %v12164_v23  ;;  %6753 = vmatpush1.bf16.msra.mxu1 %v12165_v18  ;;  %v7646_v18 = vld [vmem:[%s9460_s7 + $0x1a8] sm:$0xff] }
 0x791   : > { %6668 = vmatprep.subr.bf16.mxu0 %v12166_v16  ;;  %6754 = vmatprep.subr.bf16.mxu1 %v12167_v15 }
 0x794   : > { %6669 = vmatpush1.bf16.msra.mxu0 %v12168_v17  ;;  %6755 = vmatpush1.bf16.msra.mxu1 %v12169_v50 }
 0x795   : > { %6670 = vmatprep.subr.bf16.mxu0 %v12170_v13  ;;  %6756 = vmatprep.subr.bf16.mxu1 %v12171_v10 }
 0x798   : > { %6671 = vmatpush1.bf16.msra.mxu0 %v12172_v49  ;;  %6757 = vmatpush1.bf16.msra.mxu1 %v12173_v32 }
 0x799   : > { %6672 = vmatprep.subr.bf16.mxu0 %v12174_v63  ;;  %6758 = vmatprep.subr.bf16.mxu1 %v12175_v12  ;;  %v7644_v12 = vld [vmem:[%s9460_s7 + $0x198] sm:$0xff] }
 0x79c   : > { %6673 = vmatpush1.bf16.msra.mxu0 %v12176_v6  ;;  %6759 = vmatpush1.bf16.msra.mxu1 %v12177_v7 }
 0x79d   : > { %6674 = vmatprep.subr.bf16.mxu0 %v12178_v8  ;;  %6760 = vmatprep.subr.bf16.mxu1 %v12179_v1  ;;  %v7643_v8 = vld [vmem:[%s9460_s7 + $0x190] sm:$0xff] }
 0x7a0   : > { %6675 = vmatpush1.bf16.msra.mxu0 %v12180_v48  ;;  %6761 = vmatpush1.bf16.msra.mxu1 %v12181_v44  ;;  %v7648_v48 = vld [vmem:[%s9460_s7 + $0x1b8] sm:$0xff]  ;;  %v7647_v44 = vld [vmem:[%s9460_s7 + $0x1b0] sm:$0xff] }
 0x7a1   : > { %6676 = vmatprep.subr.bf16.mxu0 %v12182_v41  ;;  %6762 = vmatprep.subr.bf16.mxu1 %v12183_v9 }
 0x7a4   : > { %6677 = vmatpush1.bf16.msra.mxu0 %v12184_v45  ;;  %6763 = vmatpush1.bf16.msra.mxu1 %v12185_v40 }
 0x7a5   : > { %6678 = vmatprep.subr.bf16.mxu0 %v12186_v37  ;;  %6764 = vmatprep.subr.bf16.mxu1 %v12187_v36 }
 0x7a8   : > { %6679 = vmatpush1.bf16.msra.mxu0 %v12188_v38  ;;  %6765 = vmatpush1.bf16.msra.mxu1 %v12189_v35 }
 0x7a9   : > { %6691 = vmatprep.subr.bf16.mxu0 %v12190_v14  ;;  %6777 = vmatprep.subr.bf16.mxu1 %v12191_v51 }
 0x83e   : > { %v5889_v47 = vpop.f32.mrb[24].mxu0  ;;  %v5975_v26 = vpop.f32.mrb[24].mxu1 }
 0x83f   : > { %v5984_v20 = vadd.f32 %v7641_v52, %v5889_v47  ;;  %v5891_v4 = vpop.f32.mrb[25].mxu0  ;;  %v5977_v23 = vpop.f32.mrb[25].mxu1  ;;  %v5986_v41 = vadd.f32 %v7643_v8, %v5975_v26 }
 0x840   : > { %v5985_v16 = vadd.f32 %v7642_v0, %v5891_v4  ;;  %v5893_v15 = vpop.f32.mrb[26].mxu0  ;;  %v5979_v17 = vpop.f32.mrb[26].mxu1  ;;  %v5987_v1 = vadd.f32 %v7644_v12, %v5977_v23 }
 0x841   : > { %v7747_v50 = vmul.f32 -1.442695, %v5984_v20  ;;  %v5988_v13 = vadd.f32 %v7645_v43, %v5893_v15  ;;  %v5895_v10 = vpop.f32.mrb[27].mxu0  ;;  %v5981_v49 = vpop.f32.mrb[27].mxu1  ;;  %v5990_v40 = vadd.f32 %v7647_v44, %v5979_v17 }
 0x842   : > { %v7745_v32 = vmul.f32 -1.442695, %v5985_v16  ;;  %v5989_v63 = vadd.f32 %v7646_v18, %v5895_v10  ;;  %v7749_v9 = vmul.f32 -1.442695, %v5987_v1  ;;  %v5991_v45 = vadd.f32 %v7648_v48, %v5981_v49 }
 0x843   : > { %8709 = vpow2.f32 %v7747_v50  ;;  %v7748_v6 = vmul.f32 -1.442695, %v5988_v13 }
 0x844   : > { %8711 = vpow2.f32 %v7745_v32  ;;  %v7746_v7 = vmul.f32 -1.442695, %v5989_v63  ;;  %v7750_v35 = vmul.f32 -1.442695, %v5991_v45 }
 0x845   : > { %8713 = vpow2.f32 %v7748_v6 }
 0x846   : > { %8715 = vpow2.f32 %v7746_v7 }
 0x847   : > { %8717 = vtanh.f32 %v5986_v41 }
 0x848   : > { %8719 = vpow2.f32 %v7749_v9 }
 0x849   : > { %8721 = vtanh.f32 %v5990_v40 }
 0x84d   : > { %v8710_v37 = vpop.eup %8709 }
 0x84e   : > { %v8712_v36 = vpop.eup %8711  ;;  %v6014_v38 = vadd.f32 1.0, %v8710_v37 }
 0x84f   : > { %v6000_v14 = vadd.f32 1.0, %v8712_v36  ;;  %v8714_v51 = vpop.eup %8713 }
 0x850   : > { %8723 = vrcp.f32 %v6014_v38  ;;  %v6015_v52 = vadd.f32 1.0, %v8714_v51  ;;  %v8716_v0 = vpop.eup %8715 }
 0x851   : > { %8725 = vrcp.f32 %v6000_v14  ;;  %v6001_v47 = vadd.f32 1.0, %v8716_v0  ;;  %v8718_v26 = vpop.eup %8717 }
 0x852   : > { %8727 = vpow2.f32 %v7750_v35  ;;  %v8720_v43 = vpop.eup %8719 }
 0x853   : > { %8729 = vrcp.f32 %v6015_v52  ;;  %v8722_v20 = vpop.eup %8721  ;;  %v6032_v16 = vadd.f32 1.0, %v8720_v43  ;;  %v7753_v52 = vld [vmem:[%s9460_s7 + $0x1d0] sm:$0xff] }
 0x854   : > { %8731 = vrcp.f32 %v6001_v47  ;;  %v7758_v47 = vld [vmem:[%s9460_s7 + $0x1f8] sm:$0xff] }
 0x855   : > { %8733 = vrcp.f32 %v6032_v16 }
 0x85a   : > { %v8724_v4 = vpop.eup %8723 }
 0x85b   : > { %v8726_v23 = vpop.eup %8725  ;;  %v6022_v18 = vmul.f32 %v8724_v4, %v8718_v26  ;;  %v7757_v26 = vld [vmem:[%s9460_s7 + $0x1f0] sm:$0xff] }
 0x85c   : > { %v8728_v15 = vpop.eup %8727  ;;  %v6006_v17 = vmul.f32 %v8726_v23, %v11407_v21 }
 0x85d   : > { %v8730_v50 = vpop.eup %8729  ;;  %v6033_v32 = vadd.f32 1.0, %v8728_v15 }
 0x85e   : > { %v11685_v13 = vadd.f32 %v6022_v18, %v6006_v17  ;;  %v6023_v10 = vmul.f32 %v8730_v50, %v8722_v20  ;;  %v8732_v49 = vpop.eup %8731 }
 0x85f   : > { %v6007_v63 = vmul.f32 %v8732_v49, %v11411_v62  ;;  %v8734_v6 = vpop.eup %8733 }
 0x860   : > { %8735 = vtanh.f32 %v11685_v13 }
 0x861   : > { %v11689_v12 = vadd.f32 %v6023_v10, %v6007_v63  ;;  %8737 = vrcp.f32 %v6033_v32 }
 0x863   : > { %8739 = vtanh.f32 %v11689_v12 }
 0x86a   : > { %v8736_v7 = vpop.eup %8735 }
 0x86b   : > { %v6040_v8 = vmul.f32 %v8736_v7, %v8734_v6  ;;  %v8738_v21 = vpop.eup %8737 }
 0x86d   : > { %v8740_v1 = vpop.eup %8739  ;;  %v6051_v48 = vrot.slane %v6040_v8, 7  ;;  %v6055_v45 = vrot.slane %v6040_v8, 1 }
 0x86e   : > { %v6041_v44 = vmul.f32 %v8740_v1, %v8738_v21 }
 0x86f   : > { %v6054_v62 = vsel %vm200_vm0, %v11950_v28, %v6051_v48  ;;  %v12194_v28 = vld [vmem:[#allocation38_spill] sm:$0xff] }
 0x870   : > { %v6061_v41 = vpack.c.bf16 %v6041_v44, %v6040_v8  ;;  %v6052_v9 = vrot.slane %v6041_v44, 7  ;;  %v6056_v40 = vrot.slane %v6041_v44, 1 }
 0x872   : > { %6680 = vmatprep.mubr.bf16.mxu0 %v6061_v41  ;;  %6766 = vmatprep.mubr.bf16.mxu1 %v6061_v41  ;;  %v6053_v37 = vsel %vm200_vm0, %v6051_v48, %v6052_v9  ;;  %v6058_v36 = vsel %vm206_vm1, %v6056_v40, %v9374_v53  ;;  %v6059_v38 = vsel %vm206_vm1, %v6055_v45, %v6056_v40  ;;  %v12192_v53 = vld [vmem:[#allocation36_spill] sm:$0xff] }
 0x873   : > { %v6060_v35 = vpack.c.bf16 %v6053_v37, %v6054_v62  ;;  %v6062_v14 = vpack.c.bf16 %v6058_v36, %v6059_v38 }
 0x875   : > { %6681 = vmatmul.mubr.bf16.vlgmr.msra.gmra.mrb[28].mxu0 %v6060_v35  ;;  %6767 = vmatmul.mubr.bf16.vlgmr.msra.gmra.mrb[28].mxu1 %v6060_v35 }
 0x876   : > { %6692 = vmatpush1.bf16.msra.mxu0 %v11420_v56  ;;  %6778 = vmatpush1.bf16.msra.mxu1 %v11425_v5  ;;  %v12196_v56 = vld [vmem:[#allocation40_spill] sm:$0xff]  ;;  %v12197_v5 = vld [vmem:[#allocation41_spill] sm:$0xff] }
 0x877   : > { %6693 = vmatprep.subr.bf16.mxu0 %v11437_v29  ;;  %6779 = vmatprep.subr.bf16.mxu1 %v11442_v25  ;;  %v12198_v29 = vld [vmem:[#allocation42_spill] sm:$0xff]  ;;  %v7751_v25 = vld [vmem:[%s9460_s7 + $0x1c0] sm:$0xff] }
 0x878   : > { %6723 = vmatprep.mubr.bf16.mxu0 %v11951_v39  ;;  %6809 = vmatprep.mubr.bf16.mxu1 %v11951_v39  ;;  %v12195_v39 = vld [vmem:[#allocation39_spill] sm:$0xff] }
 0x87a   : > { %6694 = vmatpush1.bf16.msra.mxu0 %v11451_v57  ;;  %6780 = vmatpush1.bf16.msra.mxu1 %v11456_v24  ;;  %v7752_v57 = vld [vmem:[%s9460_s7 + $0x1c8] sm:$0xff] }
 0x87b   : > { %6695 = vmatprep.subr.bf16.mxu0 %v11463_v58  ;;  %6781 = vmatprep.subr.bf16.mxu1 %v11468_v2  ;;  %v7755_v2 = vld [vmem:[%s9460_s7 + $0x1e0] sm:$0xff] }
 0x87e   : > { %6696 = vmatpush1.bf16.msra.mxu0 %v11477_v22  ;;  %6782 = vmatpush1.bf16.msra.mxu1 %v11482_v61 }
 0x87f   : > { %6697 = vmatprep.subr.bf16.mxu0 %v11489_v34  ;;  %6783 = vmatprep.subr.bf16.mxu1 %v11494_v54  ;;  %v7756_v54 = vld [vmem:[%s9460_s7 + $0x1e8] sm:$0xff] }
 0x882   : > { %6698 = vmatpush1.bf16.msra.mxu0 %v11501_v60  ;;  %6784 = vmatpush1.bf16.msra.mxu1 %v11506_v3 }
 0x883   : > { %6699 = vmatprep.subr.bf16.mxu0 %v11513_v55  ;;  %6785 = vmatprep.subr.bf16.mxu1 %v11518_v59 }
 0x886   : > { %6700 = vmatpush1.bf16.msra.mxu0 %v11525_v42  ;;  %6786 = vmatpush1.bf16.msra.mxu1 %v12192_v53 }
 0x887   : > { %6701 = vmatprep.subr.bf16.mxu0 %v12193_v19  ;;  %6787 = vmatprep.subr.bf16.mxu1 %v12194_v28 }
 0x88a   : > { %6702 = vmatpush1.bf16.msra.mxu0 %v12195_v39  ;;  %6788 = vmatpush1.bf16.msra.mxu1 %v12196_v56 }
 0x88b   : > { %6703 = vmatprep.subr.bf16.mxu0 %v12197_v5  ;;  %6789 = vmatprep.subr.bf16.mxu1 %v12198_v29 }
 0x88e   : > { %6704 = vmatpush1.bf16.msra.mxu0 %v11573_v33  ;;  %6790 = vmatpush1.bf16.msra.mxu1 %v11578_v27 }
 0x88f   : > { %6705 = vmatprep.subr.bf16.mxu0 %v11585_v11  ;;  %6791 = vmatprep.subr.bf16.mxu1 %v11590_v46  ;;  %v7754_v46 = vld [vmem:[%s9460_s7 + $0x1d8] sm:$0xff]  ;;  %s7864_s7 = sshll.u32 %s12200_s13, 4 }
 0x890   : > { %s183_s28 = scalar_lea.vmem %s11757_s3, %s7864_s7  ;;  %s178_s30 = scalar_lea.vmem %s11756_s2, %s7864_s7 }
 0x892   : > { %6706 = vmatpush1.bf16.msra.mxu0 %v11597_v30  ;;  %6792 = vmatpush1.bf16.msra.mxu1 %v11602_v31 }
 0x895   : > { %6724 = vmatmul.mubr.bf16.vlgmr.msra.gmra.mrb[28].mxu0 %v6062_v14  ;;  %6810 = vmatmul.mubr.bf16.vlgmr.msra.gmra.mrb[28].mxu1 %v6062_v14 }
 0x968   : > { %v6725_v24 = vpop.f32.mrb[28].mxu0  ;;  %v6811_v58 = vpop.f32.mrb[28].mxu1 }
 0x969   : > { %v6820_v22 = vadd.f32 %v7751_v25, %v6725_v24  ;;  %v6727_v61 = vpop.f32.mrb[29].mxu0  ;;  %v6813_v34 = vpop.f32.mrb[29].mxu1  ;;  %v6822_v43 = vadd.f32 %v7753_v52, %v6811_v58 }
 0x96a   : > { %v6821_v60 = vadd.f32 %v7752_v57, %v6727_v61  ;;  %v6729_v3 = vpop.f32.mrb[30].mxu0  ;;  %v6815_v55 = vpop.f32.mrb[30].mxu1  ;;  %v6823_v0 = vadd.f32 %v7754_v46, %v6813_v34 }
 0x96b   : > { %v7857_v59 = vmul.f32 -1.442695, %v6820_v22  ;;  %v6824_v42 = vadd.f32 %v7755_v2, %v6729_v3  ;;  %v6731_v31 = vpop.f32.mrb[31].mxu0  ;;  %v6817_v33 = vpop.f32.mrb[31].mxu1  ;;  %v6826_v23 = vadd.f32 %v7757_v26, %v6815_v55 }
 0x96c   : > { %v7855_v27 = vmul.f32 -1.442695, %v6821_v60  ;;  %v6825_v11 = vadd.f32 %v7756_v54, %v6731_v31  ;;  %v7859_v20 = vmul.f32 -1.442695, %v6823_v0  ;;  %v6827_v4 = vadd.f32 %v7758_v47, %v6817_v33 }
 0x96d   : > { %8741 = vpow2.f32 %v7857_v59  ;;  %v7858_v30 = vmul.f32 -1.442695, %v6824_v42 }
 0x96e   : > { %8743 = vpow2.f32 %v7855_v27  ;;  %v7856_v51 = vmul.f32 -1.442695, %v6825_v11  ;;  %v7860_v17 = vmul.f32 -1.442695, %v6827_v4 }
 0x96f   : > { %8745 = vpow2.f32 %v7858_v30 }
 0x970   : > { %8747 = vpow2.f32 %v7856_v51 }
 0x971   : > { %8749 = vtanh.f32 %v6822_v43 }
 0x972   : > { %8751 = vpow2.f32 %v7859_v20 }
 0x973   : > { %8753 = vtanh.f32 %v6826_v23 }
 0x977   : > { %v8742_v18 = vpop.eup %8741 }
 0x978   : > { %v8744_v16 = vpop.eup %8743  ;;  %v6850_v15 = vadd.f32 1.0, %v8742_v18 }
 0x979   : > { %v6836_v50 = vadd.f32 1.0, %v8744_v16  ;;  %v8746_v10 = vpop.eup %8745 }
 0x97a   : > { %8755 = vrcp.f32 %v6850_v15  ;;  %v6851_v49 = vadd.f32 1.0, %v8746_v10  ;;  %v8748_v32 = vpop.eup %8747 }
 0x97b   : > { %8757 = vrcp.f32 %v6836_v50  ;;  %v6837_v63 = vadd.f32 1.0, %v8748_v32  ;;  %v8750_v6 = vpop.eup %8749 }
 0x97c   : > { %8759 = vpow2.f32 %v7860_v17  ;;  %v8752_v7 = vpop.eup %8751 }
 0x97d   : > { %8761 = vrcp.f32 %v6851_v49  ;;  %v8754_v8 = vpop.eup %8753  ;;  %v6868_v44 = vadd.f32 1.0, %v8752_v7 }
 0x97e   : > { %8763 = vrcp.f32 %v6837_v63 }
 0x97f   : > { %8765 = vrcp.f32 %v6868_v44 }
 0x984   : > { %v8756_v21 = vpop.eup %8755 }
 0x985   : > { %v8758_v1 = vpop.eup %8757  ;;  %v6858_v48 = vmul.f32 %v8756_v21, %v8750_v6 }
 0x986   : > { %v8760_v41 = vpop.eup %8759  ;;  %v6842_v9 = vmul.f32 %v8758_v1, %v11685_v13 }
 0x987   : > { %v8762_v45 = vpop.eup %8761  ;;  %v6869_v36 = vadd.f32 1.0, %v8760_v41 }
 0x988   : > { %v6860_v40 = vadd.f32 %v6858_v48, %v6842_v9  ;;  %v6859_v62 = vmul.f32 %v8762_v45, %v8754_v8  ;;  %v8764_v37 = vpop.eup %8763 }
 0x989   : > { %v6843_v38 = vmul.f32 %v8764_v37, %v11689_v12  ;;  %v8766_v14 = vpop.eup %8765 }
 0x98a   : > { %8767 = vtanh.f32 %v6860_v40  ;;  %6888 = vst [vmem:[%s183_s28] sm:$0xff] %v6860_v40 }
 0x98b   : > { %v6861_v35 = vadd.f32 %v6859_v62, %v6843_v38  ;;  %8769 = vrcp.f32 %v6869_v36 }
 0x98d   : > { %8771 = vtanh.f32 %v6861_v35  ;;  %6889 = vst [vmem:[%s183_s28 + $0x8] sm:$0xff] %v6861_v35 }
 0x994   : > { %v8768_v13 = vpop.eup %8767 }
 0x995   : > { %v6876_v53 = vmul.f32 %v8768_v13, %v8766_v14  ;;  %v8770_v19 = vpop.eup %8769 }
 0x997   : > { %6884 = vst [vmem:[%s178_s30] sm:$0xff] %v6876_v53  ;;  %v8772_v28 = vpop.eup %8771 }
 0x998   : > { %v6877_v39 = vmul.f32 %v8772_v28, %v8770_v19 }
 0x99a   : > { %6885 = vst [vmem:[%s178_s30 + $0x8] sm:$0xff] %v6877_v39 }
 0x99b PF: > { %s14_s12 = sadd.s32 1, %s8787_s12  }
 0x99c   : > { %p11_p4 = scmp.ge.s32.totalorder %s14_s12, 4  }
 0x99e   :  { %13 = sbr.rel (!%p11_p4) target bundleno = 1 (0x1), region = 77 }

</bundles_post_ra>
